<compile_context>
chip_gen: v7x
topology: tpu7x:2x2x1
jax: 0.10.0
libtpu: 0.0.40
codegen_flags: <defaults>
</compile_context>

<pallas_src>
import functools

import jax
import jax.numpy as jnp
from jax.experimental import pallas as pl
from jax.experimental.pallas import tpu as pltpu


LANE = 128


def _round_up(x, m):
    return ((x + m - 1) // m) * m


# ---------------------------------------------------------------------------
# Kernel
# ---------------------------------------------------------------------------
def _vae_kernel(x_ref, eps_ref,
                w1_ref, b1_ref,       # img_2hid          : (Dp, Hp) bf16, (1, Hp) f32
                w23_ref, b23_ref,     # hid_2mu || sigma  : (Hp, 2Zp) bf16, (1, 2Zp) f32
                w4_ref, b4_ref,       # z_2hid            : (Zp, Hp) bf16, (1, Hp) f32
                w5_ref, b5_ref,       # hid_2img          : (Hp, Dp) bf16, (1, Dp) f32
                xrec_ref, musig_ref,  # (TB, Dp) f32, (TB, 2Zp) f32
                *, z_pad):
    wd = w1_ref.dtype                                   # matmul operand dtype (bf16)

    # ---- encode -----------------------------------------------------------
    x = x_ref[...].astype(wd)
    h = jnp.dot(x, w1_ref[...], preferred_element_type=jnp.float32) + b1_ref[...]
    h = jnp.maximum(h, 0.0)                             # ReLU (f32 on the VPU)

    musig = (jnp.dot(h.astype(wd), w23_ref[...],
                     preferred_element_type=jnp.float32) + b23_ref[...])
    mu = musig[:, :z_pad]
    sigma = musig[:, z_pad:]

    # ---- reparametrize (f32 element-wise) ----------------------------------
    z = mu + sigma * eps_ref[...]

    # ---- decode -------------------------------------------------------------
    h2 = jnp.dot(z.astype(wd), w4_ref[...],
                 preferred_element_type=jnp.float32) + b4_ref[...]
    h2 = jnp.maximum(h2, 0.0)                           # ReLU
    logits = jnp.dot(h2.astype(wd), w5_ref[...],
                     preferred_element_type=jnp.float32) + b5_ref[...]

    xrec_ref[...] = jax.nn.sigmoid(logits)              # sigmoid on EUP, f32
    musig_ref[...] = musig


# ---------------------------------------------------------------------------
# Wrapper
# ---------------------------------------------------------------------------
@functools.partial(jax.jit, static_argnames=("block_b",))
def vae_forward(x, epsilon, packed, *, block_b=128):
    """x: (B, D) f32, epsilon: (B, Z) f32, packed: dict from pack_params."""
    B, D = x.shape
    Z = epsilon.shape[1]
    Dp, Hp = packed["w1"].shape
    Zp = packed["w23"].shape[1] // 2

    Bp = _round_up(B, block_b)
    xp = jnp.pad(x, ((0, Bp - B), (0, Dp - D)))
    ep = jnp.pad(epsilon, ((0, Bp - B), (0, Zp - Z)))

    grid = (pl.cdiv(Bp, block_b),)

    # x / eps / outputs tiled over batch; weights & biases pinned resident.
    batch_spec = lambda feat: pl.BlockSpec((block_b, feat), lambda i: (i, 0))
    resident = lambda shape: pl.BlockSpec(shape, lambda i: (0, 0))

    in_specs = [
        batch_spec(Dp),                       # x tile
        batch_spec(Zp),                       # epsilon tile
        resident((Dp, Hp)), resident((1, Hp)),          # w1, b1
        resident((Hp, 2 * Zp)), resident((1, 2 * Zp)),  # w23, b23
        resident((Zp, Hp)), resident((1, Hp)),          # w4, b4
        resident((Hp, Dp)), resident((1, Dp)),          # w5, b5
    ]
    out_specs = (batch_spec(Dp), batch_spec(2 * Zp))
    out_shape = (
        jax.ShapeDtypeStruct((Bp, Dp), jnp.float32),       # x_reconstructed (padded)
        jax.ShapeDtypeStruct((Bp, 2 * Zp), jnp.float32),   # mu || sigma (padded)
    )

    matmul_flops = 2 * Bp * (Dp * Hp + Hp * 2 * Zp + Zp * Hp + Hp * Dp)
    weight_bytes = 2 * (Dp * Hp + Hp * 2 * Zp + Zp * Hp + Hp * Dp)
    act_bytes = 4 * (Bp * Dp + Bp * Zp + Bp * Dp + Bp * 2 * Zp)
    bias_bytes = 4 * (Hp + 2 * Zp + Hp + Dp)

    xrec_p, musig_p = pl.pallas_call(
        functools.partial(_vae_kernel, z_pad=Zp),
        out_shape=out_shape,
        grid=grid,
        in_specs=in_specs,
        out_specs=out_specs,
        compiler_params=pltpu.CompilerParams(
            dimension_semantics=("parallel",),           # shard batch across TCs on v7x
            vmem_limit_bytes=32 * 1024 * 1024,
        ),
        cost_estimate=pl.CostEstimate(
            flops=matmul_flops,
            transcendentals=Bp * Dp,                     # sigmoid
            bytes_accessed=weight_bytes + act_bytes + bias_bytes,
        ),
    )(xp, ep,
      packed["w1"], packed["b1"],
      packed["w23"], packed["b23"],
      packed["w4"], packed["b4"],
      packed["w5"], packed["b5"])

    x_rec = xrec_p[:B, :D]
    mu = musig_p[:B, :Z]
    sigma = musig_p[:B, Zp:Zp + Z]
    return x_rec, mu, sigma


# ---------------------------------------------------------------------------
# Parameter handling
# ---------------------------------------------------------------------------
def init_params(key, input_dim, h_dim, z_dim):
    """Torch-style init: U(-1/sqrt(fan_in), 1/sqrt(fan_in)).

    Weights stored pre-transposed to (in, out); biases as (1, out)."""
    def linear(k, fan_in, fan_out):
        kw, kb = jax.random.split(k)
        bound = 1.0 / jnp.sqrt(float(fan_in))
        w = jax.random.uniform(kw, (fan_in, fan_out), jnp.float32, -bound, bound)
        b = jax.random.uniform(kb, (1, fan_out), jnp.float32, -bound, bound)
        return w, b

    k1, k2, k3, k4, k5 = jax.random.split(key, 5)
    w1, b1 = linear(k1, input_dim, h_dim)   # img_2hid
    w2, b2 = linear(k2, h_dim, z_dim)       # hid_2mu
    w3, b3 = linear(k3, h_dim, z_dim)       # hid_2sigma
    w4, b4 = linear(k4, z_dim, h_dim)       # z_2hid
    w5, b5 = linear(k5, h_dim, input_dim)   # hid_2img
    return dict(w1=w1, b1=b1, w2=w2, b2=b2, w3=w3, b3=b3,
                w4=w4, b4=b4, w5=w5, b5=b5)


def pack_params(params, *, compute_dtype=jnp.bfloat16):
    """Zero-pad all feature dims to multiples of 128, fuse mu/sigma weights,
    and cast weights to the MXU compute dtype (biases stay f32)."""
    D, H = params["w1"].shape
    Z = params["w2"].shape[1]
    Dp, Hp, Zp = _round_up(D, LANE), _round_up(H, LANE), _round_up(Z, LANE)

    def pad2(a, rows, cols):
        return jnp.pad(a, ((0, rows - a.shape[0]), (0, cols - a.shape[1])))

    w1 = pad2(params["w1"], Dp, Hp).astype(compute_dtype)
    b1 = pad2(params["b1"], 1, Hp)
    w23 = jnp.concatenate([pad2(params["w2"], Hp, Zp),
                           pad2(params["w3"], Hp, Zp)], axis=1).astype(compute_dtype)
    b23 = jnp.concatenate([pad2(params["b2"], 1, Zp),
                           pad2(params["b3"], 1, Zp)], axis=1)
    w4 = pad2(params["w4"], Zp, Hp).astype(compute_dtype)
    b4 = pad2(params["b4"], 1, Hp)
    w5 = pad2(params["w5"], Hp, Dp).astype(compute_dtype)
    b5 = pad2(params["b5"], 1, Dp)
    return dict(w1=w1, b1=b1, w23=w23, b23=b23, w4=w4, b4=b4, w5=w5, b5=b5)


def reference_forward(x, epsilon, p, compute_dtype=jnp.bfloat16):
    """Pure-JAX reference matching the PyTorch module semantics, using the
    same bf16-operand / f32-accumulation matmul recipe as the kernel."""
    def mm(a, w):
        return jnp.dot(a.astype(compute_dtype), w.astype(compute_dtype),
                       preferred_element_type=jnp.float32)
    h = jax.nn.relu(mm(x, p["w1"]) + p["b1"])
    mu = mm(h, p["w2"]) + p["b2"]
    sigma = mm(h, p["w3"]) + p["b3"]
    z = mu + sigma * epsilon
    h2 = jax.nn.relu(mm(z, p["w4"]) + p["b4"])
    x_rec = jax.nn.sigmoid(mm(h2, p["w5"]) + p["b5"])
    return x_rec, mu, sigma


if __name__ == "__main__":
    # Module-default sizes (MNIST-style VAE): input_dim=784, h_dim=200, z_dim=20.
    # Batch 256 so each grid step processes a 128-row tile (good MXU occupancy).
    B, INPUT_DIM, H_DIM, Z_DIM = 256, 784, 200, 20

    key = jax.random.PRNGKey(0)
    k_x, k_eps, k_params = jax.random.split(key, 3)

    x = jax.random.uniform(k_x, (B, INPUT_DIM), jnp.float32)      # "image" in [0,1)
    epsilon = jax.random.normal(k_eps, (B, Z_DIM), jnp.float32)   # torch.randn_like(sigma)
    params = init_params(k_params, INPUT_DIM, H_DIM, Z_DIM)
    packed = pack_params(params)

    x_rec, mu, sigma = vae_forward(x, epsilon, packed, block_b=128)
    jax.block_until_ready((x_rec, mu, sigma))

    # Sanity check against the pure-JAX reference (same bf16 matmul recipe).
    x_rec_ref, mu_ref, sigma_ref = reference_forward(x, epsilon, params)
    assert x_rec.shape == (B, INPUT_DIM) and mu.shape == (B, Z_DIM) and sigma.shape == (B, Z_DIM)
    assert jnp.allclose(x_rec, x_rec_ref, atol=2e-3, rtol=2e-3)
    assert jnp.allclose(mu, mu_ref, atol=2e-3, rtol=2e-3)
    assert jnp.allclose(sigma, sigma_ref, atol=2e-3, rtol=2e-3)

    print("KERNEL_OK")
</pallas_src>

<mosaic_0001>
module attributes {stable_mosaic.version = 11 : i64} {
  func.func @_vae_kernel(%arg0: i32, %arg1: memref<128x896xf32, #tpu.memory_space<vmem>>, %arg2: memref<128x128xf32, #tpu.memory_space<vmem>>, %arg3: memref<896x256xbf16, #tpu.memory_space<vmem>>, %arg4: memref<1x256xf32, #tpu.memory_space<vmem>>, %arg5: memref<256x256xbf16, #tpu.memory_space<vmem>>, %arg6: memref<1x256xf32, #tpu.memory_space<vmem>>, %arg7: memref<128x256xbf16, #tpu.memory_space<vmem>>, %arg8: memref<1x256xf32, #tpu.memory_space<vmem>>, %arg9: memref<256x896xbf16, #tpu.memory_space<vmem>>, %arg10: memref<1x896xf32, #tpu.memory_space<vmem>>, %arg11: memref<128x896xf32, #tpu.memory_space<vmem>>, %arg12: memref<128x256xf32, #tpu.memory_space<vmem>>) attributes {dimension_semantics = [#tpu.dimension_semantics<parallel>], iteration_bounds = array<i64: 2>, scalar_prefetch = 0 : i64, scratch_operands = 0 : i64, tpu.core_type = #tpu.core_type<tc>, window_params = [{transform_indices = @transform_0, window_bounds = array<i64: 128, 896>}, {transform_indices = @transform_1, window_bounds = array<i64: 128, 128>}, {pipeline_mode = #tpu.pipeline_mode<synchronous>, transform_indices = @transform_2, window_bounds = array<i64: 896, 256>}, {pipeline_mode = #tpu.pipeline_mode<synchronous>, transform_indices = @transform_3, window_bounds = array<i64: 1, 256>}, {pipeline_mode = #tpu.pipeline_mode<synchronous>, transform_indices = @transform_4, window_bounds = array<i64: 256, 256>}, {pipeline_mode = #tpu.pipeline_mode<synchronous>, transform_indices = @transform_5, window_bounds = array<i64: 1, 256>}, {pipeline_mode = #tpu.pipeline_mode<synchronous>, transform_indices = @transform_6, window_bounds = array<i64: 128, 256>}, {pipeline_mode = #tpu.pipeline_mode<synchronous>, transform_indices = @transform_7, window_bounds = array<i64: 1, 256>}, {pipeline_mode = #tpu.pipeline_mode<synchronous>, transform_indices = @transform_8, window_bounds = array<i64: 256, 896>}, {pipeline_mode = #tpu.pipeline_mode<synchronous>, transform_indices = @transform_9, window_bounds = array<i64: 1, 896>}, {transform_indices = @transform_10, window_bounds = array<i64: 128, 896>}, {transform_indices = @transform_11, window_bounds = array<i64: 128, 256>}]} {
    %c0 = arith.constant 0 : index
    %c0_0 = arith.constant 0 : index
    %0 = vector.load %arg1[%c0, %c0_0] : memref<128x896xf32, #tpu.memory_space<vmem>>, vector<128x896xf32>
    %1 = arith.truncf %0 : vector<128x896xf32> to vector<128x896xbf16>
    %c0_1 = arith.constant 0 : index
    %c0_2 = arith.constant 0 : index
    %2 = vector.load %arg3[%c0_1, %c0_2] : memref<896x256xbf16, #tpu.memory_space<vmem>>, vector<896x256xbf16>
    %cst = arith.constant dense<0.000000e+00> : vector<128x256xf32>
    %3 = tpu.matmul %1, %2, %cst {dimension_numbers = #tpu.dot_dimension_numbers<[1], [0], [0], [1], [0, 0, 1, 1], [], []>} : vector<128x896xbf16>, vector<896x256xbf16>, vector<128x256xf32> -> vector<128x256xf32>
    %c0_3 = arith.constant 0 : index
    %c0_4 = arith.constant 0 : index
    %4 = vector.load %arg4[%c0_3, %c0_4] : memref<1x256xf32, #tpu.memory_space<vmem>>, vector<1x256xf32>
    %5 = vector.broadcast %4 : vector<1x256xf32> to vector<128x256xf32>
    %6 = arith.addf %3, %5 : vector<128x256xf32>
    %cst_5 = arith.constant 0.000000e+00 : f32
    %7 = vector.broadcast %cst_5 : f32 to vector<128x256xf32>
    %8 = arith.maximumf %6, %7 : vector<128x256xf32>
    %9 = arith.truncf %8 : vector<128x256xf32> to vector<128x256xbf16>
    %c0_6 = arith.constant 0 : index
    %c0_7 = arith.constant 0 : index
    %10 = vector.load %arg5[%c0_6, %c0_7] : memref<256x256xbf16, #tpu.memory_space<vmem>>, vector<256x256xbf16>
    %cst_8 = arith.constant dense<0.000000e+00> : vector<128x256xf32>
    %11 = tpu.matmul %9, %10, %cst_8 {dimension_numbers = #tpu.dot_dimension_numbers<[1], [0], [0], [1], [0, 0, 1, 1], [], []>} : vector<128x256xbf16>, vector<256x256xbf16>, vector<128x256xf32> -> vector<128x256xf32>
    %c0_9 = arith.constant 0 : index
    %c0_10 = arith.constant 0 : index
    %12 = vector.load %arg6[%c0_9, %c0_10] : memref<1x256xf32, #tpu.memory_space<vmem>>, vector<1x256xf32>
    %13 = vector.broadcast %12 : vector<1x256xf32> to vector<128x256xf32>
    %14 = arith.addf %11, %13 : vector<128x256xf32>
    %15 = vector.extract_strided_slice %14 {offsets = [0, 0], sizes = [128, 128], strides = [1, 1]} : vector<128x256xf32> to vector<128x128xf32>
    %16 = vector.extract_strided_slice %14 {offsets = [0, 128], sizes = [128, 128], strides = [1, 1]} : vector<128x256xf32> to vector<128x128xf32>
    %c0_11 = arith.constant 0 : index
    %c0_12 = arith.constant 0 : index
    %17 = vector.load %arg2[%c0_11, %c0_12] : memref<128x128xf32, #tpu.memory_space<vmem>>, vector<128x128xf32>
    %18 = arith.mulf %16, %17 : vector<128x128xf32>
    %19 = arith.addf %15, %18 : vector<128x128xf32>
    %20 = arith.truncf %19 : vector<128x128xf32> to vector<128x128xbf16>
    %c0_13 = arith.constant 0 : index
    %c0_14 = arith.constant 0 : index
    %21 = vector.load %arg7[%c0_13, %c0_14] : memref<128x256xbf16, #tpu.memory_space<vmem>>, vector<128x256xbf16>
    %cst_15 = arith.constant dense<0.000000e+00> : vector<128x256xf32>
    %22 = tpu.matmul %20, %21, %cst_15 {dimension_numbers = #tpu.dot_dimension_numbers<[1], [0], [0], [1], [0, 0, 1, 1], [], []>} : vector<128x128xbf16>, vector<128x256xbf16>, vector<128x256xf32> -> vector<128x256xf32>
    %c0_16 = arith.constant 0 : index
    %c0_17 = arith.constant 0 : index
    %23 = vector.load %arg8[%c0_16, %c0_17] : memref<1x256xf32, #tpu.memory_space<vmem>>, vector<1x256xf32>
    %24 = vector.broadcast %23 : vector<1x256xf32> to vector<128x256xf32>
    %25 = arith.addf %22, %24 : vector<128x256xf32>
    %cst_18 = arith.constant 0.000000e+00 : f32
    %26 = vector.broadcast %cst_18 : f32 to vector<128x256xf32>
    %27 = arith.maximumf %25, %26 : vector<128x256xf32>
    %28 = arith.truncf %27 : vector<128x256xf32> to vector<128x256xbf16>
    %c0_19 = arith.constant 0 : index
    %c0_20 = arith.constant 0 : index
    %29 = vector.load %arg9[%c0_19, %c0_20] : memref<256x896xbf16, #tpu.memory_space<vmem>>, vector<256x896xbf16>
    %cst_21 = arith.constant dense<0.000000e+00> : vector<128x896xf32>
    %30 = tpu.matmul %28, %29, %cst_21 {dimension_numbers = #tpu.dot_dimension_numbers<[1], [0], [0], [1], [0, 0, 1, 1], [], []>} : vector<128x256xbf16>, vector<256x896xbf16>, vector<128x896xf32> -> vector<128x896xf32>
    %c0_22 = arith.constant 0 : index
    %c0_23 = arith.constant 0 : index
    %31 = vector.load %arg10[%c0_22, %c0_23] : memref<1x896xf32, #tpu.memory_space<vmem>>, vector<1x896xf32>
    %32 = vector.broadcast %31 : vector<1x896xf32> to vector<128x896xf32>
    %33 = arith.addf %30, %32 : vector<128x896xf32>
    %34 = arith.negf %33 : vector<128x896xf32>
    %35 = math.exp %34 : vector<128x896xf32>
    %cst_24 = arith.constant 1.000000e+00 : f32
    %36 = vector.broadcast %cst_24 : f32 to vector<128x896xf32>
    %37 = arith.addf %36, %35 : vector<128x896xf32>
    %38 = arith.divf %36, %37 : vector<128x896xf32>
    %c0_25 = arith.constant 0 : index
    %c0_26 = arith.constant 0 : index
    %39 = vector.load %arg11[%c0_25, %c0_26] : memref<128x896xf32, #tpu.memory_space<vmem>>, vector<128x896xf32>
    tpu.vector_store %arg11[%c0_25, %c0_26], %38 {strides = array<i32>} : memref<128x896xf32, #tpu.memory_space<vmem>>, vector<128x896xf32>,
    %c0_27 = arith.constant 0 : index
    %c0_28 = arith.constant 0 : index
    %40 = vector.load %arg12[%c0_27, %c0_28] : memref<128x256xf32, #tpu.memory_space<vmem>>, vector<128x256xf32>
    tpu.vector_store %arg12[%c0_27, %c0_28], %14 {strides = array<i32>} : memref<128x256xf32, #tpu.memory_space<vmem>>, vector<128x256xf32>,
    return
  }
  func.func @transform_0(%arg0: i32) -> (i32, i32) {
    %c0_i32 = arith.constant 0 : i32
    %c0_i32_0 = arith.constant 0 : i32
    return %arg0, %c0_i32 : i32, i32
  }
  func.func @transform_1(%arg0: i32) -> (i32, i32) {
    %c0_i32 = arith.constant 0 : i32
    %c0_i32_0 = arith.constant 0 : i32
    return %arg0, %c0_i32 : i32, i32
  }
  func.func @transform_2(%arg0: i32) -> (i32, i32) {
    %c0_i32 = arith.constant 0 : i32
    %c0_i32_0 = arith.constant 0 : i32
    %c0_i32_1 = arith.constant 0 : i32
    return %c0_i32, %c0_i32_0 : i32, i32
  }
  func.func @transform_3(%arg0: i32) -> (i32, i32) {
    %c0_i32 = arith.constant 0 : i32
    %c0_i32_0 = arith.constant 0 : i32
    %c0_i32_1 = arith.constant 0 : i32
    return %c0_i32, %c0_i32_0 : i32, i32
  }
  func.func @transform_4(%arg0: i32) -> (i32, i32) {
    %c0_i32 = arith.constant 0 : i32
    %c0_i32_0 = arith.constant 0 : i32
    %c0_i32_1 = arith.constant 0 : i32
    return %c0_i32, %c0_i32_0 : i32, i32
  }
  func.func @transform_5(%arg0: i32) -> (i32, i32) {
    %c0_i32 = arith.constant 0 : i32
    %c0_i32_0 = arith.constant 0 : i32
    %c0_i32_1 = arith.constant 0 : i32
    return %c0_i32, %c0_i32_0 : i32, i32
  }
  func.func @transform_6(%arg0: i32) -> (i32, i32) {
    %c0_i32 = arith.constant 0 : i32
    %c0_i32_0 = arith.constant 0 : i32
    %c0_i32_1 = arith.constant 0 : i32
    return %c0_i32, %c0_i32_0 : i32, i32
  }
  func.func @transform_7(%arg0: i32) -> (i32, i32) {
    %c0_i32 = arith.constant 0 : i32
    %c0_i32_0 = arith.constant 0 : i32
    %c0_i32_1 = arith.constant 0 : i32
    return %c0_i32, %c0_i32_0 : i32, i32
  }
  func.func @transform_8(%arg0: i32) -> (i32, i32) {
    %c0_i32 = arith.constant 0 : i32
    %c0_i32_0 = arith.constant 0 : i32
    %c0_i32_1 = arith.constant 0 : i32
    return %c0_i32, %c0_i32_0 : i32, i32
  }
  func.func @transform_9(%arg0: i32) -> (i32, i32) {
    %c0_i32 = arith.constant 0 : i32
    %c0_i32_0 = arith.constant 0 : i32
    %c0_i32_1 = arith.constant 0 : i32
    return %c0_i32, %c0_i32_0 : i32, i32
  }
  func.func @transform_10(%arg0: i32) -> (i32, i32) {
    %c0_i32 = arith.constant 0 : i32
    %c0_i32_0 = arith.constant 0 : i32
    return %arg0, %c0_i32 : i32, i32
  }
  func.func @transform_11(%arg0: i32) -> (i32, i32) {
    %c0_i32 = arith.constant 0 : i32
    %c0_i32_0 = arith.constant 0 : i32
    return %arg0, %c0_i32 : i32, i32
  }
}

</mosaic_0001>

<bundles_post_ra>
// kernel: vae_forward.1
= control target key start
LH: loop header
LB: loop body
LE: loop exit
PB: predicated region body
PF: predicated region fallthrough
CT: control target
= control target key end

     0   :  { %s6048_s17 = smov 0   ;;  %s7839_s0 = inlined_call_operand.vmem [shape: f32[256,896], index: 0, kind: input, shape index: {}]   ;;  %s7840_s1 = inlined_call_operand.vmem [shape: f32[256,128], index: 1, kind: input, shape index: {}]   ;;  %s7841_s2 = inlined_call_operand.vmem [shape: bf16[896,256], index: 2, kind: input, shape index: {}]   ;;  %s7842_s3 = inlined_call_operand.vmem [shape: f32[1,256], index: 3, kind: input, shape index: {}]   ;;  %s7843_s4 = inlined_call_operand.vmem [shape: bf16[256,256], index: 4, kind: input, shape index: {}]   ;;  %s7844_s5 = inlined_call_operand.vmem [shape: f32[1,256], index: 5, kind: input, shape index: {}]   ;;  %s7845_s6 = inlined_call_operand.vmem [shape: bf16[128,256], index: 6, kind: input, shape index: {}]   ;;  %s7846_s7 = inlined_call_operand.vmem [shape: f32[1,256], index: 7, kind: input, shape index: {}]   ;;  %s7847_s8 = inlined_call_operand.vmem [shape: bf16[256,896], index: 8, kind: input, shape index: {}]   ;;  %s7848_s9 = inlined_call_operand.vmem [shape: f32[1,896], index: 9, kind: input, shape index: {}]   ;;  %s7849_s10 = inlined_call_operand.vmem [shape: f32[256,896], index: 10, kind: output, shape index: {0}]   ;;  %s7850_s11 = inlined_call_operand.vmem [shape: f32[256,256], index: 11, kind: output, shape index: {1}]  }
   0x1 LB: > { %s4527_s18 = sadd.s32 4294967295, %s5985_s17   ;;  %p4531_p0 = scmp.ge.s32.totalorder %s5985_s17, 1  ;;  %s5985_s17 = sphi %s6048_s17, %s22_s17  }
   0x2   : > { %p353_p1 = scmp.lt.s32.totalorder %s5985_s17, 3 }
   0x4   : > { %p354_p2 = pnand %p4531_p0, %p353_p1 }
   0x5   : > { %v5130_v0 = vld [vmem:[%s7841_s2 + $0x4] ss:$8 sps:$4 sm:$0xff] (!%p354_p2)   ;;  %v5132_v1 = vld [vmem:[%s7841_s2] ss:$8 sps:$4 sm:$0xff] (!%p354_p2)   ;;  %v5133_v2 = vld [vmem:[%s7841_s2 + $0x14] ss:$8 sps:$4 sm:$0xff] (!%p354_p2)  }
   0x6   : > { %357 = sbr.rel (%p354_p2) target bundleno = 1388 (0x56c), region = 60  ;;  %1286 = vmatprep.subr.bf16.mxu0 (!%p354_p2), %v5130_v0  ;;  %v5135_v3 = vld [vmem:[%s7841_s2 + $0x10] ss:$8 sps:$4 sm:$0xff] (!%p354_p2)   ;;  %s4532_s27 = sshll.u32 (!%p354_p2), %s4527_s18, 4  ;;  %v5136_v4 = vld [vmem:[%s7841_s2 + $0x24] ss:$8 sps:$4 sm:$0xff] (!%p354_p2)  }
   0x7   : > { %1287 = vmatpush1.bf16.msra.mxu0 (!%p354_p2), %v5132_v1  ;;  %p407_p3 = scmp.lt.s32.totalorder (!%p354_p2), %s4532_s27, 31  ;;  %v5138_v5 = vld [vmem:[%s7841_s2 + $0x20] ss:$8 sps:$4 sm:$0xff] (!%p354_p2)   ;;  %v5139_v6 = vld [vmem:[%s7841_s2 + $0x34] ss:$8 sps:$4 sm:$0xff] (!%p354_p2)  }
   0x8   : > { %1288 = vmatprep.subr.bf16.mxu0 (!%p354_p2), %v5133_v2  ;;  %v5141_v7 = vld [vmem:[%s7841_s2 + $0x30] ss:$8 sps:$4 sm:$0xff] (!%p354_p2)   ;;  %v5142_v8 = vld [vmem:[%s7841_s2 + $0x44] ss:$8 sps:$4 sm:$0xff] (!%p354_p2)   ;;  %v5144_v9 = vld [vmem:[%s7841_s2 + $0x40] ss:$8 sps:$4 sm:$0xff] (!%p354_p2)  }
   0x9   : > { %v5145_v10 = vld [vmem:[%s7841_s2 + $0x54] ss:$8 sps:$4 sm:$0xff] (!%p354_p2)   ;;  %v5147_v11 = vld [vmem:[%s7841_s2 + $0x50] ss:$8 sps:$4 sm:$0xff] (!%p354_p2)   ;;  %v5148_v12 = vld [vmem:[%s7841_s2 + $0x64] ss:$8 sps:$4 sm:$0xff] (!%p354_p2)  }
   0xa   : > { %v5150_v16 = vld [vmem:[%s7841_s2 + $0x60] ss:$8 sps:$4 sm:$0xff] (!%p354_p2)   ;;  %v5151_v17 = vld [vmem:[%s7841_s2 + $0x74] ss:$8 sps:$4 sm:$0xff] (!%p354_p2)   ;;  %v5153_v18 = vld [vmem:[%s7841_s2 + $0x70] ss:$8 sps:$4 sm:$0xff] (!%p354_p2)  }
   0xb   : > { %1289 = vmatpush1.bf16.msra.mxu0 (!%p354_p2), %v5135_v3  ;;  %v5154_v19 = vld [vmem:[%s7841_s2 + $0x84] ss:$8 sps:$4 sm:$0xff] (!%p354_p2)   ;;  %v5156_v20 = vld [vmem:[%s7841_s2 + $0x80] ss:$8 sps:$4 sm:$0xff] (!%p354_p2)   ;;  %v5157_v21 = vld [vmem:[%s7841_s2 + $0x94] ss:$8 sps:$4 sm:$0xff] (!%p354_p2)  }
   0xc   : > { %1290 = vmatprep.subr.bf16.mxu0 (!%p354_p2), %v5136_v4  ;;  %v5159_v22 = vld [vmem:[%s7841_s2 + $0x90] ss:$8 sps:$4 sm:$0xff] (!%p354_p2)   ;;  %v5160_v23 = vld [vmem:[%s7841_s2 + $0xa4] ss:$8 sps:$4 sm:$0xff] (!%p354_p2)   ;;  %v5162_v24 = vld [vmem:[%s7841_s2 + $0xa0] ss:$8 sps:$4 sm:$0xff] (!%p354_p2)  }
   0xd   : > { %s7852_s27 = smov (!%p407_p3, %s4532_s27), 31  ;;  %v5163_v25 = vld [vmem:[%s7841_s2 + $0xb4] ss:$8 sps:$4 sm:$0xff]   ;;  %v5165_v26 = vld [vmem:[%s7841_s2 + $0xb0] ss:$8 sps:$4 sm:$0xff]  }
   0xe   : > { %s5120_s20 = smul.u32 56, %s7852_s27  ;;  %v5166_v27 = vld [vmem:[%s7841_s2 + $0xc4] ss:$8 sps:$4 sm:$0xff]   ;;  %v5168_v28 = vld [vmem:[%s7841_s2 + $0xc0] ss:$8 sps:$4 sm:$0xff]   ;;  %s4927_s21 = sshll.u32 %s7852_s27, 4 }
   0xf   : > { %1291 = vmatpush1.bf16.msra.mxu0 %v5138_v5  ;;  %v5169_v29 = vld [vmem:[%s7841_s2 + $0xd4] ss:$8 sps:$4 sm:$0xff]   ;;  %v5171_v30 = vld [vmem:[%s7841_s2 + $0xd0] ss:$8 sps:$4 sm:$0xff]   ;;  %v5172_v31 = vld [vmem:[%s7841_s2 + $0xe4] ss:$8 sps:$4 sm:$0xff]   ;;  %s6822_s29 = scalar_lea.vmem %s7850_s11, %s4927_s21 }
  0x10   : > { %1292 = vmatprep.subr.bf16.mxu0 %v5139_v6  ;;  %s6097_s28 = scalar_lea.vmem %s7839_s0, %s5120_s20  ;;  %v5174_v32 = vld [vmem:[%s7841_s2 + $0xe0] ss:$8 sps:$4 sm:$0xff]   ;;  %v5175_v33 = vld [vmem:[%s7841_s2 + $0xf4] ss:$8 sps:$4 sm:$0xff]   ;;  %v5177_v34 = vld [vmem:[%s7841_s2 + $0xf0] ss:$8 sps:$4 sm:$0xff]   ;;  %s7347_s14 = scalar_lea.vmem %s7849_s10, %s5120_s20 }
  0x11   : > { %v435_v13 = vld [vmem:[%s6097_s28 + $0x8] sm:$0xff]  ;;  %v442_v14 = vld [vmem:[%s6097_s28 + $0x40] sm:$0xff]  ;;  %v441_v36 = vld [vmem:[%s6097_s28 + $0x38] sm:$0xff] }
  0x12   : > { %v547_v15 = vpack.c.bf16 %v442_v14, %v435_v13  ;;  %v434_v35 = vld [vmem:[%s6097_s28] sm:$0xff]  ;;  %v449_v38 = vld [vmem:[%s6097_s28 + $0x78] sm:$0xff]  ;;  %v456_v39 = vld [vmem:[%s6097_s28 + $0xb0] sm:$0xff] }
  0x13   : > { %1293 = vmatpush1.bf16.msra.mxu0 %v5141_v7  ;;  %v5180_v37 = vld [vmem:[%s7841_s2 + $0x104] ss:$8 sps:$4 sm:$0xff]   ;;  %v546_v40 = vpack.c.bf16 %v441_v36, %v434_v35  ;;  %v5178_v41 = vld [vmem:[%s7841_s2 + $0x100] ss:$8 sps:$4 sm:$0xff]   ;;  %v554_v42 = vpack.c.bf16 %v456_v39, %v449_v38  ;;  %v5183_v43 = vld [vmem:[%s7841_s2 + $0x114] ss:$8 sps:$4 sm:$0xff]  }
  0x14   : > { %1294 = vmatprep.subr.bf16.mxu0 %v5142_v8  ;;  %1318 = vmatprep.mubr.bf16.mxu0 %v547_v15  ;;  %v5181_v44 = vld [vmem:[%s7841_s2 + $0x110] ss:$8 sps:$4 sm:$0xff]   ;;  %v455_v46 = vld [vmem:[%s6097_s28 + $0xa8] sm:$0xff]  ;;  %v470_v49 = vld [vmem:[%s6097_s28 + $0x120] sm:$0xff] }
  0x15   : > { %v448_v45 = vld [vmem:[%s6097_s28 + $0x70] sm:$0xff]  ;;  %v5186_v47 = vld [vmem:[%s7841_s2 + $0x124] ss:$8 sps:$4 sm:$0xff]   ;;  %v5184_v51 = vld [vmem:[%s7841_s2 + $0x120] ss:$8 sps:$4 sm:$0xff]  }
  0x16   : > { %v463_v48 = vld [vmem:[%s6097_s28 + $0xe8] sm:$0xff]  ;;  %v553_v50 = vpack.c.bf16 %v455_v46, %v448_v45  ;;  %v5189_v53 = vld [vmem:[%s7841_s2 + $0x134] ss:$8 sps:$4 sm:$0xff]   ;;  %v5187_v54 = vld [vmem:[%s7841_s2 + $0x130] ss:$8 sps:$4 sm:$0xff]  }
  0x17   : > { %1295 = vmatpush1.bf16.msra.mxu0 %v5144_v9  ;;  %v561_v52 = vpack.c.bf16 %v470_v49, %v463_v48  ;;  %v462_v55 = vld [vmem:[%s6097_s28 + $0xe0] sm:$0xff]  ;;  %v469_v56 = vld [vmem:[%s6097_s28 + $0x118] sm:$0xff]  ;;  %v484_v59 = vld [vmem:[%s6097_s28 + $0x190] sm:$0xff] }
  0x18   : > { %1296 = vmatprep.subr.bf16.mxu0 %v5145_v10  ;;  %v5192_v57 = vld [vmem:[%s7841_s2 + $0x144] ss:$8 sps:$4 sm:$0xff]   ;;  %v477_v58 = vld [vmem:[%s6097_s28 + $0x158] sm:$0xff]  ;;  %v560_v60 = vpack.c.bf16 %v469_v56, %v462_v55  ;;  %v5190_v61 = vld [vmem:[%s7841_s2 + $0x140] ss:$8 sps:$4 sm:$0xff]  }
  0x19   : > { %v568_v62 = vpack.c.bf16 %v484_v59, %v477_v58  ;;  %v5195_v63 = vld [vmem:[%s7841_s2 + $0x154] ss:$8 sps:$4 sm:$0xff]   ;;  %v5193_v0 = vld [vmem:[%s7841_s2 + $0x150] ss:$8 sps:$4 sm:$0xff]   ;;  %v483_v2 = vld [vmem:[%s6097_s28 + $0x188] sm:$0xff] }
  0x1a   : > { %v476_v1 = vld [vmem:[%s6097_s28 + $0x150] sm:$0xff]  ;;  %v5198_v3 = vld [vmem:[%s7841_s2 + $0x164] ss:$8 sps:$4 sm:$0xff]   ;;  %v5196_v7 = vld [vmem:[%s7841_s2 + $0x160] ss:$8 sps:$4 sm:$0xff]  }
  0x1b   : > { %1297 = vmatpush1.bf16.msra.mxu0 %v5147_v11  ;;  %v491_v4 = vld [vmem:[%s6097_s28 + $0x1c8] sm:$0xff]  ;;  %v498_v5 = vld [vmem:[%s6097_s28 + $0x200] sm:$0xff]  ;;  %v567_v6 = vpack.c.bf16 %v483_v2, %v476_v1  ;;  %v5201_v9 = vld [vmem:[%s7841_s2 + $0x174] ss:$8 sps:$4 sm:$0xff]  }
  0x1c   : > { %1298 = vmatprep.subr.bf16.mxu0 %v5148_v12  ;;  %v575_v8 = vpack.c.bf16 %v498_v5, %v491_v4  ;;  %v5199_v10 = vld [vmem:[%s7841_s2 + $0x170] ss:$8 sps:$4 sm:$0xff]   ;;  %v490_v11 = vld [vmem:[%s6097_s28 + $0x1c0] sm:$0xff]  ;;  %v5219_v38 = vld [vmem:[%s7841_s2 + $0x1d4] ss:$8 sps:$4 sm:$0xff]  }
  0x1d   : > { %v497_v12 = vld [vmem:[%s6097_s28 + $0x1f8] sm:$0xff]  ;;  %v5204_v13 = vld [vmem:[%s7841_s2 + $0x184] ss:$8 sps:$4 sm:$0xff]   ;;  %v512_v15 = vld [vmem:[%s6097_s28 + $0x270] sm:$0xff] }
  0x1e   : > { %v505_v14 = vld [vmem:[%s6097_s28 + $0x238] sm:$0xff]  ;;  %v540_v35 = vld [vmem:[%s6097_s28 + $0x350] sm:$0xff]  ;;  %v5214_v36 = vld [vmem:[%s7841_s2 + $0x1c0] ss:$8 sps:$4 sm:$0xff]  }
  0x1f   : > { %1299 = vmatpush1.bf16.msra.mxu0 %v5150_v16  ;;  %v574_v16 = vpack.c.bf16 %v497_v12, %v490_v11  ;;  %v444_v45 = vld [vmem:[%s6097_s28 + $0x50] sm:$0xff]  ;;  %v5220_v46 = vld [vmem:[%s7841_s2 + $0x1e0] ss:$8 sps:$4 sm:$0xff]  }
  0x20   : > { %1300 = vmatprep.subr.bf16.mxu0 %v5151_v17  ;;  %v5202_v17 = vld [vmem:[%s7841_s2 + $0x180] ss:$8 sps:$4 sm:$0xff]   ;;  %v5225_v48 = vld [vmem:[%s7841_s2 + $0x1f4] ss:$8 sps:$4 sm:$0xff]  }
  0x21   : > { %v458_v55 = vld [vmem:[%s6097_s28 + $0xc0] sm:$0xff]  ;;  %v5231_v58 = vld [vmem:[%s7841_s2 + $0x214] ss:$8 sps:$4 sm:$0xff]  }
  0x22   : > { %v5226_v56 = vld [vmem:[%s7841_s2 + $0x200] ss:$8 sps:$4 sm:$0xff]   ;;  %v472_v1 = vld [vmem:[%s6097_s28 + $0x130] sm:$0xff] }
  0x23   : > { %1301 = vmatpush1.bf16.msra.mxu0 %v5153_v18  ;;  %v582_v18 = vpack.c.bf16 %v512_v15, %v505_v14  ;;  %v5232_v2 = vld [vmem:[%s7841_s2 + $0x220] ss:$8 sps:$4 sm:$0xff]   ;;  %v5237_v4 = vld [vmem:[%s7841_s2 + $0x234] ss:$8 sps:$4 sm:$0xff]  }
  0x24   : > { %1302 = vmatprep.subr.bf16.mxu0 %v5154_v19  ;;  %v5207_v19 = vld [vmem:[%s7841_s2 + $0x194] ss:$8 sps:$4 sm:$0xff]   ;;  %v486_v11 = vld [vmem:[%s6097_s28 + $0x1a0] sm:$0xff] }
  0x25   : > { %v5238_v12 = vld [vmem:[%s7841_s2 + $0x240] ss:$8 sps:$4 sm:$0xff]   ;;  %v5243_v14 = vld [vmem:[%s7841_s2 + $0x254] ss:$8 sps:$4 sm:$0xff]  }
  0x27   : > { %1303 = vmatpush1.bf16.msra.mxu0 %v5156_v20  ;;  %v5205_v20 = vld [vmem:[%s7841_s2 + $0x190] ss:$8 sps:$4 sm:$0xff]  }
  0x28   : > { %1304 = vmatprep.subr.bf16.mxu0 %v5157_v21  ;;  %v504_v21 = vld [vmem:[%s6097_s28 + $0x230] sm:$0xff] }
  0x2b   : > { %1305 = vmatpush1.bf16.msra.mxu0 %v5159_v22  ;;  %v511_v22 = vld [vmem:[%s6097_s28 + $0x268] sm:$0xff] }
  0x2c   : > { %1306 = vmatprep.subr.bf16.mxu0 %v5160_v23  ;;  %v5210_v23 = vld [vmem:[%s7841_s2 + $0x1a4] ss:$8 sps:$4 sm:$0xff]  }
  0x2f   : > { %1307 = vmatpush1.bf16.msra.mxu0 %v5162_v24  ;;  %v519_v24 = vld [vmem:[%s6097_s28 + $0x2a8] sm:$0xff] }
  0x30   : > { %1308 = vmatprep.subr.bf16.mxu0 %v5163_v25  ;;  %v526_v25 = vld [vmem:[%s6097_s28 + $0x2e0] sm:$0xff] }
  0x33   : > { %1309 = vmatpush1.bf16.msra.mxu0 %v5165_v26  ;;  %v5208_v26 = vld [vmem:[%s7841_s2 + $0x1a0] ss:$8 sps:$4 sm:$0xff]  }
  0x34   : > { %1310 = vmatprep.subr.bf16.mxu0 %v5166_v27  ;;  %v581_v27 = vpack.c.bf16 %v511_v22, %v504_v21  ;;  %v500_v21 = vld [vmem:[%s6097_s28 + $0x210] sm:$0xff]  ;;  %v5244_v22 = vld [vmem:[%s7841_s2 + $0x260] ss:$8 sps:$4 sm:$0xff]  }
  0x37   : > { %1311 = vmatpush1.bf16.msra.mxu0 %v5168_v28  ;;  %v5213_v28 = vld [vmem:[%s7841_s2 + $0x1b4] ss:$8 sps:$4 sm:$0xff]  }
  0x38   : > { %1312 = vmatprep.subr.bf16.mxu0 %v5169_v29  ;;  %v589_v29 = vpack.c.bf16 %v526_v25, %v519_v24  ;;  %v5249_v24 = vld [vmem:[%s7841_s2 + $0x274] ss:$8 sps:$4 sm:$0xff]  }
  0x3b   : > { %1313 = vmatpush1.bf16.msra.mxu0 %v5171_v30  ;;  %v5211_v30 = vld [vmem:[%s7841_s2 + $0x1b0] ss:$8 sps:$4 sm:$0xff]  }
  0x3c   : > { %1314 = vmatprep.subr.bf16.mxu0 %v5172_v31  ;;  %v518_v31 = vld [vmem:[%s6097_s28 + $0x2a0] sm:$0xff] }
  0x3f   : > { %1315 = vmatpush1.bf16.msra.mxu0 %v5174_v32  ;;  %v525_v32 = vld [vmem:[%s6097_s28 + $0x2d8] sm:$0xff] }
  0x40   : > { %1316 = vmatprep.subr.bf16.mxu0 %v5175_v33  ;;  %v5216_v33 = vld [vmem:[%s7841_s2 + $0x1c4] ss:$8 sps:$4 sm:$0xff]  }
  0x43   : > { %1317 = vmatpush1.bf16.msra.mxu0 %v5177_v34  ;;  %v533_v34 = vld [vmem:[%s6097_s28 + $0x318] sm:$0xff] }
  0x44   : > { %1399 = vmatprep.subr.bf16.mxu0 %v5180_v37  ;;  %v588_v37 = vpack.c.bf16 %v525_v32, %v518_v31  ;;  %v596_v39 = vpack.c.bf16 %v540_v35, %v533_v34  ;;  %v514_v31 = vld [vmem:[%s6097_s28 + $0x280] sm:$0xff]  ;;  %v5255_v34 = vld [vmem:[%s7841_s2 + $0x294] ss:$8 sps:$4 sm:$0xff]  }
  0x45   : > { %v5250_v32 = vld [vmem:[%s7841_s2 + $0x280] ss:$8 sps:$4 sm:$0xff]  }
  0x46   : > { %1319 = vmatmul.mubr.bf16.vlgmr.msra.gmra.mrb[0].mxu0 %v546_v40  ;;  %v5217_v40 = vld [vmem:[%s7841_s2 + $0x1d0] ss:$8 sps:$4 sm:$0xff]  }
  0x47   : > { %1400 = vmatpush1.bf16.msra.mxu0 %v5178_v41  ;;  %1328 = vmatprep.mubr.bf16.mxu0 %v554_v42  ;;  %v532_v41 = vld [vmem:[%s6097_s28 + $0x310] sm:$0xff]  ;;  %v539_v42 = vld [vmem:[%s6097_s28 + $0x348] sm:$0xff] }
  0x48   : > { %1401 = vmatprep.subr.bf16.mxu0 %v5183_v43  ;;  %v5222_v43 = vld [vmem:[%s7841_s2 + $0x1e4] ss:$8 sps:$4 sm:$0xff]  }
  0x4b   : > { %1402 = vmatpush1.bf16.msra.mxu0 %v5181_v44  ;;  %v437_v44 = vld [vmem:[%s6097_s28 + $0x18] sm:$0xff] }
  0x4c   : > { %1403 = vmatprep.subr.bf16.mxu0 %v5186_v47  ;;  %v595_v47 = vpack.c.bf16 %v539_v42, %v532_v41  ;;  %v549_v49 = vpack.c.bf16 %v444_v45, %v437_v44  ;;  %v528_v41 = vld [vmem:[%s6097_s28 + $0x2f0] sm:$0xff]  ;;  %v5256_v42 = vld [vmem:[%s7841_s2 + $0x2a0] ss:$8 sps:$4 sm:$0xff]  }
  0x4d   : > { %v5261_v44 = vld [vmem:[%s7841_s2 + $0x2b4] ss:$8 sps:$4 sm:$0xff]  }
  0x4e   : > { %1329 = vmatmul.mubr.bf16.gmra.mrb[4].mxu0 %v553_v50  ;;  %v5223_v50 = vld [vmem:[%s7841_s2 + $0x1f0] ss:$8 sps:$4 sm:$0xff]  }
  0x4f   : > { %1404 = vmatpush1.bf16.msra.mxu0 %v5184_v51  ;;  %1338 = vmatprep.mubr.bf16.mxu0 %v561_v52  ;;  %v436_v51 = vld [vmem:[%s6097_s28 + $0x10] sm:$0xff]  ;;  %v443_v52 = vld [vmem:[%s6097_s28 + $0x48] sm:$0xff] }
  0x50   : > { %1405 = vmatprep.subr.bf16.mxu0 %v5189_v53  ;;  %v5228_v53 = vld [vmem:[%s7841_s2 + $0x204] ss:$8 sps:$4 sm:$0xff]  }
  0x53   : > { %1406 = vmatpush1.bf16.msra.mxu0 %v5187_v54  ;;  %v451_v54 = vld [vmem:[%s6097_s28 + $0x88] sm:$0xff] }
  0x54   : > { %1407 = vmatprep.subr.bf16.mxu0 %v5192_v57  ;;  %v548_v57 = vpack.c.bf16 %v443_v52, %v436_v51  ;;  %v556_v59 = vpack.c.bf16 %v458_v55, %v451_v54  ;;  %v542_v51 = vld [vmem:[%s6097_s28 + $0x360] sm:$0xff]  ;;  %v5267_v55 = vld [vmem:[%s7841_s2 + $0x2d4] ss:$8 sps:$4 sm:$0xff]  }
  0x56   : > { %1339 = vmatmul.mubr.bf16.gmra.mrb[8].mxu0 %v560_v60  ;;  %v5229_v60 = vld [vmem:[%s7841_s2 + $0x210] ss:$8 sps:$4 sm:$0xff]  }
  0x57   : > { %1408 = vmatpush1.bf16.msra.mxu0 %v5190_v61  ;;  %1348 = vmatprep.mubr.bf16.mxu0 %v568_v62  ;;  %v450_v61 = vld [vmem:[%s6097_s28 + $0x80] sm:$0xff]  ;;  %v457_v62 = vld [vmem:[%s6097_s28 + $0xb8] sm:$0xff] }
  0x58   : > { %1409 = vmatprep.subr.bf16.mxu0 %v5195_v63  ;;  %v5234_v63 = vld [vmem:[%s7841_s2 + $0x224] ss:$8 sps:$4 sm:$0xff]  }
  0x5b   : > { %1410 = vmatpush1.bf16.msra.mxu0 %v5193_v0  ;;  %v465_v0 = vld [vmem:[%s6097_s28 + $0xf8] sm:$0xff] }
  0x5c   : > { %1411 = vmatprep.subr.bf16.mxu0 %v5198_v3  ;;  %v555_v3 = vpack.c.bf16 %v457_v62, %v450_v61  ;;  %v563_v5 = vpack.c.bf16 %v472_v1, %v465_v0  ;;  %v446_v61 = vld [vmem:[%s6097_s28 + $0x60] sm:$0xff]  ;;  %v5273_v1 = vld [vmem:[%s7841_s2 + $0x2f4] ss:$8 sps:$4 sm:$0xff]  }
  0x5e   : > { %1349 = vmatmul.mubr.bf16.gmra.mrb[12].mxu0 %v567_v6  ;;  %v5235_v6 = vld [vmem:[%s7841_s2 + $0x230] ss:$8 sps:$4 sm:$0xff]  }
  0x5f   : > { %1412 = vmatpush1.bf16.msra.mxu0 %v5196_v7  ;;  %1358 = vmatprep.mubr.bf16.mxu0 %v575_v8  ;;  %v464_v7 = vld [vmem:[%s6097_s28 + $0xf0] sm:$0xff]  ;;  %v471_v8 = vld [vmem:[%s6097_s28 + $0x128] sm:$0xff] }
  0x60   : > { %1413 = vmatprep.subr.bf16.mxu0 %v5201_v9  ;;  %v5240_v9 = vld [vmem:[%s7841_s2 + $0x244] ss:$8 sps:$4 sm:$0xff]  }
  0x63   : > { %1414 = vmatpush1.bf16.msra.mxu0 %v5199_v10  ;;  %v479_v10 = vld [vmem:[%s6097_s28 + $0x168] sm:$0xff] }
  0x64   : > { %1415 = vmatprep.subr.bf16.mxu0 %v5204_v13  ;;  %v562_v13 = vpack.c.bf16 %v471_v8, %v464_v7  ;;  %v570_v15 = vpack.c.bf16 %v486_v11, %v479_v10  ;;  %v445_v7 = vld [vmem:[%s6097_s28 + $0x58] sm:$0xff]  ;;  %v5276_v8 = vld [vmem:[%s7841_s2 + $0x304] ss:$8 sps:$4 sm:$0xff]   ;;  %v460_v10 = vld [vmem:[%s6097_s28 + $0xd0] sm:$0xff] }
  0x65   : > { %v5303_v11 = vld [vmem:[%s7843_s4 + $0x10] ss:$8 sps:$4 sm:$0xff]  }
  0x66   : > { %1359 = vmatmul.mubr.bf16.gmra.mrb[16].mxu0 %v574_v16  ;;  %v5241_v16 = vld [vmem:[%s7841_s2 + $0x250] ss:$8 sps:$4 sm:$0xff]  }
  0x67   : > { %1416 = vmatpush1.bf16.msra.mxu0 %v5202_v17  ;;  %1368 = vmatprep.mubr.bf16.mxu0 %v582_v18  ;;  %v478_v17 = vld [vmem:[%s6097_s28 + $0x160] sm:$0xff]  ;;  %v485_v18 = vld [vmem:[%s6097_s28 + $0x198] sm:$0xff] }
  0x68   : > { %1417 = vmatprep.subr.bf16.mxu0 %v5207_v19  ;;  %v5246_v19 = vld [vmem:[%s7841_s2 + $0x264] ss:$8 sps:$4 sm:$0xff]  }
  0x6b   : > { %1418 = vmatpush1.bf16.msra.mxu0 %v5205_v20  ;;  %v493_v20 = vld [vmem:[%s6097_s28 + $0x1d8] sm:$0xff] }
  0x6c   : > { %1419 = vmatprep.subr.bf16.mxu0 %v5210_v23  ;;  %v569_v23 = vpack.c.bf16 %v485_v18, %v478_v17  ;;  %v577_v25 = vpack.c.bf16 %v500_v21, %v493_v20  ;;  %v5306_v17 = vld [vmem:[%s7843_s4 + $0x20] ss:$8 sps:$4 sm:$0xff]   ;;  %v5307_v18 = vld [vmem:[%s7843_s4 + $0x34] ss:$8 sps:$4 sm:$0xff]   ;;  %v5277_v21 = vld [vmem:[%s7841_s2 + $0x310] ss:$8 sps:$4 sm:$0xff]  }
  0x6d   : > { %v459_v20 = vld [vmem:[%s6097_s28 + $0xc8] sm:$0xff] }
  0x6e   : > { %1369 = vmatmul.mubr.bf16.gmra.mrb[20].mxu0 %v581_v27  ;;  %v492_v27 = vld [vmem:[%s6097_s28 + $0x1d0] sm:$0xff] }
  0x6f   : > { %1420 = vmatpush1.bf16.msra.mxu0 %v5208_v26  ;;  %1378 = vmatprep.mubr.bf16.mxu0 %v589_v29  ;;  %v5247_v26 = vld [vmem:[%s7841_s2 + $0x270] ss:$8 sps:$4 sm:$0xff]   ;;  %v5252_v29 = vld [vmem:[%s7841_s2 + $0x284] ss:$8 sps:$4 sm:$0xff]  }
  0x70   : > { %1421 = vmatprep.subr.bf16.mxu0 %v5213_v28  ;;  %v499_v28 = vld [vmem:[%s6097_s28 + $0x208] sm:$0xff] }
  0x73   : > { %1422 = vmatpush1.bf16.msra.mxu0 %v5211_v30  ;;  %v507_v30 = vld [vmem:[%s6097_s28 + $0x248] sm:$0xff] }
  0x74   : > { %1423 = vmatprep.subr.bf16.mxu0 %v5216_v33  ;;  %v576_v33 = vpack.c.bf16 %v499_v28, %v492_v27  ;;  %v584_v35 = vpack.c.bf16 %v514_v31, %v507_v30  ;;  %v5310_v27 = vld [vmem:[%s7843_s4 + $0x44] ss:$8 sps:$4 sm:$0xff]   ;;  %v5285_v30 = vld [vmem:[%s7841_s2 + $0x334] ss:$8 sps:$4 sm:$0xff]   ;;  %v5312_v31 = vld [vmem:[%s7843_s4 + $0x40] ss:$8 sps:$4 sm:$0xff]  }
  0x76   : > { %1379 = vmatmul.mubr.bf16.gmra.mrb[24].mxu0 %v588_v37  ;;  %v506_v37 = vld [vmem:[%s6097_s28 + $0x240] sm:$0xff] }
  0x77   : > { %1424 = vmatpush1.bf16.msra.mxu0 %v5214_v36  ;;  %1388 = vmatprep.mubr.bf16.mxu0 %v596_v39  ;;  %v5253_v36 = vld [vmem:[%s7841_s2 + $0x290] ss:$8 sps:$4 sm:$0xff]   ;;  %v5258_v39 = vld [vmem:[%s7841_s2 + $0x2a4] ss:$8 sps:$4 sm:$0xff]  }
  0x78   : > { %1425 = vmatprep.subr.bf16.mxu0 %v5219_v38  ;;  %v513_v38 = vld [vmem:[%s6097_s28 + $0x278] sm:$0xff] }
  0x7b   : > { %1426 = vmatpush1.bf16.msra.mxu0 %v5217_v40  ;;  %v521_v40 = vld [vmem:[%s6097_s28 + $0x2b8] sm:$0xff] }
  0x7c   : > { %1427 = vmatprep.subr.bf16.mxu0 %v5222_v43  ;;  %v583_v43 = vpack.c.bf16 %v513_v38, %v506_v37  ;;  %v591_v45 = vpack.c.bf16 %v528_v41, %v521_v40  ;;  %v488_v37 = vld [vmem:[%s6097_s28 + $0x1b0] sm:$0xff]  ;;  %v5288_v38 = vld [vmem:[%s7841_s2 + $0x344] ss:$8 sps:$4 sm:$0xff]  }
  0x7d   : > { %v5316_v41 = vld [vmem:[%s7843_s4 + $0x64] ss:$8 sps:$4 sm:$0xff]  }
  0x7e   : > { %1389 = vmatmul.mubr.bf16.gmra.mrb[28].mxu0 %v595_v47  ;;  %v520_v47 = vld [vmem:[%s6097_s28 + $0x2b0] sm:$0xff] }
  0x7f   : > { %1428 = vmatpush1.bf16.msra.mxu0 %v5220_v46  ;;  %1431 = vmatprep.mubr.bf16.mxu0 %v549_v49  ;;  %v5259_v46 = vld [vmem:[%s7841_s2 + $0x2b0] ss:$8 sps:$4 sm:$0xff]   ;;  %v5264_v49 = vld [vmem:[%s7841_s2 + $0x2c4] ss:$8 sps:$4 sm:$0xff]  }
  0x80   : > { %1429 = vmatprep.subr.bf16.mxu0 %v5225_v48  ;;  %v527_v48 = vld [vmem:[%s6097_s28 + $0x2e8] sm:$0xff] }
  0x81   : > { %v590_v52 = vpack.c.bf16 %v527_v48, %v520_v47  ;;  %v480_v47 = vld [vmem:[%s6097_s28 + $0x170] sm:$0xff]  ;;  %v487_v48 = vld [vmem:[%s6097_s28 + $0x1a8] sm:$0xff] }
  0x83   : > { %1430 = vmatpush1.bf16.msra.mxu0 %v5223_v50  ;;  %v535_v50 = vld [vmem:[%s6097_s28 + $0x328] sm:$0xff] }
  0x84   : > { %1512 = vmatprep.subr.bf16.mxu0 %v5228_v53  ;;  %v5262_v53 = vld [vmem:[%s7841_s2 + $0x2c0] ss:$8 sps:$4 sm:$0xff]   ;;  %v598_v54 = vpack.c.bf16 %v542_v51, %v535_v50 }
  0x85   : > { %v495_v50 = vld [vmem:[%s6097_s28 + $0x1e8] sm:$0xff]  ;;  %v502_v51 = vld [vmem:[%s6097_s28 + $0x220] sm:$0xff] }
  0x86   : > { %1432 = vmatmul.mubr.bf16.vlgmr.msra.gmra.mrb[0].mxu0 %v548_v57  ;;  %v534_v57 = vld [vmem:[%s6097_s28 + $0x320] sm:$0xff] }
  0x87   : > { %1513 = vmatpush1.bf16.msra.mxu0 %v5226_v56  ;;  %1441 = vmatprep.mubr.bf16.mxu0 %v556_v59  ;;  %v5265_v56 = vld [vmem:[%s7841_s2 + $0x2d0] ss:$8 sps:$4 sm:$0xff]   ;;  %v5270_v59 = vld [vmem:[%s7841_s2 + $0x2e4] ss:$8 sps:$4 sm:$0xff]  }
  0x88   : > { %1514 = vmatprep.subr.bf16.mxu0 %v5231_v58  ;;  %v541_v58 = vld [vmem:[%s6097_s28 + $0x358] sm:$0xff] }
  0x89   : > { %v597_v62 = vpack.c.bf16 %v541_v58, %v534_v57  ;;  %v5292_v57 = vld [vmem:[%s7841_s2 + $0x360] ss:$8 sps:$4 sm:$0xff]   ;;  %v5297_v58 = vld [vmem:[%s7841_s2 + $0x374] ss:$8 sps:$4 sm:$0xff]  }
  0x8b   : > { %1515 = vmatpush1.bf16.msra.mxu0 %v5229_v60  ;;  %v439_v60 = vld [vmem:[%s6097_s28 + $0x28] sm:$0xff] }
  0x8c   : > { %1516 = vmatprep.subr.bf16.mxu0 %v5234_v63  ;;  %v5268_v63 = vld [vmem:[%s7841_s2 + $0x2e0] ss:$8 sps:$4 sm:$0xff]   ;;  %v551_v0 = vpack.c.bf16 %v446_v61, %v439_v60  ;;  %v5325_v60 = vld [vmem:[%s7843_s4 + $0x94] ss:$8 sps:$4 sm:$0xff]  }
  0x8d   : > { %v494_v61 = vld [vmem:[%s6097_s28 + $0x1e0] sm:$0xff] }
  0x8e   : > { %1442 = vmatmul.mubr.bf16.gmra.mrb[4].mxu0 %v555_v3  ;;  %v5300_v3 = vld [vmem:[%s7843_s4] ss:$8 sps:$4 sm:$0xff]  }
  0x8f   : > { %1517 = vmatpush1.bf16.msra.mxu0 %v5232_v2  ;;  %1451 = vmatprep.mubr.bf16.mxu0 %v563_v5  ;;  %v5298_v2 = vld [vmem:[%s7843_s4 + $0x4] ss:$8 sps:$4 sm:$0xff]   ;;  %v5271_v5 = vld [vmem:[%s7841_s2 + $0x2f0] ss:$8 sps:$4 sm:$0xff]  }
  0x90   : > { %1518 = vmatprep.subr.bf16.mxu0 %v5237_v4  ;;  %v5301_v4 = vld [vmem:[%s7843_s4 + $0x14] ss:$8 sps:$4 sm:$0xff]   ;;  %1990 = vmatprep.subr.bf16.mxu1 %v5298_v2  ;;  %v5327_v2 = vld [vmem:[%s7843_s4 + $0x90] ss:$8 sps:$4 sm:$0xff]  }
  0x91   : > { %1991 = vmatpush1.bf16.msra.mxu1 %v5300_v3 }
  0x92   : > { %1992 = vmatprep.subr.bf16.mxu1 %v5301_v4  ;;  %v5328_v4 = vld [vmem:[%s7843_s4 + $0xa4] ss:$8 sps:$4 sm:$0xff]  }
  0x93   : > { %1519 = vmatpush1.bf16.msra.mxu0 %v5235_v6  ;;  %v438_v6 = vld [vmem:[%s6097_s28 + $0x20] sm:$0xff] }
  0x94   : > { %1520 = vmatprep.subr.bf16.mxu0 %v5240_v9  ;;  %v453_v9 = vld [vmem:[%s6097_s28 + $0x98] sm:$0xff] }
  0x95   : > { %1993 = vmatpush1.bf16.msra.mxu1 %v5303_v11  ;;  %v530_v11 = vld [vmem:[%s6097_s28 + $0x300] sm:$0xff] }
  0x96   : > { %1452 = vmatmul.mubr.bf16.gmra.mrb[8].mxu0 %v562_v13  ;;  %v5304_v13 = vld [vmem:[%s7843_s4 + $0x24] ss:$8 sps:$4 sm:$0xff]  }
  0x97   : > { %1521 = vmatpush1.bf16.msra.mxu0 %v5238_v12  ;;  %1461 = vmatprep.mubr.bf16.mxu0 %v570_v15  ;;  %v550_v12 = vpack.c.bf16 %v445_v7, %v438_v6  ;;  %v558_v15 = vpack.c.bf16 %v460_v10, %v453_v9  ;;  %v5330_v6 = vld [vmem:[%s7843_s4 + $0xa0] ss:$8 sps:$4 sm:$0xff]   ;;  %v5331_v7 = vld [vmem:[%s7843_s4 + $0xb4] ss:$8 sps:$4 sm:$0xff]  }
  0x98   : > { %1522 = vmatprep.subr.bf16.mxu0 %v5243_v14  ;;  %v5274_v14 = vld [vmem:[%s7841_s2 + $0x300] ss:$8 sps:$4 sm:$0xff]   ;;  %1994 = vmatprep.subr.bf16.mxu1 %v5304_v13 }
  0x99   : > { %1995 = vmatpush1.bf16.msra.mxu1 %v5306_v17  ;;  %v515_v9 = vld [vmem:[%s6097_s28 + $0x288] sm:$0xff]  ;;  %v5337_v17 = vld [vmem:[%s7843_s4 + $0xd4] ss:$8 sps:$4 sm:$0xff]  }
  0x9a   : > { %1996 = vmatprep.subr.bf16.mxu1 %v5307_v18  ;;  %v523_v10 = vld [vmem:[%s6097_s28 + $0x2c8] sm:$0xff]  ;;  %v522_v18 = vld [vmem:[%s6097_s28 + $0x2c0] sm:$0xff] }
  0x9b   : > { %1523 = vmatpush1.bf16.msra.mxu0 %v5241_v16  ;;  %v5279_v16 = vld [vmem:[%s7841_s2 + $0x314] ss:$8 sps:$4 sm:$0xff]  }
  0x9c   : > { %1524 = vmatprep.subr.bf16.mxu0 %v5246_v19  ;;  %v452_v19 = vld [vmem:[%s6097_s28 + $0x90] sm:$0xff] }
  0x9e   : > { %1462 = vmatmul.mubr.bf16.gmra.mrb[12].mxu0 %v569_v23  ;;  %v474_v23 = vld [vmem:[%s6097_s28 + $0x140] sm:$0xff] }
  0x9f   : > { %1525 = vmatpush1.bf16.msra.mxu0 %v5244_v22  ;;  %1471 = vmatprep.mubr.bf16.mxu0 %v577_v25  ;;  %v467_v22 = vld [vmem:[%s6097_s28 + $0x108] sm:$0xff]  ;;  %v5309_v25 = vld [vmem:[%s7843_s4 + $0x30] ss:$8 sps:$4 sm:$0xff]  }
  0xa0   : > { %1526 = vmatprep.subr.bf16.mxu0 %v5249_v24  ;;  %v5282_v24 = vld [vmem:[%s7841_s2 + $0x324] ss:$8 sps:$4 sm:$0xff]   ;;  %v565_v28 = vpack.c.bf16 %v474_v23, %v467_v22  ;;  %1997 = vmatpush1.bf16.msra.mxu1 %v5309_v25 }
  0xa1   : > { %1998 = vmatprep.subr.bf16.mxu1 %v5310_v27  ;;  %v543_v25 = vld [vmem:[%s6097_s28 + $0x368] sm:$0xff]  ;;  %v5987_v27 = vmov 0  }
  0xa3   : > { %1527 = vmatpush1.bf16.msra.mxu0 %v5247_v26  ;;  %v557_v26 = vpack.c.bf16 %v459_v20, %v452_v19  ;;  %v529_v19 = vld [vmem:[%s6097_s28 + $0x2f8] sm:$0xff] }
  0xa4   : > { %1528 = vmatprep.subr.bf16.mxu0 %v5252_v29  ;;  %v5280_v29 = vld [vmem:[%s7841_s2 + $0x320] ss:$8 sps:$4 sm:$0xff]   ;;  %1999 = vmatpush1.bf16.msra.mxu1 %v5312_v31  ;;  %v537_v20 = vld [vmem:[%s6097_s28 + $0x338] sm:$0xff]  ;;  %v592_v22 = vpack.c.bf16 %v529_v19, %v522_v18 }
  0xa5   : > { %v454_v31 = vld [vmem:[%s6097_s28 + $0xa0] sm:$0xff]  ;;  %v5351_v19 = vld [vmem:[%s7845_s6 + $0x14] ss:$8 sps:$4 sm:$0xff]  }
  0xa6   : > { %1472 = vmatmul.mubr.bf16.gmra.mrb[16].mxu0 %v576_v33  ;;  %v466_v33 = vld [vmem:[%s6097_s28 + $0x100] sm:$0xff] }
  0xa7   : > { %1529 = vmatpush1.bf16.msra.mxu0 %v5250_v32  ;;  %1481 = vmatprep.mubr.bf16.mxu0 %v584_v35  ;;  %v5313_v32 = vld [vmem:[%s7843_s4 + $0x54] ss:$8 sps:$4 sm:$0xff]   ;;  %v5283_v35 = vld [vmem:[%s7841_s2 + $0x330] ss:$8 sps:$4 sm:$0xff]  }
  0xa8   : > { %1530 = vmatprep.subr.bf16.mxu0 %v5255_v34  ;;  %v473_v34 = vld [vmem:[%s6097_s28 + $0x138] sm:$0xff]  ;;  %2000 = vmatprep.subr.bf16.mxu1 %v5313_v32 }
  0xa9   : > { %v564_v40 = vpack.c.bf16 %v473_v34, %v466_v33  ;;  %v461_v32 = vld [vmem:[%s6097_s28 + $0xd8] sm:$0xff]  ;;  %v468_v34 = vld [vmem:[%s6097_s28 + $0x110] sm:$0xff] }
  0xaa   : > { %v559_v33 = vpack.c.bf16 %v461_v32, %v454_v31 }
  0xab   : > { %1531 = vmatpush1.bf16.msra.mxu0 %v5253_v36  ;;  %v481_v36 = vld [vmem:[%s6097_s28 + $0x178] sm:$0xff] }
  0xac   : > { %1532 = vmatprep.subr.bf16.mxu0 %v5258_v39  ;;  %v5315_v39 = vld [vmem:[%s7843_s4 + $0x50] ss:$8 sps:$4 sm:$0xff]  }
  0xad   : > { %2001 = vmatpush1.bf16.msra.mxu1 %v5315_v39 }
  0xae   : > { %1482 = vmatmul.mubr.bf16.gmra.mrb[20].mxu0 %v583_v43  ;;  %v5286_v43 = vld [vmem:[%s7841_s2 + $0x340] ss:$8 sps:$4 sm:$0xff]   ;;  %2002 = vmatprep.subr.bf16.mxu1 %v5316_v41 }
  0xaf   : > { %1533 = vmatpush1.bf16.msra.mxu0 %v5256_v42  ;;  %1491 = vmatprep.mubr.bf16.mxu0 %v591_v45  ;;  %v572_v42 = vpack.c.bf16 %v488_v37, %v481_v36  ;;  %v5318_v45 = vld [vmem:[%s7843_s4 + $0x60] ss:$8 sps:$4 sm:$0xff]  }
  0xb0   : > { %1534 = vmatprep.subr.bf16.mxu0 %v5261_v44  ;;  %v5291_v44 = vld [vmem:[%s7841_s2 + $0x354] ss:$8 sps:$4 sm:$0xff]   ;;  %v482_v37 = vld [vmem:[%s6097_s28 + $0x180] sm:$0xff]  ;;  %v503_v41 = vld [vmem:[%s6097_s28 + $0x228] sm:$0xff] }
  0xb1   : > { %2003 = vmatpush1.bf16.msra.mxu1 %v5318_v45 }
  0xb3   : > { %1535 = vmatpush1.bf16.msra.mxu0 %v5259_v46  ;;  %v5319_v46 = vld [vmem:[%s7843_s4 + $0x74] ss:$8 sps:$4 sm:$0xff]  }
  0xb4   : > { %1536 = vmatprep.subr.bf16.mxu0 %v5264_v49  ;;  %v5289_v49 = vld [vmem:[%s7841_s2 + $0x350] ss:$8 sps:$4 sm:$0xff]   ;;  %2004 = vmatprep.subr.bf16.mxu1 %v5319_v46 }
  0xb5   : > { %v524_v46 = vld [vmem:[%s6097_s28 + $0x2d0] sm:$0xff] }
  0xb6   : > { %1492 = vmatmul.mubr.bf16.gmra.mrb[24].mxu0 %v590_v52  ;;  %v5294_v52 = vld [vmem:[%s7841_s2 + $0x364] ss:$8 sps:$4 sm:$0xff]  }
  0xb7   : > { %1537 = vmatpush1.bf16.msra.mxu0 %v5262_v53  ;;  %1501 = vmatprep.mubr.bf16.mxu0 %v598_v54  ;;  %v5321_v53 = vld [vmem:[%s7843_s4 + $0x70] ss:$8 sps:$4 sm:$0xff]   ;;  %v571_v54 = vpack.c.bf16 %v487_v48, %v480_v47  ;;  %v531_v47 = vld [vmem:[%s6097_s28 + $0x308] sm:$0xff] }
  0xb8   : > { %1538 = vmatprep.subr.bf16.mxu0 %v5267_v55  ;;  %v5322_v55 = vld [vmem:[%s7843_s4 + $0x84] ss:$8 sps:$4 sm:$0xff]   ;;  %2005 = vmatpush1.bf16.msra.mxu1 %v5321_v53  ;;  %v594_v48 = vpack.c.bf16 %v531_v47, %v524_v46 }
  0xb9   : > { %2006 = vmatprep.subr.bf16.mxu1 %v5322_v55  ;;  %v5340_v53 = vld [vmem:[%s7843_s4 + $0xe4] ss:$8 sps:$4 sm:$0xff]   ;;  %v5343_v55 = vld [vmem:[%s7843_s4 + $0xf4] ss:$8 sps:$4 sm:$0xff]  }
  0xba   : > { %v5360_v47 = vld [vmem:[%s7845_s6 + $0x44] ss:$8 sps:$4 sm:$0xff]  }
  0xbb   : > { %1539 = vmatpush1.bf16.msra.mxu0 %v5265_v56  ;;  %v579_v56 = vpack.c.bf16 %v502_v51, %v495_v50  ;;  %v545_v50 = vld [vmem:[%s6097_s28 + $0x378] sm:$0xff] }
  0xbc   : > { %1540 = vmatprep.subr.bf16.mxu0 %v5270_v59  ;;  %v5324_v59 = vld [vmem:[%s7843_s4 + $0x80] ss:$8 sps:$4 sm:$0xff]  }
  0xbd   : > { %2007 = vmatpush1.bf16.msra.mxu1 %v5324_v59 }
  0xbe   : > { %1502 = vmatmul.mubr.bf16.gmra.mrb[28].mxu0 %v597_v62  ;;  %v501_v62 = vld [vmem:[%s6097_s28 + $0x218] sm:$0xff]  ;;  %2008 = vmatprep.subr.bf16.mxu1 %v5325_v60 }
  0xbf   : > { %1541 = vmatpush1.bf16.msra.mxu0 %v5268_v63  ;;  %1544 = vmatprep.mubr.bf16.mxu0 %v551_v0  ;;  %v5295_v63 = vld [vmem:[%s7841_s2 + $0x370] ss:$8 sps:$4 sm:$0xff]   ;;  %v578_v3 = vpack.c.bf16 %v501_v62, %v494_v61  ;;  %v714_v61 = vld [vmem:[%s7842_s3] sm:$0x3] }
  0xc0   : > { %1542 = vmatprep.subr.bf16.mxu0 %v5273_v1  ;;  %v509_v0 = vld [vmem:[%s6097_s28 + $0x258] sm:$0xff]  ;;  %v516_v1 = vld [vmem:[%s6097_s28 + $0x290] sm:$0xff] }
  0xc1   : > { %2009 = vmatpush1.bf16.msra.mxu1 %v5327_v2 }
  0xc2   : > { %2010 = vmatprep.subr.bf16.mxu1 %v5328_v4 }
  0xc3   : > { %1543 = vmatpush1.bf16.msra.mxu0 %v5271_v5  ;;  %v586_v5 = vpack.c.bf16 %v516_v1, %v509_v0 }
  0xc4   : > { %1625 = vmatprep.subr.bf16.mxu0 %v5276_v8  ;;  %v508_v8 = vld [vmem:[%s6097_s28 + $0x250] sm:$0xff] }
  0xc5   : > { %2011 = vmatpush1.bf16.msra.mxu1 %v5330_v6  ;;  %v585_v13 = vpack.c.bf16 %v515_v9, %v508_v8 }
  0xc6   : > { %1545 = vmatmul.mubr.bf16.vlgmr.msra.gmra.mrb[0].mxu0 %v550_v12  ;;  %v5333_v12 = vld [vmem:[%s7843_s4 + $0xb0] ss:$8 sps:$4 sm:$0xff]   ;;  %2012 = vmatprep.subr.bf16.mxu1 %v5331_v7 }
  0xc7   : > { %1626 = vmatpush1.bf16.msra.mxu0 %v5274_v14  ;;  %1554 = vmatprep.mubr.bf16.mxu0 %v558_v15  ;;  %v5334_v14 = vld [vmem:[%s7843_s4 + $0xc4] ss:$8 sps:$4 sm:$0xff]   ;;  %v593_v15 = vpack.c.bf16 %v530_v11, %v523_v10 }
  0xc8   : > { %1627 = vmatprep.subr.bf16.mxu0 %v5279_v16  ;;  %v5336_v16 = vld [vmem:[%s7843_s4 + $0xc0] ss:$8 sps:$4 sm:$0xff]  }
  0xc9   : > { %2013 = vmatpush1.bf16.msra.mxu1 %v5333_v12 }
  0xca   : > { %2014 = vmatprep.subr.bf16.mxu1 %v5334_v14 }
  0xcb   : > { %1628 = vmatpush1.bf16.msra.mxu0 %v5277_v21  ;;  %v544_v21 = vld [vmem:[%s6097_s28 + $0x370] sm:$0xff] }
  0xcc   : > { %1629 = vmatprep.subr.bf16.mxu0 %v5282_v24  ;;  %v600_v23 = vpack.c.bf16 %v544_v21, %v537_v20  ;;  %v536_v24 = vld [vmem:[%s6097_s28 + $0x330] sm:$0xff] }
  0xcd   : > { %2015 = vmatpush1.bf16.msra.mxu1 %v5336_v16  ;;  %v5346_v16 = vld [vmem:[%s7845_s6] ss:$8 sps:$4 sm:$0xff]  }
  0xce   : > { %1555 = vmatmul.mubr.bf16.gmra.mrb[4].mxu0 %v557_v26  ;;  %2016 = vmatprep.subr.bf16.mxu1 %v5337_v17  ;;  %v599_v26 = vpack.c.bf16 %v543_v25, %v536_v24  ;;  %v5349_v25 = vld [vmem:[%s7845_s6 + $0x10] ss:$8 sps:$4 sm:$0xff]  }
  0xcf   : > { %1564 = vmatprep.mubr.bf16.mxu0 %v565_v28  ;;  %1630 = vmatpush1.bf16.msra.mxu0 %v5280_v29  ;;  %v440_v28 = vld [vmem:[%s6097_s28 + $0x30] sm:$0xff]  ;;  %v447_v29 = vld [vmem:[%s6097_s28 + $0x68] sm:$0xff] }
  0xd0   : > { %1631 = vmatprep.subr.bf16.mxu0 %v5285_v30  ;;  %v552_v30 = vpack.c.bf16 %v447_v29, %v440_v28  ;;  %v5354_v29 = vld [vmem:[%s7845_s6 + $0x24] ss:$8 sps:$4 sm:$0xff]  }
  0xd3   : > { %1632 = vmatpush1.bf16.msra.mxu0 %v5283_v35  ;;  %v475_v35 = vld [vmem:[%s6097_s28 + $0x148] sm:$0xff] }
  0xd4   : > { %1633 = vmatprep.subr.bf16.mxu0 %v5288_v38  ;;  %v566_v36 = vpack.c.bf16 %v475_v35, %v468_v34  ;;  %v489_v38 = vld [vmem:[%s6097_s28 + $0x1b8] sm:$0xff]  ;;  %v5352_v35 = vld [vmem:[%s7845_s6 + $0x20] ss:$8 sps:$4 sm:$0xff]  }
  0xd5   : > { %v573_v39 = vpack.c.bf16 %v489_v38, %v482_v37  ;;  %v5357_v38 = vld [vmem:[%s7845_s6 + $0x34] ss:$8 sps:$4 sm:$0xff]  }
  0xd6   : > { %1565 = vmatmul.mubr.bf16.gmra.mrb[8].mxu0 %v564_v40  ;;  %v496_v40 = vld [vmem:[%s6097_s28 + $0x1f0] sm:$0xff] }
  0xd7   : > { %1574 = vmatprep.mubr.bf16.mxu0 %v572_v42  ;;  %1634 = vmatpush1.bf16.msra.mxu0 %v5286_v43  ;;  %v580_v42 = vpack.c.bf16 %v503_v41, %v496_v40  ;;  %v510_v43 = vld [vmem:[%s6097_s28 + $0x260] sm:$0xff] }
  0xd8   : > { %1635 = vmatprep.subr.bf16.mxu0 %v5291_v44  ;;  %v517_v44 = vld [vmem:[%s6097_s28 + $0x298] sm:$0xff] }
  0xd9   : > { %v587_v45 = vpack.c.bf16 %v517_v44, %v510_v43  ;;  %v5355_v44 = vld [vmem:[%s7845_s6 + $0x30] ss:$8 sps:$4 sm:$0xff]  }
  0xdb   : > { %1636 = vmatpush1.bf16.msra.mxu0 %v5289_v49  ;;  %v538_v49 = vld [vmem:[%s6097_s28 + $0x340] sm:$0xff]  ;;  %s4535_s28 = sshll.u32 %s7852_s27, 3 }
  0xdc   : > { %1637 = vmatprep.subr.bf16.mxu0 %v5294_v52  ;;  %v601_v51 = vpack.c.bf16 %v545_v50, %v538_v49  ;;  %v5339_v52 = vld [vmem:[%s7843_s4 + $0xd0] ss:$8 sps:$4 sm:$0xff]   ;;  %s6814_s24 = scalar_lea.vmem %s7840_s1, %s4535_s28 }
  0xdd   : > { %2017 = vmatpush1.bf16.msra.mxu1 %v5339_v52 }
  0xde   : > { %1575 = vmatmul.mubr.bf16.gmra.mrb[12].mxu0 %v571_v54  ;;  %v5342_v54 = vld [vmem:[%s7843_s4 + $0xe0] ss:$8 sps:$4 sm:$0xff]   ;;  %2018 = vmatprep.subr.bf16.mxu1 %v5340_v53 }
  0xdf   : > { %1584 = vmatprep.mubr.bf16.mxu0 %v579_v56  ;;  %1638 = vmatpush1.bf16.msra.mxu0 %v5292_v57  ;;  %v5345_v56 = vld [vmem:[%s7843_s4 + $0xf0] ss:$8 sps:$4 sm:$0xff]   ;;  %v5348_v57 = vld [vmem:[%s7845_s6 + $0x4] ss:$8 sps:$4 sm:$0xff]   ;;  %v5358_v53 = vld [vmem:[%s7845_s6 + $0x40] ss:$8 sps:$4 sm:$0xff]  }
  0xe0   : > { %1639 = vmatprep.subr.bf16.mxu0 %v5297_v58  ;;  %v716_v58 = vlaneseq }
  0xe1   : > { %2019 = vmatpush1.bf16.msra.mxu1 %v5342_v54 }
  0xe2   : > { %2020 = vmatprep.subr.bf16.mxu1 %v5343_v55  ;;  %v6621_v59 = vshrl.u32 %v716_v58, 7 }
  0xe3   : > { %1640 = vmatpush1.bf16.msra.mxu0 %v5295_v63 }
  0xe4   : > { %v6624_v60 = vsub.s32 0, %v6621_v59  ;;  %v6630_v62 = vsub.s32 1, %v6621_v59 }
  0xe5   : > { %2021 = vmatpush1.bf16.msra.mxu1 %v5345_v56  ;;  %v5363_v56 = vld [vmem:[%s7845_s6 + $0x54] ss:$8 sps:$4 sm:$0xff]  }
  0xe6   : > { %1585 = vmatmul.mubr.bf16.gmra.mrb[16].mxu0 %v578_v3  ;;  %2267 = vmatprep.subr.bf16.mxu1 %v5348_v57  ;;  %v6633_v63 = vrot.slane %v714_v61, %v6624_v60  ;;  %v6636_v0 = vrot.slane %v714_v61, %v6630_v62 }
  0xe7   : > { %1594 = vmatprep.mubr.bf16.mxu0 %v586_v5 }
  0xee   : > { %1595 = vmatmul.mubr.bf16.gmra.mrb[20].mxu0 %v585_v13 }
  0xef   : > { %1604 = vmatprep.mubr.bf16.mxu0 %v593_v15 }
  0xf6   : > { %1605 = vmatmul.mubr.bf16.gmra.mrb[24].mxu0 %v592_v22 }
  0xf7   : > { %1614 = vmatprep.mubr.bf16.mxu0 %v600_v23 }
  0xfe   : > { %1615 = vmatmul.mubr.bf16.gmra.mrb[28].mxu0 %v599_v26 }
  0xff   : > { %1657 = vmatprep.mubr.bf16.mxu0 %v5987_v27 }
 0x106   : > { %1658 = vmatmul.mubr.bf16.vlgmr.msra.gmra.mrb[0].mxu0 %v552_v30 }
 0x107   : > { %1667 = vmatprep.mubr.bf16.mxu0 %v5987_v27 }
 0x10e   : > { %1668 = vmatmul.mubr.bf16.gmra.mrb[4].mxu0 %v559_v33 }
 0x10f   : > { %1677 = vmatprep.mubr.bf16.mxu0 %v5987_v27 }
 0x116   : > { %1678 = vmatmul.mubr.bf16.gmra.mrb[8].mxu0 %v566_v36 }
 0x117   : > { %1687 = vmatprep.mubr.bf16.mxu0 %v5987_v27 }
 0x11e   : > { %1688 = vmatmul.mubr.bf16.gmra.mrb[12].mxu0 %v573_v39 }
 0x11f   : > { %1697 = vmatprep.mubr.bf16.mxu0 %v5987_v27 }
 0x126   : > { %1698 = vmatmul.mubr.bf16.gmra.mrb[16].mxu0 %v580_v42 }
 0x127   : > { %1707 = vmatprep.mubr.bf16.mxu0 %v5987_v27 }
 0x12e   : > { %1708 = vmatmul.mubr.bf16.gmra.mrb[20].mxu0 %v587_v45 }
 0x12f   : > { %1717 = vmatprep.mubr.bf16.mxu0 %v5987_v27 }
 0x136   : > { %1718 = vmatmul.mubr.bf16.gmra.mrb[24].mxu0 %v594_v48 }
 0x137   : > { %1727 = vmatprep.mubr.bf16.mxu0 %v5987_v27 }
 0x13e   : > { %1728 = vmatmul.mubr.bf16.gmra.mrb[28].mxu0 %v601_v51 }
 0x1d9   : > { %v1659_v1 = vpop.f32.mrb[0].mxu0 }
 0x1da   : > { %v4992_v2 = vadd.f32 %v1659_v1, %v6633_v63  ;;  %v1661_v3 = vpop.f32.mrb[1].mxu0 }
 0x1db   : > { %v4993_v4 = vadd.f32 %v1661_v3, %v6636_v0  ;;  %v1663_v5 = vpop.f32.mrb[2].mxu0  ;;  %v5361_v3 = vld [vmem:[%s7845_s6 + $0x50] ss:$8 sps:$4 sm:$0xff]  }
 0x1dc   : > { %v4994_v6 = vadd.f32 %v1663_v5, %v6633_v63  ;;  %v1665_v7 = vpop.f32.mrb[3].mxu0  ;;  %v1738_v9 = vmax.f32 %v4992_v2, 0.0 }
 0x1dd   : > { %v4995_v8 = vadd.f32 %v1665_v7, %v6636_v0  ;;  %v1739_v11 = vmax.f32 %v4993_v4, 0.0 }
 0x1de   : > { %v1740_v10 = vmax.f32 %v4994_v6, 0.0  ;;  %v5366_v6 = vld [vmem:[%s7845_s6 + $0x64] ss:$8 sps:$4 sm:$0xff]  }
 0x1df   : > { %v1741_v12 = vmax.f32 %v4995_v8, 0.0 }
 0x1e0   : > { %v1770_v13 = vpack.c.bf16 %v1740_v10, %v1738_v9 }
 0x1e1   : > { %v1669_v14 = vpop.f32.mrb[4].mxu0  ;;  %v1771_v15 = vpack.c.bf16 %v1741_v12, %v1739_v11  ;;  %v5364_v12 = vld [vmem:[%s7845_s6 + $0x60] ss:$8 sps:$4 sm:$0xff]  }
 0x1e2   : > { %v4996_v17 = vadd.f32 %v1669_v14, %v6633_v63  ;;  %v1671_v18 = vpop.f32.mrb[5].mxu0 }
 0x1e3   : > { %v4997_v20 = vadd.f32 %v1671_v18, %v6636_v0  ;;  %v1673_v21 = vpop.f32.mrb[6].mxu0  ;;  %2022 = vmatprep.mubr.bf16.mxu1 %v1771_v15 }
 0x1e4   : > { %v4998_v22 = vadd.f32 %v1673_v21, %v6633_v63  ;;  %v1675_v23 = vpop.f32.mrb[7].mxu0  ;;  %2023 = vmatmul.mubr.bf16.vlgmr.msra.gmra.mrb[0].mxu1 %v1770_v13  ;;  %v1742_v26 = vmax.f32 %v4996_v17, 0.0 }
 0x1e5   : > { %v4999_v24 = vadd.f32 %v1675_v23, %v6636_v0  ;;  %2268 = vmatpush1.bf16.msra.mxu1 %v5346_v16  ;;  %v1743_v30 = vmax.f32 %v4997_v20, 0.0 }
 0x1e6   : > { %v1744_v28 = vmax.f32 %v4998_v22, 0.0  ;;  %2269 = vmatprep.subr.bf16.mxu1 %v5351_v19 }
 0x1e7   : > { %v1745_v31 = vmax.f32 %v4999_v24, 0.0 }
 0x1e8   : > { %v1772_v32 = vpack.c.bf16 %v1744_v28, %v1742_v26 }
 0x1e9   : > { %v1773_v33 = vpack.c.bf16 %v1745_v31, %v1743_v30  ;;  %v1679_v34 = vpop.f32.mrb[8].mxu0  ;;  %2270 = vmatpush1.bf16.msra.mxu1 %v5349_v25 }
 0x1ea   : > { %v5000_v36 = vadd.f32 %v1679_v34, %v6633_v63  ;;  %v1681_v37 = vpop.f32.mrb[9].mxu0  ;;  %2271 = vmatprep.subr.bf16.mxu1 %v5354_v29 }
 0x1eb   : > { %v5001_v39 = vadd.f32 %v1681_v37, %v6636_v0  ;;  %v1683_v40 = vpop.f32.mrb[10].mxu0  ;;  %2032 = vmatprep.mubr.bf16.mxu1 %v1773_v33 }
 0x1ec   : > { %v5002_v41 = vadd.f32 %v1683_v40, %v6633_v63  ;;  %v1685_v42 = vpop.f32.mrb[11].mxu0  ;;  %2033 = vmatmul.mubr.bf16.gmra.mrb[4].mxu1 %v1772_v32  ;;  %v1746_v45 = vmax.f32 %v5000_v36, 0.0 }
 0x1ed   : > { %v5003_v43 = vadd.f32 %v1685_v42, %v6636_v0  ;;  %2272 = vmatpush1.bf16.msra.mxu1 %v5352_v35  ;;  %v1747_v48 = vmax.f32 %v5001_v39, 0.0 }
 0x1ee   : > { %v1748_v46 = vmax.f32 %v5002_v41, 0.0  ;;  %2273 = vmatprep.subr.bf16.mxu1 %v5357_v38 }
 0x1ef   : > { %v1749_v49 = vmax.f32 %v5003_v43, 0.0 }
 0x1f0   : > { %v1774_v50 = vpack.c.bf16 %v1748_v46, %v1746_v45 }
 0x1f1   : > { %v1775_v51 = vpack.c.bf16 %v1749_v49, %v1747_v48  ;;  %v1689_v52 = vpop.f32.mrb[12].mxu0  ;;  %2274 = vmatpush1.bf16.msra.mxu1 %v5355_v44 }
 0x1f2   : > { %v5004_v54 = vadd.f32 %v1689_v52, %v6633_v63  ;;  %v1691_v55 = vpop.f32.mrb[13].mxu0  ;;  %2275 = vmatprep.subr.bf16.mxu1 %v5360_v47 }
 0x1f3   : > { %v5005_v57 = vadd.f32 %v1691_v55, %v6636_v0  ;;  %v1693_v58 = vpop.f32.mrb[14].mxu0  ;;  %2042 = vmatprep.mubr.bf16.mxu1 %v1775_v51 }
 0x1f4   : > { %v5006_v61 = vadd.f32 %v1693_v58, %v6633_v63  ;;  %v1695_v1 = vpop.f32.mrb[15].mxu0  ;;  %2043 = vmatmul.mubr.bf16.gmra.mrb[8].mxu1 %v1774_v50  ;;  %v1750_v4 = vmax.f32 %v5004_v54, 0.0 }
 0x1f5   : > { %v5007_v2 = vadd.f32 %v1695_v1, %v6636_v0  ;;  %2276 = vmatpush1.bf16.msra.mxu1 %v5358_v53  ;;  %v1751_v7 = vmax.f32 %v5005_v57, 0.0 }
 0x1f6   : > { %v1752_v5 = vmax.f32 %v5006_v61, 0.0  ;;  %2277 = vmatprep.subr.bf16.mxu1 %v5363_v56 }
 0x1f7   : > { %v1753_v8 = vmax.f32 %v5007_v2, 0.0 }
 0x1f8   : > { %v1776_v9 = vpack.c.bf16 %v1752_v5, %v1750_v4 }
 0x1f9   : > { %v1777_v10 = vpack.c.bf16 %v1753_v8, %v1751_v7  ;;  %v1699_v11 = vpop.f32.mrb[16].mxu0  ;;  %2278 = vmatpush1.bf16.msra.mxu1 %v5361_v3 }
 0x1fa   : > { %v5008_v13 = vadd.f32 %v1699_v11, %v6633_v63  ;;  %v1701_v14 = vpop.f32.mrb[17].mxu0  ;;  %2279 = vmatprep.subr.bf16.mxu1 %v5366_v6  ;;  %v5373_v11 = vld [vmem:[%s7847_s8 + $0x10] ss:$28 sps:$4 sm:$0xff]  }
 0x1fb   : > { %v5009_v15 = vadd.f32 %v1701_v14, %v6636_v0  ;;  %v1703_v16 = vpop.f32.mrb[18].mxu0  ;;  %2052 = vmatprep.mubr.bf16.mxu1 %v1777_v10  ;;  %v5369_v10 = vld [vmem:[%s7845_s6 + $0x74] ss:$8 sps:$4 sm:$0xff]   ;;  %v5379_v14 = vld [vmem:[%s7847_s8 + $0x48] ss:$28 sps:$4 sm:$0xff]  }
 0x1fc   : > { %v5010_v17 = vadd.f32 %v1703_v16, %v6633_v63  ;;  %v1705_v18 = vpop.f32.mrb[19].mxu0  ;;  %2053 = vmatmul.mubr.bf16.gmra.mrb[12].mxu1 %v1776_v9  ;;  %v1754_v20 = vmax.f32 %v5008_v13, 0.0  ;;  %v5381_v13 = vld [vmem:[%s7847_s8 + $0x4c] ss:$28 sps:$4 sm:$0xff]   ;;  %v5385_v16 = vld [vmem:[%s7847_s8 + $0x80] ss:$28 sps:$4 sm:$0xff]  }
 0x1fd   : > { %v5011_v19 = vadd.f32 %v1705_v18, %v6636_v0  ;;  %2280 = vmatpush1.bf16.msra.mxu1 %v5364_v12  ;;  %v1755_v22 = vmax.f32 %v5009_v15, 0.0  ;;  %v5375_v12 = vld [vmem:[%s7847_s8 + $0x14] ss:$28 sps:$4 sm:$0xff]   ;;  %v5387_v15 = vld [vmem:[%s7847_s8 + $0x84] ss:$28 sps:$4 sm:$0xff]  }
 0x1fe   : > { %v1756_v21 = vmax.f32 %v5010_v17, 0.0  ;;  %2281 = vmatprep.subr.bf16.mxu1 %v5369_v10  ;;  %3395 = vmatprep.subr.bf16.mxu0 %v5375_v12  ;;  %v5393_v17 = vld [vmem:[%s7847_s8 + $0xbc] ss:$28 sps:$4 sm:$0xff]  }
 0x1ff   : > { %v1757_v23 = vmax.f32 %v5011_v19, 0.0  ;;  %3396 = vmatpush1.bf16.msra.mxu0 %v5373_v11  ;;  %v5391_v18 = vld [vmem:[%s7847_s8 + $0xb8] ss:$28 sps:$4 sm:$0xff]  }
 0x200   : > { %v1778_v24 = vpack.c.bf16 %v1756_v21, %v1754_v20  ;;  %3397 = vmatprep.subr.bf16.mxu0 %v5381_v13  ;;  %v5399_v19 = vld [vmem:[%s7847_s8 + $0xf4] ss:$28 sps:$4 sm:$0xff]   ;;  %v5405_v21 = vld [vmem:[%s7847_s8 + $0x12c] ss:$28 sps:$4 sm:$0xff]  }
 0x201   : > { %v1779_v25 = vpack.c.bf16 %v1757_v23, %v1755_v22  ;;  %v1709_v26 = vpop.f32.mrb[20].mxu0  ;;  %v5397_v20 = vld [vmem:[%s7847_s8 + $0xf0] ss:$28 sps:$4 sm:$0xff]   ;;  %v5403_v22 = vld [vmem:[%s7847_s8 + $0x128] ss:$28 sps:$4 sm:$0xff]  }
 0x202   : > { %v5012_v28 = vadd.f32 %v1709_v26, %v6633_v63  ;;  %v1711_v29 = vpop.f32.mrb[21].mxu0  ;;  %v5411_v23 = vld [vmem:[%s7847_s8 + $0x164] ss:$28 sps:$4 sm:$0xff]   ;;  %v5415_v26 = vld [vmem:[%s7847_s8 + $0x198] ss:$28 sps:$4 sm:$0xff]  }
 0x203   : > { %v5013_v30 = vadd.f32 %v1711_v29, %v6636_v0  ;;  %v1713_v31 = vpop.f32.mrb[22].mxu0  ;;  %2062 = vmatprep.mubr.bf16.mxu1 %v1779_v25  ;;  %3398 = vmatpush1.bf16.msra.mxu0 %v5379_v14  ;;  %v5417_v25 = vld [vmem:[%s7847_s8 + $0x19c] ss:$28 sps:$4 sm:$0xff]   ;;  %v5421_v29 = vld [vmem:[%s7847_s8 + $0x1d0] ss:$28 sps:$4 sm:$0xff]  }
 0x204   : > { %v5014_v32 = vadd.f32 %v1713_v31, %v6633_v63  ;;  %v1715_v33 = vpop.f32.mrb[23].mxu0  ;;  %2063 = vmatmul.mubr.bf16.gmra.mrb[16].mxu1 %v1778_v24  ;;  %v1758_v35 = vmax.f32 %v5012_v28, 0.0  ;;  %3399 = vmatprep.subr.bf16.mxu0 %v5387_v15  ;;  %v5409_v24 = vld [vmem:[%s7847_s8 + $0x160] ss:$28 sps:$4 sm:$0xff]   ;;  %v5423_v28 = vld [vmem:[%s7847_s8 + $0x1d4] ss:$28 sps:$4 sm:$0xff]  }
 0x205   : > { %v5015_v34 = vadd.f32 %v1715_v33, %v6636_v0  ;;  %v1759_v37 = vmax.f32 %v5013_v30, 0.0  ;;  %v5429_v30 = vld [vmem:[%s7847_s8 + $0x20c] ss:$28 sps:$4 sm:$0xff]   ;;  %v5433_v33 = vld [vmem:[%s7847_s8 + $0x240] ss:$28 sps:$4 sm:$0xff]  }
 0x206   : > { %v1760_v36 = vmax.f32 %v5014_v32, 0.0  ;;  %v5427_v31 = vld [vmem:[%s7847_s8 + $0x208] ss:$28 sps:$4 sm:$0xff]   ;;  %v5384_v13 = vld [vmem:[%s7847_s8 + $0x74] ss:$28 sps:$4 sm:$0xff]  }
 0x207   : > { %v1761_v38 = vmax.f32 %v5015_v34, 0.0  ;;  %3400 = vmatpush1.bf16.msra.mxu0 %v5385_v16  ;;  %v5435_v32 = vld [vmem:[%s7847_s8 + $0x244] ss:$28 sps:$4 sm:$0xff]   ;;  %v5441_v34 = vld [vmem:[%s7847_s8 + $0x27c] ss:$28 sps:$4 sm:$0xff]  }
 0x208   : > { %v1780_v39 = vpack.c.bf16 %v1760_v36, %v1758_v35  ;;  %3401 = vmatprep.subr.bf16.mxu0 %v5393_v17  ;;  %v5439_v35 = vld [vmem:[%s7847_s8 + $0x278] ss:$28 sps:$4 sm:$0xff]  }
 0x209   : > { %v1781_v40 = vpack.c.bf16 %v1761_v38, %v1759_v37  ;;  %v1719_v41 = vpop.f32.mrb[24].mxu0  ;;  %v5447_v36 = vld [vmem:[%s7847_s8 + $0x2b4] ss:$28 sps:$4 sm:$0xff]   ;;  %v5453_v38 = vld [vmem:[%s7847_s8 + $0x2ec] ss:$28 sps:$4 sm:$0xff]  }
 0x20a   : > { %v5016_v42 = vadd.f32 %v1719_v41, %v6633_v63  ;;  %v1721_v43 = vpop.f32.mrb[25].mxu0  ;;  %v5445_v37 = vld [vmem:[%s7847_s8 + $0x2b0] ss:$28 sps:$4 sm:$0xff]  }
 0x20b   : > { %v5017_v44 = vadd.f32 %v1721_v43, %v6636_v0  ;;  %v1723_v45 = vpop.f32.mrb[26].mxu0  ;;  %2072 = vmatprep.mubr.bf16.mxu1 %v1781_v40  ;;  %3402 = vmatpush1.bf16.msra.mxu0 %v5391_v18  ;;  %v1818_v40 = vld [vmem:[%s7844_s5] sm:$0x3] }
 0x20c   : > { %v5018_v46 = vadd.f32 %v1723_v45, %v6633_v63  ;;  %v1725_v47 = vpop.f32.mrb[27].mxu0  ;;  %2073 = vmatmul.mubr.bf16.gmra.mrb[20].mxu1 %v1780_v39  ;;  %v1762_v49 = vmax.f32 %v5016_v42, 0.0  ;;  %3403 = vmatprep.subr.bf16.mxu0 %v5399_v19  ;;  %v5451_v39 = vld [vmem:[%s7847_s8 + $0x2e8] ss:$28 sps:$4 sm:$0xff]   ;;  %v6809_v41 = vrot.slane %v1818_v40, %v6624_v60  ;;  %v6817_v42 = vrot.slane %v1818_v40, %v6630_v62  ;;  %v5382_v19 = vld [vmem:[%s7847_s8 + $0x70] ss:$28 sps:$4 sm:$0xff]  }
 0x20d   : > { %v5019_v48 = vadd.f32 %v1725_v47, %v6636_v0  ;;  %v1763_v51 = vmax.f32 %v5017_v44, 0.0  ;;  %v2107_v18 = vld [vmem:[%s6814_s24 + $0x20] sm:$0xff] }
 0x20e   : > { %v1764_v50 = vmax.f32 %v5018_v46, 0.0  ;;  %v2103_v46 = vld [vmem:[%s6814_s24] sm:$0xff] }
 0x20f   : > { %v1765_v52 = vmax.f32 %v5019_v48, 0.0  ;;  %3404 = vmatpush1.bf16.msra.mxu0 %v5397_v20 }
 0x210   : > { %v1782_v53 = vpack.c.bf16 %v1764_v50, %v1762_v49  ;;  %3405 = vmatprep.subr.bf16.mxu0 %v5405_v21 }
 0x211   : > { %v1783_v54 = vpack.c.bf16 %v1765_v52, %v1763_v51  ;;  %v1729_v55 = vpop.f32.mrb[28].mxu0  ;;  %v2104_v51 = vld [vmem:[%s6814_s24 + $0x8] sm:$0xff] }
 0x212   : > { %v5020_v56 = vadd.f32 %v1729_v55, %v6633_v63  ;;  %v1731_v57 = vpop.f32.mrb[29].mxu0 }
 0x213   : > { %v5021_v58 = vadd.f32 %v1731_v57, %v6636_v0  ;;  %v1733_v61 = vpop.f32.mrb[30].mxu0  ;;  %2082 = vmatprep.mubr.bf16.mxu1 %v1783_v54  ;;  %3406 = vmatpush1.bf16.msra.mxu0 %v5403_v22 }
 0x214   : > { %v5022_v1 = vadd.f32 %v1733_v61, %v6633_v63  ;;  %v1735_v2 = vpop.f32.mrb[31].mxu0  ;;  %2083 = vmatmul.mubr.bf16.gmra.mrb[24].mxu1 %v1782_v53  ;;  %v1766_v4 = vmax.f32 %v5020_v56, 0.0  ;;  %v5367_v63 = vld [vmem:[%s7845_s6 + $0x70] ss:$8 sps:$4 sm:$0xff]   ;;  %3407 = vmatprep.subr.bf16.mxu0 %v5411_v23  ;;  %v5390_v23 = vld [vmem:[%s7847_s8 + $0xac] ss:$28 sps:$4 sm:$0xff]  }
 0x215   : > { %v5023_v3 = vadd.f32 %v1735_v2, %v6636_v0  ;;  %v1767_v6 = vmax.f32 %v5021_v58, 0.0  ;;  %2282 = vmatpush1.bf16.msra.mxu1 %v5367_v63  ;;  %v5372_v0 = vld [vmem:[%s7847_s8 + $0x4] ss:$28 sps:$4 sm:$0xff]  }
 0x216   : > { %v1768_v5 = vmax.f32 %v5022_v1, 0.0  ;;  %3169 = vmatprep.subr.bf16.mxu1 %v5372_v0  ;;  %v2105_v1 = vld [vmem:[%s6814_s24 + $0x10] sm:$0xff]  ;;  %v5370_v2 = vld [vmem:[%s7847_s8] ss:$28 sps:$4 sm:$0xff]  }
 0x217   : > { %v1769_v7 = vmax.f32 %v5023_v3, 0.0  ;;  %3408 = vmatpush1.bf16.msra.mxu0 %v5409_v24  ;;  %v5376_v0 = vld [vmem:[%s7847_s8 + $0x38] ss:$28 sps:$4 sm:$0xff]  }
 0x218   : > { %v1784_v8 = vpack.c.bf16 %v1768_v5, %v1766_v4  ;;  %3409 = vmatprep.subr.bf16.mxu0 %v5417_v25 }
 0x219   : > { %v1785_v9 = vpack.c.bf16 %v1769_v7, %v1767_v6  ;;  %v5378_v6 = vld [vmem:[%s7847_s8 + $0x3c] ss:$28 sps:$4 sm:$0xff]  }
 0x21b   : > { %2092 = vmatprep.mubr.bf16.mxu1 %v1785_v9  ;;  %3410 = vmatpush1.bf16.msra.mxu0 %v5415_v26  ;;  %v2106_v9 = vld [vmem:[%s6814_s24 + $0x18] sm:$0xff]  ;;  %v2108_v26 = vld [vmem:[%s6814_s24 + $0x28] sm:$0xff] }
 0x21c   : > { %2093 = vmatmul.mubr.bf16.gmra.mrb[28].mxu1 %v1784_v8  ;;  %3411 = vmatprep.subr.bf16.mxu0 %v5423_v28 }
 0x21d   : > { %2299 = vmatprep.mubr.bf16.mxu1 %v5987_v27 }
 0x21f   : > { %3412 = vmatpush1.bf16.msra.mxu0 %v5421_v29 }
 0x220   : > { %3413 = vmatprep.subr.bf16.mxu0 %v5429_v30  ;;  %v5388_v30 = vld [vmem:[%s7847_s8 + $0xa8] ss:$28 sps:$4 sm:$0xff]  }
 0x223   : > { %3414 = vmatpush1.bf16.msra.mxu0 %v5427_v31 }
 0x224   : > { %3415 = vmatprep.subr.bf16.mxu0 %v5435_v32 }
 0x227   : > { %3416 = vmatpush1.bf16.msra.mxu0 %v5433_v33  ;;  %v5396_v33 = vld [vmem:[%s7847_s8 + $0xe4] ss:$28 sps:$4 sm:$0xff]  }
 0x228   : > { %3417 = vmatprep.subr.bf16.mxu0 %v5441_v34 }
 0x22b   : > { %3418 = vmatpush1.bf16.msra.mxu0 %v5439_v35 }
 0x22c   : > { %3419 = vmatprep.subr.bf16.mxu0 %v5447_v36 }
 0x22f   : > { %3420 = vmatpush1.bf16.msra.mxu0 %v5445_v37 }
 0x230   : > { %3421 = vmatprep.subr.bf16.mxu0 %v5453_v38  ;;  %v2109_v38 = vld [vmem:[%s6814_s24 + $0x30] sm:$0xff] }
 0x233   : > { %3422 = vmatpush1.bf16.msra.mxu0 %v5451_v39  ;;  %v5394_v39 = vld [vmem:[%s7847_s8 + $0xe0] ss:$28 sps:$4 sm:$0xff]  }
 0x2b7   : > { %v2024_v43 = vpop.f32.mrb[0].mxu1 }
 0x2b8   : > { %v2025_v44 = vadd.f32 %v2024_v43, %v6809_v41  ;;  %v2026_v45 = vpop.f32.mrb[1].mxu1 }
 0x2b9   : > { %v2027_v47 = vadd.f32 %v2026_v45, %v6817_v42  ;;  %v2028_v48 = vpop.f32.mrb[2].mxu1  ;;  %v5402_v45 = vld [vmem:[%s7847_s8 + $0x11c] ss:$28 sps:$4 sm:$0xff]  }
 0x2ba   : > { %4389 = vst [vmem:[%s6822_s29] sm:$0xff] %v2025_v44  ;;  %v2029_v49 = vadd.f32 %v2028_v48, %v6809_v41  ;;  %v2030_v50 = vpop.f32.mrb[3].mxu1  ;;  %v2110_v48 = vld [vmem:[%s6814_s24 + $0x38] sm:$0xff] }
 0x2bb   : > { %v2119_v52 = vmul.f32 %v2103_v46, %v2027_v47  ;;  %4390 = vst [vmem:[%s6822_s29 + $0x8] sm:$0xff] %v2027_v47  ;;  %v2031_v53 = vadd.f32 %v2030_v50, %v6817_v42 }
 0x2bc   : > { %4391 = vst [vmem:[%s6822_s29 + $0x10] sm:$0xff] %v2029_v49 }
 0x2bd   : > { %v2135_v54 = vadd.f32 %v2119_v52, %v2025_v44  ;;  %v2120_v55 = vmul.f32 %v2104_v51, %v2031_v53  ;;  %4392 = vst [vmem:[%s6822_s29 + $0x18] sm:$0xff] %v2031_v53  ;;  %v5400_v51 = vld [vmem:[%s7847_s8 + $0x118] ss:$28 sps:$4 sm:$0xff]  }
 0x2bf   : > { %v2136_v56 = vadd.f32 %v2120_v55, %v2029_v49  ;;  %v2034_v57 = vpop.f32.mrb[4].mxu1 }
 0x2c0   : > { %v2035_v58 = vadd.f32 %v2034_v57, %v6809_v41  ;;  %v2036_v61 = vpop.f32.mrb[5].mxu1 }
 0x2c1   : > { %v2151_v3 = vpack.c.bf16 %v2136_v56, %v2135_v54  ;;  %v2037_v4 = vadd.f32 %v2036_v61, %v6817_v42  ;;  %v2038_v5 = vpop.f32.mrb[6].mxu1  ;;  %v5408_v54 = vld [vmem:[%s7847_s8 + $0x154] ss:$28 sps:$4 sm:$0xff]   ;;  %v2111_v61 = vld [vmem:[%s6814_s24 + $0x40] sm:$0xff] }
 0x2c2   : > { %4393 = vst [vmem:[%s6822_s29 + $0x20] sm:$0xff] %v2035_v58  ;;  %v2039_v7 = vadd.f32 %v2038_v5, %v6809_v41  ;;  %v2040_v8 = vpop.f32.mrb[7].mxu1  ;;  %v5414_v5 = vld [vmem:[%s7847_s8 + $0x18c] ss:$28 sps:$4 sm:$0xff]  }
 0x2c3   : > { %v2121_v10 = vmul.f32 %v2105_v1, %v2037_v4  ;;  %4394 = vst [vmem:[%s6822_s29 + $0x28] sm:$0xff] %v2037_v4  ;;  %v2041_v63 = vadd.f32 %v2040_v8, %v6817_v42  ;;  %2300 = vmatmul.mubr.bf16.vlgmr.msra.gmra.mrb[32].mxu1 %v2151_v3  ;;  %v5406_v1 = vld [vmem:[%s7847_s8 + $0x150] ss:$28 sps:$4 sm:$0xff]  }
 0x2c4   : > { %4395 = vst [vmem:[%s6822_s29 + $0x30] sm:$0xff] %v2039_v7  ;;  %2309 = vmatprep.mubr.bf16.mxu1 %v5987_v27  ;;  %3170 = vmatpush1.bf16.msra.mxu1 %v5370_v2  ;;  %v2112_v8 = vld [vmem:[%s6814_s24 + $0x48] sm:$0xff] }
 0x2c5   : > { %v2137_v11 = vadd.f32 %v2121_v10, %v2035_v58  ;;  %v2122_v12 = vmul.f32 %v2106_v9, %v2041_v63  ;;  %4396 = vst [vmem:[%s6822_s29 + $0x38] sm:$0xff] %v2041_v63  ;;  %3171 = vmatprep.subr.bf16.mxu1 %v5378_v6  ;;  %v5412_v63 = vld [vmem:[%s7847_s8 + $0x188] ss:$28 sps:$4 sm:$0xff]  }
 0x2c7   : > { %v2138_v14 = vadd.f32 %v2122_v12, %v2039_v7  ;;  %v2044_v15 = vpop.f32.mrb[8].mxu1  ;;  %v5420_v12 = vld [vmem:[%s7847_s8 + $0x1c4] ss:$28 sps:$4 sm:$0xff]  }
 0x2c8   : > { %v2045_v16 = vadd.f32 %v2044_v15, %v6809_v41  ;;  %v2046_v17 = vpop.f32.mrb[9].mxu1  ;;  %3172 = vmatpush1.bf16.msra.mxu1 %v5376_v0 }
 0x2c9   : > { %v2047_v20 = vadd.f32 %v2046_v17, %v6817_v42  ;;  %v2048_v21 = vpop.f32.mrb[10].mxu1  ;;  %v2152_v22 = vpack.c.bf16 %v2138_v14, %v2137_v11  ;;  %3173 = vmatprep.subr.bf16.mxu1 %v5384_v13  ;;  %v2113_v17 = vld [vmem:[%s6814_s24 + $0x50] sm:$0xff] }
 0x2ca   : > { %4397 = vst [vmem:[%s6822_s29 + $0x40] sm:$0xff] %v2045_v16  ;;  %v2049_v24 = vadd.f32 %v2048_v21, %v6809_v41  ;;  %v2050_v25 = vpop.f32.mrb[11].mxu1 }
 0x2cb   : > { %v2123_v28 = vmul.f32 %v2107_v18, %v2047_v20  ;;  %4398 = vst [vmem:[%s6822_s29 + $0x48] sm:$0xff] %v2047_v20  ;;  %v2051_v29 = vadd.f32 %v2050_v25, %v6817_v42  ;;  %2310 = vmatmul.mubr.bf16.gmra.mrb[36].mxu1 %v2152_v22  ;;  %v5418_v18 = vld [vmem:[%s7847_s8 + $0x1c0] ss:$28 sps:$4 sm:$0xff]  }
 0x2cc   : > { %4399 = vst [vmem:[%s6822_s29 + $0x50] sm:$0xff] %v2049_v24  ;;  %2319 = vmatprep.mubr.bf16.mxu1 %v5987_v27  ;;  %3174 = vmatpush1.bf16.msra.mxu1 %v5382_v19  ;;  %v5426_v22 = vld [vmem:[%s7847_s8 + $0x1fc] ss:$28 sps:$4 sm:$0xff]  }
 0x2cd   : > { %v2139_v31 = vadd.f32 %v2123_v28, %v2045_v16  ;;  %v2124_v32 = vmul.f32 %v2108_v26, %v2051_v29  ;;  %4400 = vst [vmem:[%s6822_s29 + $0x58] sm:$0xff] %v2051_v29  ;;  %3175 = vmatprep.subr.bf16.mxu1 %v5390_v23  ;;  %v2114_v25 = vld [vmem:[%s6814_s24 + $0x58] sm:$0xff] }
 0x2ce   : > { %v5424_v29 = vld [vmem:[%s7847_s8 + $0x1f8] ss:$28 sps:$4 sm:$0xff]  }
 0x2cf   : > { %v2140_v34 = vadd.f32 %v2124_v32, %v2049_v24  ;;  %v2054_v35 = vpop.f32.mrb[12].mxu1  ;;  %v5432_v32 = vld [vmem:[%s7847_s8 + $0x234] ss:$28 sps:$4 sm:$0xff]  }
 0x2d0   : > { %v2055_v36 = vadd.f32 %v2054_v35, %v6809_v41  ;;  %v2056_v37 = vpop.f32.mrb[13].mxu1  ;;  %3176 = vmatpush1.bf16.msra.mxu1 %v5388_v30 }
 0x2d1   : > { %v2057_v40 = vadd.f32 %v2056_v37, %v6817_v42  ;;  %v2058_v43 = vpop.f32.mrb[14].mxu1  ;;  %v2153_v44 = vpack.c.bf16 %v2140_v34, %v2139_v31  ;;  %3177 = vmatprep.subr.bf16.mxu1 %v5396_v33  ;;  %v2115_v37 = vld [vmem:[%s6814_s24 + $0x60] sm:$0xff] }
 0x2d2   : > { %4401 = vst [vmem:[%s6822_s29 + $0x60] sm:$0xff] %v2055_v36  ;;  %v2059_v46 = vadd.f32 %v2058_v43, %v6809_v41  ;;  %v2060_v47 = vpop.f32.mrb[15].mxu1 }
 0x2d3   : > { %v2125_v49 = vmul.f32 %v2109_v38, %v2057_v40  ;;  %4402 = vst [vmem:[%s6822_s29 + $0x68] sm:$0xff] %v2057_v40  ;;  %v2061_v50 = vadd.f32 %v2060_v47, %v6817_v42  ;;  %2320 = vmatmul.mubr.bf16.gmra.mrb[40].mxu1 %v2153_v44  ;;  %v5430_v38 = vld [vmem:[%s7847_s8 + $0x230] ss:$28 sps:$4 sm:$0xff]  }
 0x2d4   : > { %4403 = vst [vmem:[%s6822_s29 + $0x70] sm:$0xff] %v2059_v46  ;;  %2329 = vmatprep.mubr.bf16.mxu1 %v5987_v27  ;;  %3178 = vmatpush1.bf16.msra.mxu1 %v5394_v39  ;;  %v5438_v44 = vld [vmem:[%s7847_s8 + $0x26c] ss:$28 sps:$4 sm:$0xff]  }
 0x2d5   : > { %v2141_v52 = vadd.f32 %v2125_v49, %v2055_v36  ;;  %v2126_v53 = vmul.f32 %v2110_v48, %v2061_v50  ;;  %4404 = vst [vmem:[%s6822_s29 + $0x78] sm:$0xff] %v2061_v50  ;;  %3179 = vmatprep.subr.bf16.mxu1 %v5402_v45  ;;  %v2116_v47 = vld [vmem:[%s6814_s24 + $0x68] sm:$0xff] }
 0x2d6   : > { %v5436_v50 = vld [vmem:[%s7847_s8 + $0x268] ss:$28 sps:$4 sm:$0xff]  }
 0x2d7   : > { %v2142_v55 = vadd.f32 %v2126_v53, %v2059_v46  ;;  %v2064_v56 = vpop.f32.mrb[16].mxu1  ;;  %v5444_v53 = vld [vmem:[%s7847_s8 + $0x2a4] ss:$28 sps:$4 sm:$0xff]  }
 0x2d8   : > { %v2065_v57 = vadd.f32 %v2064_v56, %v6809_v41  ;;  %v2066_v58 = vpop.f32.mrb[17].mxu1  ;;  %3180 = vmatpush1.bf16.msra.mxu1 %v5400_v51 }
 0x2d9   : > { %v2067_v2 = vadd.f32 %v2066_v58, %v6817_v42  ;;  %v2068_v3 = vpop.f32.mrb[18].mxu1  ;;  %v2154_v4 = vpack.c.bf16 %v2142_v55, %v2141_v52  ;;  %3181 = vmatprep.subr.bf16.mxu1 %v5408_v54  ;;  %v2117_v58 = vld [vmem:[%s6814_s24 + $0x70] sm:$0xff] }
 0x2da   : > { %4405 = vst [vmem:[%s6822_s29 + $0x80] sm:$0xff] %v2065_v57  ;;  %v2069_v6 = vadd.f32 %v2068_v3, %v6809_v41  ;;  %v2070_v7 = vpop.f32.mrb[19].mxu1 }
 0x2db   : > { %v2127_v9 = vmul.f32 %v2111_v61, %v2067_v2  ;;  %4406 = vst [vmem:[%s6822_s29 + $0x88] sm:$0xff] %v2067_v2  ;;  %v2071_v10 = vadd.f32 %v2070_v7, %v6817_v42  ;;  %2330 = vmatmul.mubr.bf16.gmra.mrb[44].mxu1 %v2154_v4  ;;  %v5442_v61 = vld [vmem:[%s7847_s8 + $0x2a0] ss:$28 sps:$4 sm:$0xff]  }
 0x2dc   : > { %4407 = vst [vmem:[%s6822_s29 + $0x90] sm:$0xff] %v2069_v6  ;;  %2339 = vmatprep.mubr.bf16.mxu1 %v5987_v27  ;;  %3182 = vmatpush1.bf16.msra.mxu1 %v5406_v1  ;;  %v5450_v4 = vld [vmem:[%s7847_s8 + $0x2dc] ss:$28 sps:$4 sm:$0xff]  }
 0x2dd   : > { %v2143_v0 = vadd.f32 %v2127_v9, %v2065_v57  ;;  %v2128_v11 = vmul.f32 %v2112_v8, %v2071_v10  ;;  %4408 = vst [vmem:[%s6822_s29 + $0x98] sm:$0xff] %v2071_v10  ;;  %3183 = vmatprep.subr.bf16.mxu1 %v5414_v5  ;;  %v2118_v7 = vld [vmem:[%s6814_s24 + $0x78] sm:$0xff] }
 0x2de   : > { %v5448_v10 = vld [vmem:[%s7847_s8 + $0x2d8] ss:$28 sps:$4 sm:$0xff]  }
 0x2df   : > { %v2144_v13 = vadd.f32 %v2128_v11, %v2069_v6  ;;  %v2074_v14 = vpop.f32.mrb[20].mxu1 }
 0x2e0   : > { %v2075_v15 = vadd.f32 %v2074_v14, %v6809_v41  ;;  %v2076_v16 = vpop.f32.mrb[21].mxu1  ;;  %3184 = vmatpush1.bf16.msra.mxu1 %v5412_v63  ;;  %v5462_v14 = vld [vmem:[%s7847_s8 + $0x34c] ss:$28 sps:$4 sm:$0xff]  }
 0x2e1   : > { %v2077_v19 = vadd.f32 %v2076_v16, %v6817_v42  ;;  %v2078_v20 = vpop.f32.mrb[22].mxu1  ;;  %v2155_v21 = vpack.c.bf16 %v2144_v13, %v2143_v0  ;;  %3185 = vmatprep.subr.bf16.mxu1 %v5420_v12  ;;  %v5454_v12 = vld [vmem:[%s7847_s8 + $0x310] ss:$28 sps:$4 sm:$0xff]   ;;  %v5457_v13 = vld [vmem:[%s7847_s8 + $0x320] ss:$28 sps:$4 sm:$0xff]  }
 0x2e2   : > { %4409 = vst [vmem:[%s6822_s29 + $0xa0] sm:$0xff] %v2075_v15  ;;  %v2079_v23 = vadd.f32 %v2078_v20, %v6809_v41  ;;  %v2080_v24 = vpop.f32.mrb[23].mxu1  ;;  %v5460_v16 = vld [vmem:[%s7847_s8 + $0x348] ss:$28 sps:$4 sm:$0xff]  }
 0x2e3   : > { %v2129_v26 = vmul.f32 %v2113_v17, %v2077_v19  ;;  %4410 = vst [vmem:[%s6822_s29 + $0xa8] sm:$0xff] %v2077_v19  ;;  %v2081_v28 = vadd.f32 %v2080_v24, %v6817_v42  ;;  %2340 = vmatmul.mubr.bf16.gmra.mrb[48].mxu1 %v2155_v21  ;;  %v5463_v17 = vld [vmem:[%s7847_s8 + $0x358] ss:$28 sps:$4 sm:$0xff]   ;;  %v2175_v19 = vld [vmem:[%s7846_s7] sm:$0x3] }
 0x2e4   : > { %4411 = vst [vmem:[%s6822_s29 + $0xb0] sm:$0xff] %v2079_v23  ;;  %2349 = vmatprep.mubr.bf16.mxu1 %v5987_v27  ;;  %3186 = vmatpush1.bf16.msra.mxu1 %v5418_v18  ;;  %v5468_v18 = vld [vmem:[%s7847_s8 + $0xc] ss:$28 sps:$4 sm:$0xff]   ;;  %v7023_v20 = vrot.slane %v2175_v19, %v6624_v60  ;;  %v7026_v21 = vrot.slane %v2175_v19, %v6630_v62 }
 0x2e5   : > { %v2145_v30 = vadd.f32 %v2129_v26, %v2075_v15  ;;  %v2130_v31 = vmul.f32 %v2114_v25, %v2081_v28  ;;  %4412 = vst [vmem:[%s6822_s29 + $0xb8] sm:$0xff] %v2081_v28  ;;  %3187 = vmatprep.subr.bf16.mxu1 %v5426_v22  ;;  %v5465_v15 = vld [vmem:[%s7847_s8 + $0x35c] ss:$28 sps:$4 sm:$0xff]  }
 0x2e7   : > { %v2146_v33 = vadd.f32 %v2130_v31, %v2079_v23  ;;  %v2084_v34 = vpop.f32.mrb[24].mxu1 }
 0x2e8   : > { %v2085_v35 = vadd.f32 %v2084_v34, %v6809_v41  ;;  %v2086_v36 = vpop.f32.mrb[25].mxu1  ;;  %3188 = vmatpush1.bf16.msra.mxu1 %v5424_v29 }
 0x2e9   : > { %v2087_v39 = vadd.f32 %v2086_v36, %v6817_v42  ;;  %v2088_v40 = vpop.f32.mrb[26].mxu1  ;;  %v2156_v43 = vpack.c.bf16 %v2146_v33, %v2145_v30  ;;  %3189 = vmatprep.subr.bf16.mxu1 %v5432_v32 }
 0x2ea   : > { %4413 = vst [vmem:[%s6822_s29 + $0xc0] sm:$0xff] %v2085_v35  ;;  %v2089_v45 = vadd.f32 %v2088_v40, %v6809_v41  ;;  %v2090_v46 = vpop.f32.mrb[27].mxu1 }
 0x2eb   : > { %v2131_v48 = vmul.f32 %v2115_v37, %v2087_v39  ;;  %4414 = vst [vmem:[%s6822_s29 + $0xc8] sm:$0xff] %v2087_v39  ;;  %v2091_v49 = vadd.f32 %v2090_v46, %v6817_v42  ;;  %2350 = vmatmul.mubr.bf16.gmra.mrb[52].mxu1 %v2156_v43  ;;  %v5471_v43 = vld [vmem:[%s7847_s8 + $0x44] ss:$28 sps:$4 sm:$0xff]  }
 0x2ec   : > { %4415 = vst [vmem:[%s6822_s29 + $0xd0] sm:$0xff] %v2089_v45  ;;  %2359 = vmatprep.mubr.bf16.mxu1 %v5987_v27  ;;  %3190 = vmatpush1.bf16.msra.mxu1 %v5430_v38  ;;  %v5466_v38 = vld [vmem:[%s7847_s8 + $0x8] ss:$28 sps:$4 sm:$0xff]  }
 0x2ed   : > { %v2147_v51 = vadd.f32 %v2131_v48, %v2085_v35  ;;  %v2132_v52 = vmul.f32 %v2116_v47, %v2091_v49  ;;  %4416 = vst [vmem:[%s6822_s29 + $0xd8] sm:$0xff] %v2091_v49  ;;  %3191 = vmatprep.subr.bf16.mxu1 %v5438_v44  ;;  %v5469_v49 = vld [vmem:[%s7847_s8 + $0x40] ss:$28 sps:$4 sm:$0xff]  }
 0x2ef   : > { %v2148_v54 = vadd.f32 %v2132_v52, %v2089_v45  ;;  %v2094_v55 = vpop.f32.mrb[28].mxu1  ;;  %v5474_v52 = vld [vmem:[%s7847_s8 + $0x7c] ss:$28 sps:$4 sm:$0xff]  }
 0x2f0   : > { %v2095_v56 = vadd.f32 %v2094_v55, %v6809_v41  ;;  %v2096_v57 = vpop.f32.mrb[29].mxu1  ;;  %3192 = vmatpush1.bf16.msra.mxu1 %v5436_v50 }
 0x2f1   : > { %v2097_v1 = vadd.f32 %v2096_v57, %v6817_v42  ;;  %v2098_v2 = vpop.f32.mrb[30].mxu1  ;;  %v2157_v3 = vpack.c.bf16 %v2148_v54, %v2147_v51  ;;  %3193 = vmatprep.subr.bf16.mxu1 %v5444_v53 }
 0x2f2   : > { %4417 = vst [vmem:[%s6822_s29 + $0xe0] sm:$0xff] %v2095_v56  ;;  %v2099_v5 = vadd.f32 %v2098_v2, %v6809_v41  ;;  %v2100_v6 = vpop.f32.mrb[31].mxu1  ;;  %v5477_v2 = vld [vmem:[%s7847_s8 + $0xb4] ss:$28 sps:$4 sm:$0xff]  }
 0x2f3   : > { %v2133_v8 = vmul.f32 %v2117_v58, %v2097_v1  ;;  %4418 = vst [vmem:[%s6822_s29 + $0xe8] sm:$0xff] %v2097_v1  ;;  %v2101_v9 = vadd.f32 %v2100_v6, %v6817_v42  ;;  %2360 = vmatmul.mubr.bf16.gmra.mrb[56].mxu1 %v2157_v3  ;;  %v5456_v42 = vld [vmem:[%s7847_s8 + $0x314] ss:$28 sps:$4 sm:$0xff]  }
 0x2f4   : > { %4419 = vst [vmem:[%s6822_s29 + $0xf0] sm:$0xff] %v2099_v5  ;;  %2369 = vmatprep.mubr.bf16.mxu1 %v5987_v27  ;;  %3194 = vmatpush1.bf16.msra.mxu1 %v5442_v61  ;;  %v5459_v27 = vld [vmem:[%s7847_s8 + $0x324] ss:$28 sps:$4 sm:$0xff]   ;;  %v5472_v58 = vld [vmem:[%s7847_s8 + $0x78] ss:$28 sps:$4 sm:$0xff]  }
 0x2f5   : > { %v2149_v63 = vadd.f32 %v2133_v8, %v2095_v56  ;;  %v2134_v0 = vmul.f32 %v2118_v7, %v2101_v9  ;;  %4420 = vst [vmem:[%s6822_s29 + $0xf8] sm:$0xff] %v2101_v9  ;;  %3195 = vmatprep.subr.bf16.mxu1 %v5450_v4  ;;  %3423 = vmatprep.subr.bf16.mxu0 %v5459_v27  ;;  %v5475_v8 = vld [vmem:[%s7847_s8 + $0xb0] ss:$28 sps:$4 sm:$0xff]  }
 0x2f6   : > { %3424 = vmatpush1.bf16.msra.mxu0 %v5457_v13 }
 0x2f7   : > { %v2150_v41 = vadd.f32 %v2134_v0, %v2099_v5  ;;  %3425 = vmatprep.subr.bf16.mxu0 %v5465_v15  ;;  %v5483_v15 = vld [vmem:[%s7847_s8 + $0x124] ss:$28 sps:$4 sm:$0xff]  }
 0x2f8   : > { %3196 = vmatpush1.bf16.msra.mxu1 %v5448_v10 }
 0x2f9   : > { %v2158_v11 = vpack.c.bf16 %v2150_v41, %v2149_v63  ;;  %3197 = vmatprep.subr.bf16.mxu1 %v5456_v42  ;;  %v5480_v63 = vld [vmem:[%s7847_s8 + $0xec] ss:$28 sps:$4 sm:$0xff]  }
 0x2fa   : > { %3426 = vmatpush1.bf16.msra.mxu0 %v5463_v17 }
 0x2fb   : > { %2370 = vmatmul.mubr.bf16.gmra.mrb[60].mxu1 %v2158_v11 }
 0x2fc   : > { %3198 = vmatpush1.bf16.msra.mxu1 %v5454_v12  ;;  %v5478_v12 = vld [vmem:[%s7847_s8 + $0xe8] ss:$28 sps:$4 sm:$0xff]  }
 0x2fd   : > { %3199 = vmatprep.subr.bf16.mxu1 %v5462_v14 }
 0x300   : > { %3200 = vmatpush1.bf16.msra.mxu1 %v5460_v16 }
 0x301   : > { %3282 = vmatprep.subr.bf16.mxu1 %v5468_v18 }
 0x396   : > { %v2301_v22 = vpop.f32.mrb[32].mxu1 }
 0x397   : > { %v2302_v23 = vadd.f32 %v2301_v22, %v7023_v20  ;;  %v2303_v24 = vpop.f32.mrb[33].mxu1 }
 0x398   : > { %v2304_v25 = vadd.f32 %v2303_v24, %v7026_v21  ;;  %v2305_v26 = vpop.f32.mrb[34].mxu1 }
 0x399   : > { %v2306_v28 = vadd.f32 %v2305_v26, %v7023_v20  ;;  %v2307_v29 = vpop.f32.mrb[35].mxu1  ;;  %v2380_v31 = vmax.f32 %v2302_v23, 0.0  ;;  %v5481_v23 = vld [vmem:[%s7847_s8 + $0x120] ss:$28 sps:$4 sm:$0xff]  }
 0x39a   : > { %v2308_v30 = vadd.f32 %v2307_v29, %v7026_v21  ;;  %v2381_v33 = vmax.f32 %v2304_v25, 0.0  ;;  %v5486_v26 = vld [vmem:[%s7847_s8 + $0x15c] ss:$28 sps:$4 sm:$0xff]  }
 0x39b   : > { %v2382_v32 = vmax.f32 %v2306_v28, 0.0 }
 0x39c   : > { %v2383_v34 = vmax.f32 %v2308_v30, 0.0 }
 0x39d   : > { %v7032_v35 = vpack.c.bf16 %v2382_v32, %v2380_v31 }
 0x39e   : > { %v7034_v36 = vpack.c.bf16 %v2383_v34, %v2381_v33  ;;  %v2311_v37 = vpop.f32.mrb[36].mxu1  ;;  %v5484_v33 = vld [vmem:[%s7847_s8 + $0x158] ss:$28 sps:$4 sm:$0xff]  }
 0x39f   : > { %v2312_v39 = vadd.f32 %v2311_v37, %v7023_v20  ;;  %v2313_v40 = vpop.f32.mrb[37].mxu1 }
 0x3a0   : > { %v2314_v44 = vadd.f32 %v2313_v40, %v7026_v21  ;;  %v2315_v45 = vpop.f32.mrb[38].mxu1  ;;  %3201 = vmatprep.mubr.bf16.mxu1 %v7034_v36  ;;  %3427 = vmatprep.mubr.bf16.mxu0 %v7034_v36 }
 0x3a1   : > { %v2316_v46 = vadd.f32 %v2315_v45, %v7023_v20  ;;  %v2317_v47 = vpop.f32.mrb[39].mxu1  ;;  %3202 = vmatmul.mubr.bf16.vlgmr.msra.gmra.mrb[64].mxu1 %v7032_v35  ;;  %3428 = vmatmul.mubr.bf16.vlgmr.msra.gmra.mrb[32].mxu0 %v7032_v35  ;;  %v2384_v50 = vmax.f32 %v2312_v39, 0.0 }
 0x3a2   : > { %v2318_v48 = vadd.f32 %v2317_v47, %v7026_v21  ;;  %3283 = vmatpush1.bf16.msra.mxu1 %v5466_v38  ;;  %v2385_v53 = vmax.f32 %v2314_v44, 0.0  ;;  %v5489_v38 = vld [vmem:[%s7847_s8 + $0x194] ss:$28 sps:$4 sm:$0xff]  }
 0x3a3   : > { %v2386_v51 = vmax.f32 %v2316_v46, 0.0  ;;  %3284 = vmatprep.subr.bf16.mxu1 %v5471_v43  ;;  %v5487_v46 = vld [vmem:[%s7847_s8 + $0x190] ss:$28 sps:$4 sm:$0xff]  }
 0x3a4   : > { %v2387_v54 = vmax.f32 %v2318_v48, 0.0 }
 0x3a5   : > { %v7056_v55 = vpack.c.bf16 %v2386_v51, %v2384_v50 }
 0x3a6   : > { %v7058_v56 = vpack.c.bf16 %v2387_v54, %v2385_v53  ;;  %v2321_v57 = vpop.f32.mrb[40].mxu1  ;;  %3285 = vmatpush1.bf16.msra.mxu1 %v5469_v49  ;;  %v5492_v49 = vld [vmem:[%s7847_s8 + $0x1cc] ss:$28 sps:$4 sm:$0xff]  }
 0x3a7   : > { %v2322_v61 = vadd.f32 %v2321_v57, %v7023_v20  ;;  %v2323_v1 = vpop.f32.mrb[41].mxu1  ;;  %3286 = vmatprep.subr.bf16.mxu1 %v5474_v52  ;;  %v5490_v57 = vld [vmem:[%s7847_s8 + $0x1c8] ss:$28 sps:$4 sm:$0xff]  }
 0x3a8   : > { %v2324_v3 = vadd.f32 %v2323_v1, %v7026_v21  ;;  %v2325_v4 = vpop.f32.mrb[42].mxu1  ;;  %3211 = vmatprep.mubr.bf16.mxu1 %v7058_v56  ;;  %3437 = vmatprep.mubr.bf16.mxu0 %v7058_v56  ;;  %v5495_v1 = vld [vmem:[%s7847_s8 + $0x204] ss:$28 sps:$4 sm:$0xff]  }
 0x3a9   : > { %v2326_v5 = vadd.f32 %v2325_v4, %v7023_v20  ;;  %v2327_v6 = vpop.f32.mrb[43].mxu1  ;;  %3212 = vmatmul.mubr.bf16.gmra.mrb[68].mxu1 %v7056_v55  ;;  %3438 = vmatmul.mubr.bf16.gmra.mrb[36].mxu0 %v7056_v55  ;;  %v2388_v9 = vmax.f32 %v2322_v61, 0.0 }
 0x3aa   : > { %v2328_v7 = vadd.f32 %v2327_v6, %v7026_v21  ;;  %3287 = vmatpush1.bf16.msra.mxu1 %v5472_v58  ;;  %v2389_v0 = vmax.f32 %v2324_v3, 0.0 }
 0x3ab   : > { %v2390_v10 = vmax.f32 %v2326_v5, 0.0  ;;  %3288 = vmatprep.subr.bf16.mxu1 %v5477_v2 }
 0x3ac   : > { %v2391_v41 = vmax.f32 %v2328_v7, 0.0  ;;  %v5493_v7 = vld [vmem:[%s7847_s8 + $0x200] ss:$28 sps:$4 sm:$0xff]  }
 0x3ad   : > { %v7080_v11 = vpack.c.bf16 %v2390_v10, %v2388_v9  ;;  %v5498_v10 = vld [vmem:[%s7847_s8 + $0x23c] ss:$28 sps:$4 sm:$0xff]  }
 0x3ae   : > { %v7082_v42 = vpack.c.bf16 %v2391_v41, %v2389_v0  ;;  %v2331_v27 = vpop.f32.mrb[44].mxu1  ;;  %3289 = vmatpush1.bf16.msra.mxu1 %v5475_v8 }
 0x3af   : > { %v2332_v13 = vadd.f32 %v2331_v27, %v7023_v20  ;;  %v2333_v14 = vpop.f32.mrb[45].mxu1  ;;  %3290 = vmatprep.subr.bf16.mxu1 %v5480_v63 }
 0x3b0   : > { %v2334_v16 = vadd.f32 %v2333_v14, %v7026_v21  ;;  %v2335_v17 = vpop.f32.mrb[46].mxu1  ;;  %3221 = vmatprep.mubr.bf16.mxu1 %v7082_v42  ;;  %3447 = vmatprep.mubr.bf16.mxu0 %v7082_v42 }
 0x3b1   : > { %v2336_v18 = vadd.f32 %v2335_v17, %v7023_v20  ;;  %v2337_v19 = vpop.f32.mrb[47].mxu1  ;;  %3222 = vmatmul.mubr.bf16.gmra.mrb[72].mxu1 %v7080_v11  ;;  %3448 = vmatmul.mubr.bf16.gmra.mrb[40].mxu0 %v7080_v11  ;;  %v2392_v24 = vmax.f32 %v2332_v13, 0.0  ;;  %v5496_v13 = vld [vmem:[%s7847_s8 + $0x238] ss:$28 sps:$4 sm:$0xff]  }
 0x3b2   : > { %v2338_v22 = vadd.f32 %v2337_v19, %v7026_v21  ;;  %3291 = vmatpush1.bf16.msra.mxu1 %v5478_v12  ;;  %v2393_v28 = vmax.f32 %v2334_v16, 0.0  ;;  %v5501_v16 = vld [vmem:[%s7847_s8 + $0x274] ss:$28 sps:$4 sm:$0xff]  }
 0x3b3   : > { %v2394_v25 = vmax.f32 %v2336_v18, 0.0  ;;  %3292 = vmatprep.subr.bf16.mxu1 %v5483_v15 }
 0x3b4   : > { %v2395_v29 = vmax.f32 %v2338_v22, 0.0 }
 0x3b5   : > { %v7104_v30 = vpack.c.bf16 %v2394_v25, %v2392_v24  ;;  %v5499_v24 = vld [vmem:[%s7847_s8 + $0x270] ss:$28 sps:$4 sm:$0xff]  }
 0x3b6   : > { %v7106_v31 = vpack.c.bf16 %v2395_v29, %v2393_v28  ;;  %v2341_v32 = vpop.f32.mrb[48].mxu1  ;;  %3293 = vmatpush1.bf16.msra.mxu1 %v5481_v23  ;;  %v5504_v28 = vld [vmem:[%s7847_s8 + $0x2ac] ss:$28 sps:$4 sm:$0xff]  }
 0x3b7   : > { %v2342_v34 = vadd.f32 %v2341_v32, %v7023_v20  ;;  %v2343_v37 = vpop.f32.mrb[49].mxu1  ;;  %3294 = vmatprep.subr.bf16.mxu1 %v5486_v26 }
 0x3b8   : > { %v2344_v39 = vadd.f32 %v2343_v37, %v7026_v21  ;;  %v2345_v40 = vpop.f32.mrb[50].mxu1  ;;  %3231 = vmatprep.mubr.bf16.mxu1 %v7106_v31  ;;  %3457 = vmatprep.mubr.bf16.mxu0 %v7106_v31 }
 0x3b9   : > { %v2346_v43 = vadd.f32 %v2345_v40, %v7023_v20  ;;  %v2347_v44 = vpop.f32.mrb[51].mxu1  ;;  %3232 = vmatmul.mubr.bf16.gmra.mrb[76].mxu1 %v7104_v30  ;;  %3458 = vmatmul.mubr.bf16.gmra.mrb[44].mxu0 %v7104_v30  ;;  %v2396_v47 = vmax.f32 %v2342_v34, 0.0 }
 0x3ba   : > { %v2348_v45 = vadd.f32 %v2347_v44, %v7026_v21  ;;  %3295 = vmatpush1.bf16.msra.mxu1 %v5484_v33  ;;  %v2397_v50 = vmax.f32 %v2344_v39, 0.0 }
 0x3bb   : > { %v2398_v48 = vmax.f32 %v2346_v43, 0.0  ;;  %3296 = vmatprep.subr.bf16.mxu1 %v5489_v38  ;;  %v5502_v38 = vld [vmem:[%s7847_s8 + $0x2a8] ss:$28 sps:$4 sm:$0xff]  }
 0x3bc   : > { %v2399_v51 = vmax.f32 %v2348_v45, 0.0  ;;  %v5507_v43 = vld [vmem:[%s7847_s8 + $0x2e4] ss:$28 sps:$4 sm:$0xff]  }
 0x3bd   : > { %v7128_v52 = vpack.c.bf16 %v2398_v48, %v2396_v47 }
 0x3be   : > { %v7130_v53 = vpack.c.bf16 %v2399_v51, %v2397_v50  ;;  %v2351_v54 = vpop.f32.mrb[52].mxu1  ;;  %3297 = vmatpush1.bf16.msra.mxu1 %v5487_v46 }
 0x3bf   : > { %v2352_v58 = vadd.f32 %v2351_v54, %v7023_v20  ;;  %v2353_v61 = vpop.f32.mrb[53].mxu1  ;;  %3298 = vmatprep.subr.bf16.mxu1 %v5492_v49  ;;  %v5505_v49 = vld [vmem:[%s7847_s8 + $0x2e0] ss:$28 sps:$4 sm:$0xff]  }
 0x3c0   : > { %v2354_v2 = vadd.f32 %v2353_v61, %v7026_v21  ;;  %v2355_v3 = vpop.f32.mrb[54].mxu1  ;;  %3241 = vmatprep.mubr.bf16.mxu1 %v7130_v53  ;;  %3467 = vmatprep.mubr.bf16.mxu0 %v7130_v53  ;;  %v5510_v54 = vld [vmem:[%s7847_s8 + $0x31c] ss:$28 sps:$4 sm:$0xff]  }
 0x3c1   : > { %v2356_v4 = vadd.f32 %v2355_v3, %v7023_v20  ;;  %v2357_v5 = vpop.f32.mrb[55].mxu1  ;;  %3242 = vmatmul.mubr.bf16.gmra.mrb[80].mxu1 %v7128_v52  ;;  %3468 = vmatmul.mubr.bf16.gmra.mrb[48].mxu0 %v7128_v52  ;;  %v2400_v8 = vmax.f32 %v2352_v58, 0.0  ;;  %v5514_v3 = vld [vmem:[%s7847_s8 + $0x1d8] ss:$28 sps:$4 sm:$0xff]  }
 0x3c2   : > { %v2358_v6 = vadd.f32 %v2357_v5, %v7026_v21  ;;  %3299 = vmatpush1.bf16.msra.mxu1 %v5490_v57  ;;  %v2401_v63 = vmax.f32 %v2354_v2, 0.0  ;;  %v5511_v2 = vld [vmem:[%s7847_s8 + $0x350] ss:$28 sps:$4 sm:$0xff]  }
 0x3c3   : > { %v2402_v9 = vmax.f32 %v2356_v4, 0.0  ;;  %3300 = vmatprep.subr.bf16.mxu1 %v5495_v1  ;;  %v5513_v1 = vld [vmem:[%s7847_s8 + $0x354] ss:$28 sps:$4 sm:$0xff]  }
 0x3c4   : > { %v2403_v0 = vmax.f32 %v2358_v6, 0.0  ;;  %v5515_v4 = vld [vmem:[%s7847_s8 + $0x18] ss:$28 sps:$4 sm:$0xff]   ;;  %v5516_v5 = vld [vmem:[%s7847_s8 + $0x210] ss:$28 sps:$4 sm:$0xff]  }
 0x3c5   : > { %v7152_v41 = vpack.c.bf16 %v2402_v9, %v2400_v8  ;;  %v5517_v6 = vld [vmem:[%s7847_s8 + $0x50] ss:$28 sps:$4 sm:$0xff]   ;;  %v5519_v8 = vld [vmem:[%s7847_s8 + $0x88] ss:$28 sps:$4 sm:$0xff]   ;;  %v5520_v9 = vld [vmem:[%s7847_s8 + $0x280] ss:$28 sps:$4 sm:$0xff]  }
 0x3c6   : > { %v7154_v27 = vpack.c.bf16 %v2403_v0, %v2401_v63  ;;  %v2361_v12 = vpop.f32.mrb[56].mxu1  ;;  %3301 = vmatpush1.bf16.msra.mxu1 %v5493_v7  ;;  %v5518_v7 = vld [vmem:[%s7847_s8 + $0x248] ss:$28 sps:$4 sm:$0xff]   ;;  %v5522_v63 = vld [vmem:[%s7847_s8 + $0x2b8] ss:$28 sps:$4 sm:$0xff]  }
 0x3c7   : > { %v2362_v14 = vadd.f32 %v2361_v12, %v7023_v20  ;;  %v2363_v15 = vpop.f32.mrb[57].mxu1  ;;  %3302 = vmatprep.subr.bf16.mxu1 %v5498_v10  ;;  %v5521_v10 = vld [vmem:[%s7847_s8 + $0xc0] ss:$28 sps:$4 sm:$0xff]   ;;  %v5523_v0 = vld [vmem:[%s7847_s8 + $0xf8] ss:$28 sps:$4 sm:$0xff]  }
 0x3c8   : > { %v2364_v17 = vadd.f32 %v2363_v15, %v7026_v21  ;;  %v2365_v18 = vpop.f32.mrb[58].mxu1  ;;  %3251 = vmatprep.mubr.bf16.mxu1 %v7154_v27  ;;  %3477 = vmatprep.mubr.bf16.mxu0 %v7154_v27  ;;  %v5524_v12 = vld [vmem:[%s7847_s8 + $0x2f0] ss:$28 sps:$4 sm:$0xff]   ;;  %v5527_v15 = vld [vmem:[%s7847_s8 + $0x168] ss:$28 sps:$4 sm:$0xff]  }
 0x3c9   : > { %v2366_v19 = vadd.f32 %v2365_v18, %v7023_v20  ;;  %v2367_v22 = vpop.f32.mrb[59].mxu1  ;;  %3252 = vmatmul.mubr.bf16.gmra.mrb[84].mxu1 %v7152_v41  ;;  %3478 = vmatmul.mubr.bf16.gmra.mrb[52].mxu0 %v7152_v41  ;;  %v2404_v25 = vmax.f32 %v2362_v14, 0.0  ;;  %v5526_v14 = vld [vmem:[%s7847_s8 + $0x328] ss:$28 sps:$4 sm:$0xff]  }
 0x3ca   : > { %v2368_v23 = vadd.f32 %v2367_v22, %v7026_v21  ;;  %3303 = vmatpush1.bf16.msra.mxu1 %v5496_v13  ;;  %v2405_v29 = vmax.f32 %v2364_v17, 0.0  ;;  %v5525_v13 = vld [vmem:[%s7847_s8 + $0x130] ss:$28 sps:$4 sm:$0xff]   ;;  %v5529_v17 = vld [vmem:[%s7847_s8 + $0x1a0] ss:$28 sps:$4 sm:$0xff]  }
 0x3cb   : > { %v2406_v26 = vmax.f32 %v2366_v19, 0.0  ;;  %3304 = vmatprep.subr.bf16.mxu1 %v5501_v16  ;;  %v5528_v16 = vld [vmem:[%s7847_s8 + $0x360] ss:$28 sps:$4 sm:$0xff]  }
 0x3cc   : > { %v2407_v32 = vmax.f32 %v2368_v23, 0.0 }
 0x3cd   : > { %v7176_v33 = vpack.c.bf16 %v2406_v26, %v2404_v25 }
 0x3ce   : > { %v7178_v34 = vpack.c.bf16 %v2407_v32, %v2405_v29  ;;  %v2371_v37 = vpop.f32.mrb[60].mxu1  ;;  %3305 = vmatpush1.bf16.msra.mxu1 %v5499_v24 }
 0x3cf   : > { %v2372_v39 = vadd.f32 %v2371_v37, %v7023_v20  ;;  %v2373_v40 = vpop.f32.mrb[61].mxu1  ;;  %3306 = vmatprep.subr.bf16.mxu1 %v5504_v28 }
 0x3d0   : > { %v2374_v44 = vadd.f32 %v2373_v40, %v7026_v21  ;;  %v2375_v45 = vpop.f32.mrb[62].mxu1  ;;  %3261 = vmatprep.mubr.bf16.mxu1 %v7178_v34  ;;  %3487 = vmatprep.mubr.bf16.mxu0 %v7178_v34 }
 0x3d1   : > { %v2376_v46 = vadd.f32 %v2375_v45, %v7023_v20  ;;  %v2377_v47 = vpop.f32.mrb[63].mxu1  ;;  %3262 = vmatmul.mubr.bf16.gmra.mrb[88].mxu1 %v7176_v33  ;;  %3488 = vmatmul.mubr.bf16.gmra.mrb[56].mxu0 %v7176_v33  ;;  %v2408_v50 = vmax.f32 %v2372_v39, 0.0 }
 0x3d2   : > { %v2378_v48 = vadd.f32 %v2377_v47, %v7026_v21  ;;  %3307 = vmatpush1.bf16.msra.mxu1 %v5502_v38  ;;  %v2409_v20 = vmax.f32 %v2374_v44, 0.0  ;;  %v5508_v21 = vld [vmem:[%s7847_s8 + $0x318] ss:$28 sps:$4 sm:$0xff]  }
 0x3d3   : > { %v2410_v51 = vmax.f32 %v2376_v46, 0.0  ;;  %3308 = vmatprep.subr.bf16.mxu1 %v5507_v43 }
 0x3d4   : > { %v2411_v57 = vmax.f32 %v2378_v48, 0.0 }
 0x3d5   : > { %v7200_v58 = vpack.c.bf16 %v2410_v51, %v2408_v50 }
 0x3d6   : > { %v7202_v61 = vpack.c.bf16 %v2411_v57, %v2409_v20  ;;  %3309 = vmatpush1.bf16.msra.mxu1 %v5505_v49 }
 0x3d7   : > { %3310 = vmatprep.subr.bf16.mxu1 %v5510_v54 }
 0x3d8   : > { %3271 = vmatprep.mubr.bf16.mxu1 %v7202_v61  ;;  %3497 = vmatprep.mubr.bf16.mxu0 %v7202_v61 }
 0x3d9   : > { %3272 = vmatmul.mubr.bf16.gmra.mrb[92].mxu1 %v7200_v58  ;;  %3498 = vmatmul.mubr.bf16.gmra.mrb[60].mxu0 %v7200_v58 }
 0x3da   : > { %3311 = vmatpush1.bf16.msra.mxu1 %v5508_v21  ;;  %3314 = vmatprep.mubr.bf16.mxu1 %v7034_v36 }
 0x3db   : > { %3312 = vmatprep.subr.bf16.mxu1 %v5513_v1 }
 0x3de   : > { %3313 = vmatpush1.bf16.msra.mxu1 %v5511_v2 }
 0x3df   : > { %4928 = vmatprep.subr.bf16.mxu1 %v5514_v3 }
 0x3e1   : > { %3315 = vmatmul.mubr.bf16.vlgmr.msra.gmra.mrb[96].mxu1 %v7032_v35 }
 0x3e2   : > { %3324 = vmatprep.mubr.bf16.mxu1 %v7058_v56  ;;  %4929 = vmatpush3.bf16.msra.mxu1 %v5515_v4 }
 0x3e3   : > { %4930 = vmatprep.subr.bf16.mxu1 %v5516_v5 }
 0x3e6   : > { %4931 = vmatpush3.bf16.msra.mxu1 %v5517_v6 }
 0x3e7   : > { %4932 = vmatprep.subr.bf16.mxu1 %v5518_v7 }
 0x3e9   : > { %3325 = vmatmul.mubr.bf16.gmra.mrb[100].mxu1 %v7056_v55 }
 0x3ea   : > { %3334 = vmatprep.mubr.bf16.mxu1 %v7082_v42  ;;  %4933 = vmatpush3.bf16.msra.mxu1 %v5519_v8 }
 0x3eb   : > { %4934 = vmatprep.subr.bf16.mxu1 %v5520_v9 }
 0x3ee   : > { %4935 = vmatpush3.bf16.msra.mxu1 %v5521_v10 }
 0x3ef   : > { %4936 = vmatprep.subr.bf16.mxu1 %v5522_v63 }
 0x3f1   : > { %3335 = vmatmul.mubr.bf16.gmra.mrb[104].mxu1 %v7080_v11 }
 0x3f2   : > { %3344 = vmatprep.mubr.bf16.mxu1 %v7106_v31  ;;  %4937 = vmatpush3.bf16.msra.mxu1 %v5523_v0 }
 0x3f3   : > { %4938 = vmatprep.subr.bf16.mxu1 %v5524_v12 }
 0x3f6   : > { %4939 = vmatpush3.bf16.msra.mxu1 %v5525_v13 }
 0x3f7   : > { %4940 = vmatprep.subr.bf16.mxu1 %v5526_v14 }
 0x3f9   : > { %3345 = vmatmul.mubr.bf16.gmra.mrb[108].mxu1 %v7104_v30 }
 0x3fa   : > { %3354 = vmatprep.mubr.bf16.mxu1 %v7130_v53  ;;  %4941 = vmatpush3.bf16.msra.mxu1 %v5527_v15 }
 0x3fb   : > { %4942 = vmatprep.subr.bf16.mxu1 %v5528_v16 }
 0x3fe   : > { %4943 = vmatpush3.bf16.msra.mxu1 %v5529_v17 }
 0x401   : > { %3355 = vmatmul.mubr.bf16.gmra.mrb[112].mxu1 %v7128_v52 }
 0x402   : > { %3364 = vmatprep.mubr.bf16.mxu1 %v7154_v27 }
 0x409   : > { %3365 = vmatmul.mubr.bf16.gmra.mrb[116].mxu1 %v7152_v41 }
 0x40a   : > { %3374 = vmatprep.mubr.bf16.mxu1 %v7178_v34 }
 0x411   : > { %3375 = vmatmul.mubr.bf16.gmra.mrb[120].mxu1 %v7176_v33 }
 0x412   : > { %3384 = vmatprep.mubr.bf16.mxu1 %v7202_v61 }
 0x419   : > { %3385 = vmatmul.mubr.bf16.gmra.mrb[124].mxu1 %v7200_v58 }
 0x41a   : > { %3540 = vmatprep.mubr.bf16.mxu1 %v7034_v36  ;;  %v7301_v36 = vld [vmem:[%s7848_s9] sm:$0xff] }
 0x421   : > { %3541 = vmatmul.mubr.bf16.vlgmr.msra.gmra.mrb[128].mxu1 %v7032_v35  ;;  %v2576_v35 = vsub.s32 4, %v6621_v59 }
 0x422   : > { %3548 = vmatprep.mubr.bf16.mxu1 %v7058_v56  ;;  %v7306_v56 = vrot.slane %v7301_v36, %v6624_v60 }
 0x429   : > { %3549 = vmatmul.mubr.bf16.gmra.mrb[132].mxu1 %v7056_v55  ;;  %v2580_v55 = vsub.s32 5, %v6621_v59 }
 0x42a   : > { %3556 = vmatprep.mubr.bf16.mxu1 %v7082_v42  ;;  %v7313_v42 = vrot.slane %v7301_v36, %v6630_v62 }
 0x431   : > { %3557 = vmatmul.mubr.bf16.gmra.mrb[136].mxu1 %v7080_v11  ;;  %v7309_v11 = vrot.slane %v7301_v36, %v2576_v35 }
 0x432   : > { %3564 = vmatprep.mubr.bf16.mxu1 %v7106_v31 }
 0x439   : > { %3565 = vmatmul.mubr.bf16.gmra.mrb[140].mxu1 %v7104_v30  ;;  %v7316_v30 = vrot.slane %v7301_v36, %v2580_v55 }
 0x43a   : > { %3572 = vmatprep.mubr.bf16.mxu1 %v7130_v53 }
 0x441   : > { %3573 = vmatmul.mubr.bf16.gmra.mrb[144].mxu1 %v7128_v52 }
 0x442   : > { %3580 = vmatprep.mubr.bf16.mxu1 %v7154_v27 }
 0x449   : > { %3581 = vmatmul.mubr.bf16.gmra.mrb[148].mxu1 %v7152_v41 }
 0x44a   : > { %3588 = vmatprep.mubr.bf16.mxu1 %v7178_v34 }
 0x451   : > { %3589 = vmatmul.mubr.bf16.gmra.mrb[152].mxu1 %v7176_v33 }
 0x452   : > { %3596 = vmatprep.mubr.bf16.mxu1 %v7202_v61 }
 0x459   : > { %3597 = vmatmul.mubr.bf16.gmra.mrb[156].mxu1 %v7200_v58 }
 0x474   : > { %v3203_v31 = vpop.f32.mrb[64].mxu1  ;;  %v3429_v52 = vpop.f32.mrb[32].mxu0 }
 0x475   : > { %v3204_v53 = vadd.f32 %v3203_v31, %v7306_v56  ;;  %v3430_v41 = vadd.f32 %v3429_v52, %v7309_v11  ;;  %v3205_v27 = vpop.f32.mrb[65].mxu1  ;;  %v3431_v18 = vpop.f32.mrb[33].mxu0 }
 0x476   : > { %v3206_v60 = vadd.f32 %v3205_v27, %v7313_v42  ;;  %v3432_v19 = vadd.f32 %v3431_v18, %v7316_v30  ;;  %v3207_v22 = vpop.f32.mrb[66].mxu1  ;;  %v3433_v23 = vpop.f32.mrb[34].mxu0 }
 0x477   : > { %v4813_v24 = vmul.f32 -1.442695, %v3204_v53  ;;  %v4817_v62 = vmul.f32 -1.442695, %v3430_v41  ;;  %v3208_v25 = vadd.f32 %v3207_v22, %v7306_v56  ;;  %v3434_v26 = vadd.f32 %v3433_v23, %v7309_v11  ;;  %v3209_v28 = vpop.f32.mrb[67].mxu1  ;;  %v3435_v29 = vpop.f32.mrb[35].mxu0 }
 0x478   : > { %v4814_v32 = vmul.f32 -1.442695, %v3206_v60  ;;  %v4818_v33 = vmul.f32 -1.442695, %v3432_v19  ;;  %v3210_v34 = vadd.f32 %v3209_v28, %v7313_v42  ;;  %v3436_v37 = vadd.f32 %v3435_v29, %v7316_v30 }
 0x479   : > { %5530 = vpow2.f32 %v4813_v24  ;;  %v4820_v38 = vmul.f32 -1.442695, %v3208_v25  ;;  %v4824_v39 = vmul.f32 -1.442695, %v3434_v26 }
 0x47a   : > { %5532 = vpow2.f32 %v4817_v62  ;;  %v4821_v40 = vmul.f32 -1.442695, %v3210_v34  ;;  %v4825_v43 = vmul.f32 -1.442695, %v3436_v37 }
 0x47b   : > { %5534 = vpow2.f32 %v4814_v32 }
 0x47c   : > { %5536 = vpow2.f32 %v4818_v33  ;;  %v3213_v44 = vpop.f32.mrb[68].mxu1  ;;  %v3439_v45 = vpop.f32.mrb[36].mxu0 }
 0x47d   : > { %5538 = vpow2.f32 %v4820_v38  ;;  %v3214_v46 = vadd.f32 %v3213_v44, %v7306_v56  ;;  %v3440_v47 = vadd.f32 %v3439_v45, %v7309_v11  ;;  %v3215_v48 = vpop.f32.mrb[69].mxu1  ;;  %v3441_v49 = vpop.f32.mrb[37].mxu0 }
 0x47e   : > { %5540 = vpow2.f32 %v4824_v39  ;;  %v3216_v50 = vadd.f32 %v3215_v48, %v7313_v42  ;;  %v3442_v51 = vadd.f32 %v3441_v49, %v7316_v30  ;;  %v3217_v54 = vpop.f32.mrb[70].mxu1  ;;  %v3443_v20 = vpop.f32.mrb[38].mxu0 }
 0x47f   : > { %5542 = vpow2.f32 %v4821_v40  ;;  %v4827_v57 = vmul.f32 -1.442695, %v3214_v46  ;;  %v4831_v58 = vmul.f32 -1.442695, %v3440_v47  ;;  %v3218_v61 = vadd.f32 %v3217_v54, %v7306_v56  ;;  %v3219_v21 = vpop.f32.mrb[71].mxu1  ;;  %v3445_v1 = vpop.f32.mrb[39].mxu0 }
 0x480   : > { %5544 = vpow2.f32 %v4825_v43  ;;  %v4828_v2 = vmul.f32 -1.442695, %v3216_v50  ;;  %v4832_v3 = vmul.f32 -1.442695, %v3442_v51  ;;  %v3444_v23 = vadd.f32 %v3443_v20, %v7309_v11 }
 0x481   : > { %5546 = vpow2.f32 %v4827_v57  ;;  %v4834_v4 = vmul.f32 -1.442695, %v3218_v61  ;;  %v3220_v25 = vadd.f32 %v3219_v21, %v7313_v42  ;;  %v3446_v32 = vadd.f32 %v3445_v1, %v7316_v30 }
 0x482   : > { %5548 = vpow2.f32 %v4831_v58  ;;  %v4838_v46 = vmul.f32 -1.442695, %v3444_v23 }
 0x483   : > { %v5531_v5 = vpop.eup %5530  ;;  %5550 = vpow2.f32 %v4828_v2  ;;  %v4835_v54 = vmul.f32 -1.442695, %v3220_v25  ;;  %v4839_v61 = vmul.f32 -1.442695, %v3446_v32 }
 0x484   : > { %v5533_v6 = vpop.eup %5532  ;;  %v3941_v7 = vadd.f32 1.0, %v5531_v5  ;;  %5552 = vpow2.f32 %v4832_v3  ;;  %v3223_v8 = vpop.f32.mrb[72].mxu1 }
 0x485   : > { %v3449_v9 = vpop.f32.mrb[40].mxu0  ;;  %v5535_v10 = vpop.eup %5534  ;;  %v3945_v63 = vadd.f32 1.0, %v5533_v6  ;;  %5554 = vpow2.f32 %v4834_v4  ;;  %v3224_v39 = vadd.f32 %v3223_v8, %v7306_v56 }
 0x486   : > { %v3225_v0 = vpop.f32.mrb[73].mxu1  ;;  %v3451_v12 = vpop.f32.mrb[41].mxu0  ;;  %5556 = vrcp.f32 %v3941_v7  ;;  %v3942_v14 = vadd.f32 1.0, %v5535_v10  ;;  %v3450_v47 = vadd.f32 %v3449_v9, %v7309_v11 }
 0x487   : > { %v5537_v13 = vpop.eup %5536  ;;  %v3227_v15 = vpop.f32.mrb[74].mxu1  ;;  %5558 = vrcp.f32 %v3945_v63  ;;  %v3226_v20 = vadd.f32 %v3225_v0, %v7313_v42  ;;  %v3452_v21 = vadd.f32 %v3451_v12, %v7316_v30  ;;  %v4841_v2 = vmul.f32 -1.442695, %v3224_v39 }
 0x488   : > { %v7331_v16 = vpop.f32.mrb[42].mxu0  ;;  %v5539_v17 = vpop.eup %5538  ;;  %v3946_v35 = vadd.f32 1.0, %v5537_v13  ;;  %5560 = vrcp.f32 %v3942_v14  ;;  %v3228_v3 = vadd.f32 %v3227_v15, %v7306_v56  ;;  %v4845_v5 = vmul.f32 -1.442695, %v3450_v47 }
 0x489   : > { %v7333_v55 = vpop.f32.mrb[75].mxu1  ;;  %v5541_v31 = vpop.eup %5540  ;;  %v3948_v52 = vadd.f32 1.0, %v5539_v17  ;;  %v3454_v6 = vadd.f32 %v7331_v16, %v7309_v11  ;;  %v4842_v8 = vmul.f32 -1.442695, %v3226_v20  ;;  %v4846_v12 = vmul.f32 -1.442695, %v3452_v21 }
 0x48a   : > { %v7335_v53 = vpop.f32.mrb[43].mxu0  ;;  %v5543_v41 = vpop.eup %5542  ;;  %5562 = vrcp.f32 %v3946_v35  ;;  %v3952_v27 = vadd.f32 1.0, %v5541_v31  ;;  %v3230_v9 = vadd.f32 %v7333_v55, %v7313_v42  ;;  %v4848_v17 = vmul.f32 -1.442695, %v3228_v3 }
 0x48b   : > { %v5545_v18 = vpop.eup %5544  ;;  %5564 = vrcp.f32 %v3948_v52  ;;  %v3949_v60 = vadd.f32 1.0, %v5543_v41  ;;  %v3456_v13 = vadd.f32 %v7335_v53, %v7316_v30  ;;  %v4852_v53 = vmul.f32 -1.442695, %v3454_v6 }
 0x48c   : > { %v5547_v19 = vpop.eup %5546  ;;  %5566 = vrcp.f32 %v3952_v27  ;;  %v3953_v22 = vadd.f32 1.0, %v5545_v18  ;;  %v3233_v26 = vpop.f32.mrb[76].mxu1 }
 0x48d   : > { %v5549_v24 = vpop.eup %5548  ;;  %5568 = vrcp.f32 %v3949_v60  ;;  %v3955_v62 = vadd.f32 1.0, %v5547_v19  ;;  %v3459_v33 = vpop.f32.mrb[44].mxu0  ;;  %v3234_v35 = vadd.f32 %v3233_v26, %v7306_v56  ;;  %v4849_v19 = vmul.f32 -1.442695, %v3230_v9 }
 0x48e   : > { %v5551_v28 = vpop.eup %5550  ;;  %5570 = vrcp.f32 %v3953_v22  ;;  %v3959_v29 = vadd.f32 1.0, %v5549_v24  ;;  %v7340_v34 = vpop.f32.mrb[77].mxu1  ;;  %v3460_v41 = vadd.f32 %v3459_v33, %v7309_v11  ;;  %v4853_v23 = vmul.f32 -1.442695, %v3456_v13 }
 0x48f   : > { %v5553_v37 = vpop.eup %5552  ;;  %5572 = vrcp.f32 %v3955_v62  ;;  %v3956_v38 = vadd.f32 1.0, %v5551_v28  ;;  %v7350_v40 = vpop.f32.mrb[45].mxu0  ;;  %v4855_v25 = vmul.f32 -1.442695, %v3234_v35  ;;  %v3236_v21 = vadd.f32 %v7340_v34, %v7313_v42 }
 0x490   : > { %v7352_v43 = vpop.f32.mrb[78].mxu1  ;;  %v5555_v44 = vpop.eup %5554  ;;  %5574 = vrcp.f32 %v3959_v29  ;;  %v3960_v45 = vadd.f32 1.0, %v5553_v37  ;;  %v4859_v28 = vmul.f32 -1.442695, %v3460_v41 }
 0x491   : > { %v7355_v48 = vpop.f32.mrb[46].mxu0  ;;  %v7357_v49 = vpop.f32.mrb[79].mxu1  ;;  %5576 = vrcp.f32 %v3956_v38  ;;  %v3962_v51 = vadd.f32 1.0, %v5555_v44  ;;  %v3238_v41 = vadd.f32 %v7352_v43, %v7306_v56 }
 0x492   : > { %v5557_v50 = vpop.eup %5556  ;;  %v7360_v57 = vpop.f32.mrb[47].mxu0  ;;  %5578 = vrcp.f32 %v3960_v45 }
 0x493   : > { %v5559_v58 = vpop.eup %5558  ;;  %4277 = vst [vmem:[%s7347_s14] sm:$0xff] %v5557_v50  ;;  %5580 = vrcp.f32 %v3962_v51 }
 0x494   : > { %v5561_v1 = vpop.eup %5560  ;;  %4281 = vst [vmem:[%s7347_s14 + $0x20] sm:$0xff] %v5559_v58  ;;  %5582 = vpow2.f32 %v4838_v46  ;;  %v7372_v10 = vpop.f32.mrb[80].mxu1 }
 0x495   : > { %v5563_v4 = vpop.eup %5562  ;;  %4278 = vst [vmem:[%s7347_s14 + $0x8] sm:$0xff] %v5561_v1  ;;  %5584 = vpow2.f32 %v4835_v54  ;;  %v7374_v63 = vpop.f32.mrb[48].mxu0 }
 0x496   : > { %v5565_v7 = vpop.eup %5564  ;;  %4282 = vst [vmem:[%s7347_s14 + $0x28] sm:$0xff] %v5563_v4  ;;  %5586 = vpow2.f32 %v4839_v61  ;;  %v7379_v14 = vpop.f32.mrb[81].mxu1  ;;  %v3462_v4 = vadd.f32 %v7350_v40, %v7316_v30 }
 0x497   : > { %v5567_v0 = vpop.eup %5566  ;;  %4284 = vst [vmem:[%s7347_s14 + $0x38] sm:$0xff] %v5565_v7  ;;  %v7381_v15 = vpop.f32.mrb[49].mxu0  ;;  %5588 = vpow2.f32 %v4841_v2 }
 0x498   : > { %v5569_v16 = vpop.eup %5568  ;;  %4288 = vst [vmem:[%s7347_s14 + $0x58] sm:$0xff] %v5567_v0  ;;  %v7385_v55 = vpop.f32.mrb[82].mxu1  ;;  %5590 = vpow2.f32 %v4845_v5 }
 0x499   : > { %v7387_v31 = vpop.f32.mrb[50].mxu0  ;;  %v5571_v52 = vpop.eup %5570  ;;  %4285 = vst [vmem:[%s7347_s14 + $0x40] sm:$0xff] %v5569_v16  ;;  %5592 = vpow2.f32 %v4842_v8 }
 0x49a   : > { %v7391_v27 = vpop.f32.mrb[83].mxu1  ;;  %v3475_v18 = vpop.f32.mrb[51].mxu0  ;;  %4289 = vst [vmem:[%s7347_s14 + $0x60] sm:$0xff] %v5571_v52  ;;  %5594 = vpow2.f32 %v4846_v12 }
 0x49b   : > { %v5573_v60 = vpop.eup %5572  ;;  %v7396_v24 = vadd.f32 %v3475_v18, %v7316_v30  ;;  %5596 = vpow2.f32 %v4848_v17  ;;  %v4856_v17 = vmul.f32 -1.442695, %v3236_v21 }
 0x49c   : > { %v5575_v22 = vpop.eup %5574  ;;  %4291 = vst [vmem:[%s7347_s14 + $0x70] sm:$0xff] %v5573_v60  ;;  %5598 = vpow2.f32 %v4852_v53  ;;  %v3253_v32 = vpop.f32.mrb[84].mxu1  ;;  %v7430_v53 = vmul.f32 -1.442695, %v3462_v4 }
 0x49d   : > { %v5577_v62 = vpop.eup %5576  ;;  %4295 = vst [vmem:[%s7347_s14 + $0x90] sm:$0xff] %v5575_v22  ;;  %5600 = vpow2.f32 %v4849_v19  ;;  %v3479_v33 = vpop.f32.mrb[52].mxu0  ;;  %v7403_v38 = vadd.f32 %v3253_v32, %v7306_v56  ;;  %v3464_v22 = vadd.f32 %v7355_v48, %v7309_v11  ;;  %v3240_v48 = vadd.f32 %v7357_v49, %v7313_v42 }
 0x49e   : > { %v5579_v26 = vpop.eup %5578  ;;  %4292 = vst [vmem:[%s7347_s14 + $0x78] sm:$0xff] %v5577_v62  ;;  %5602 = vpow2.f32 %v4853_v23  ;;  %v7406_v39 = vadd.f32 %v3479_v33, %v7309_v11  ;;  %v3255_v44 = vpop.f32.mrb[85].mxu1  ;;  %v3244_v49 = vadd.f32 %v7372_v10, %v7306_v56  ;;  %v3470_v10 = vadd.f32 %v7374_v63, %v7309_v11 }
 0x49f   : > { %v5581_v29 = vpop.eup %5580  ;;  %4296 = vst [vmem:[%s7347_s14 + $0x98] sm:$0xff] %v5579_v26  ;;  %v3481_v45 = vpop.f32.mrb[53].mxu0  ;;  %5604 = vpow2.f32 %v4855_v25  ;;  %v7409_v50 = vadd.f32 %v3255_v44, %v7313_v42  ;;  %v3472_v63 = vadd.f32 %v7381_v15, %v7316_v30 }
 0x4a0   : > { %v5583_v37 = vpop.eup %5582  ;;  %4298 = vst [vmem:[%s7347_s14 + $0xa8] sm:$0xff] %v5581_v29  ;;  %v7412_v51 = vadd.f32 %v3481_v45, %v7316_v30  ;;  %v3257_v54 = vpop.f32.mrb[86].mxu1  ;;  %5606 = vpow2.f32 %v4859_v28 }
 0x4a1   : > { %v5585_v46 = vpop.eup %5584  ;;  %v3966_v47 = vadd.f32 1.0, %v5583_v37  ;;  %v3483_v20 = vpop.f32.mrb[54].mxu0  ;;  %v7419_v8 = vadd.f32 %v3257_v54, %v7306_v56 }
 0x4a2   : > { %v5587_v58 = vpop.eup %5586  ;;  %v3963_v61 = vadd.f32 1.0, %v5585_v46  ;;  %v3259_v1 = vpop.f32.mrb[87].mxu1  ;;  %v7422_v9 = vadd.f32 %v3483_v20, %v7309_v11 }
 0x4a3   : > { %v5589_v2 = vpop.eup %5588  ;;  %5608 = vrcp.f32 %v3966_v47  ;;  %v3967_v3 = vadd.f32 1.0, %v5587_v58  ;;  %v3485_v5 = vpop.f32.mrb[55].mxu0  ;;  %v7425_v12 = vadd.f32 %v3259_v1, %v7313_v42  ;;  %v4862_v58 = vmul.f32 -1.442695, %v3238_v41 }
 0x4a4   : > { %v5591_v6 = vpop.eup %5590  ;;  %5610 = vrcp.f32 %v3963_v61  ;;  %v3969_v7 = vadd.f32 1.0, %v5589_v2  ;;  %v7428_v13 = vadd.f32 %v3485_v5, %v7316_v30  ;;  %v3263_v18 = vpop.f32.mrb[88].mxu1  ;;  %v3466_v61 = vadd.f32 %v7360_v57, %v7316_v30 }
 0x4a5   : > { %v5593_v0 = vpop.eup %5592  ;;  %5612 = vrcp.f32 %v3967_v3  ;;  %v3973_v34 = vadd.f32 1.0, %v5591_v6  ;;  %v7437_v23 = vadd.f32 %v3263_v18, %v7306_v56  ;;  %v3489_v62 = vpop.f32.mrb[56].mxu0 }
 0x4a6   : > { %v5595_v40 = vpop.eup %5594  ;;  %5614 = vrcp.f32 %v3969_v7  ;;  %v3970_v16 = vadd.f32 1.0, %v5593_v0  ;;  %v3265_v25 = vpop.f32.mrb[89].mxu1  ;;  %v7440_v29 = vadd.f32 %v3489_v62, %v7309_v11  ;;  %v4866_v0 = vmul.f32 -1.442695, %v3464_v22 }
 0x4a7   : > { %v5597_v35 = vpop.eup %5596  ;;  %5616 = vrcp.f32 %v3973_v34  ;;  %v3974_v52 = vadd.f32 1.0, %v5595_v40  ;;  %v7443_v43 = vadd.f32 %v3265_v25, %v7313_v42  ;;  %v3491_v32 = vpop.f32.mrb[57].mxu0 }
 0x4a8   : > { %v5599_v60 = vpop.eup %5598  ;;  %5618 = vrcp.f32 %v3970_v16  ;;  %v3976_v19 = vadd.f32 1.0, %v5597_v35  ;;  %v3267_v33 = vpop.f32.mrb[90].mxu1  ;;  %v7448_v45 = vadd.f32 %v3491_v32, %v7316_v30  ;;  %v4863_v16 = vmul.f32 -1.442695, %v3240_v48 }
 0x4a9   : > { %v5601_v26 = vpop.eup %5600  ;;  %5620 = vrcp.f32 %v3974_v52  ;;  %v3980_v28 = vadd.f32 1.0, %v5599_v60  ;;  %v3493_v46 = vpop.f32.mrb[58].mxu0  ;;  %v7455_v3 = vadd.f32 %v3267_v33, %v7306_v56  ;;  %v4867_v35 = vmul.f32 -1.442695, %v3466_v61 }
 0x4aa   : > { %v5603_v37 = vpop.eup %5602  ;;  %5622 = vrcp.f32 %v3976_v19  ;;  %v3977_v44 = vadd.f32 1.0, %v5601_v26  ;;  %v3269_v47 = vpop.f32.mrb[91].mxu1  ;;  %v7458_v6 = vadd.f32 %v3493_v46, %v7309_v11  ;;  %v3246_v52 = vadd.f32 %v7379_v14, %v7313_v42 }
 0x4ab   : > { %v5605_v54 = vpop.eup %5604  ;;  %5624 = vrcp.f32 %v3980_v28  ;;  %v3981_v20 = vadd.f32 1.0, %v5603_v37  ;;  %v3495_v21 = vpop.f32.mrb[59].mxu0  ;;  %v7461_v7 = vadd.f32 %v3269_v47, %v7313_v42  ;;  %v4869_v14 = vmul.f32 -1.442695, %v3244_v49 }
 0x4ac   : > { %v5607_v1 = vpop.eup %5606  ;;  %5626 = vrcp.f32 %v3977_v44  ;;  %v3983_v2 = vadd.f32 1.0, %v5605_v54  ;;  %v7467_v34 = vadd.f32 %v3495_v21, %v7316_v30  ;;  %v3273_v41 = vpop.f32.mrb[92].mxu1  ;;  %v4873_v37 = vmul.f32 -1.442695, %v3470_v10 }
 0x4ad   : > { %v5609_v4 = vpop.eup %5608  ;;  %5628 = vrcp.f32 %v3981_v20  ;;  %v3987_v5 = vadd.f32 1.0, %v5607_v1  ;;  %v3499_v18 = vpop.f32.mrb[60].mxu0  ;;  %v7476_v19 = vadd.f32 %v3273_v41, %v7306_v56  ;;  %v3248_v44 = vadd.f32 %v7385_v55, %v7306_v56 }
 0x4ae   : > { %v5611_v57 = vpop.eup %5610  ;;  %4302 = vst [vmem:[%s7347_s14 + $0xc8] sm:$0xff] %v5609_v4  ;;  %5630 = vrcp.f32 %v3983_v2  ;;  %v7479_v22 = vadd.f32 %v3499_v18, %v7309_v11  ;;  %v3275_v62 = vpop.f32.mrb[93].mxu1  ;;  %v4870_v54 = vmul.f32 -1.442695, %v3246_v52  ;;  %v3474_v20 = vadd.f32 %v7387_v31, %v7309_v11 }
 0x4af   : > { %v5613_v40 = vpop.eup %5612  ;;  %4299 = vst [vmem:[%s7347_s14 + $0xb0] sm:$0xff] %v5611_v57  ;;  %5632 = vrcp.f32 %v3987_v5  ;;  %v3501_v25 = vpop.f32.mrb[61].mxu0  ;;  %v7484_v28 = vadd.f32 %v3275_v62, %v7313_v42  ;;  %v4874_v31 = vmul.f32 -1.442695, %v3472_v63  ;;  %v4876_v2 = vmul.f32 -1.442695, %v3248_v44 }
 0x4b0   : > { %v5615_v60 = vpop.eup %5614  ;;  %4303 = vst [vmem:[%s7347_s14 + $0xd0] sm:$0xff] %v5613_v40  ;;  %5634 = vpow2.f32 %v4856_v17  ;;  %v7487_v17 = vadd.f32 %v3501_v25, %v7316_v30  ;;  %v3277_v15 = vpop.f32.mrb[94].mxu1 }
 0x4b1   : > { %v5617_v26 = vpop.eup %5616  ;;  %4305 = vst [vmem:[%s7347_s14 + $0xe0] sm:$0xff] %v5615_v60  ;;  %5636 = vpow2.f32 %v7430_v53  ;;  %v3503_v32 = vpop.f32.mrb[62].mxu0  ;;  %v7493_v48 = vadd.f32 %v3277_v15, %v7306_v56  ;;  %v3250_v56 = vadd.f32 %v7391_v27, %v7313_v42  ;;  %v4880_v27 = vmul.f32 -1.442695, %v3474_v20 }
 0x4b2   : > { %v5619_v33 = vpop.eup %5618  ;;  %4309 = vst [vmem:[%s7347_s14 + $0x100] sm:$0xff] %v5617_v26  ;;  %5638 = vpow2.f32 %v4862_v58  ;;  %v3279_v53 = vpop.f32.mrb[95].mxu1  ;;  %v7499_v58 = vadd.f32 %v3503_v32, %v7309_v11 }
 0x4b3   : > { %v3505_v46 = vpop.f32.mrb[63].mxu0  ;;  %v5621_v47 = vpop.eup %5620  ;;  %4306 = vst [vmem:[%s7347_s14 + $0xe8] sm:$0xff] %v5619_v33  ;;  %5640 = vpow2.f32 %v4866_v0  ;;  %v7505_v55 = vadd.f32 %v3279_v53, %v7313_v42 }
 0x4b4   : > { %v5623_v61 = vpop.eup %5622  ;;  %4310 = vst [vmem:[%s7347_s14 + $0x108] sm:$0xff] %v5621_v47  ;;  %5642 = vpow2.f32 %v4863_v16  ;;  %v7508_v21 = vadd.f32 %v3505_v46, %v7316_v30  ;;  %v7513_v42 = vpop.f32.mrb[96].mxu1  ;;  %v4877_v30 = vmul.f32 -1.442695, %v3250_v56 }
 0x4b5   : > { %v5625_v1 = vpop.eup %5624  ;;  %4312 = vst [vmem:[%s7347_s14 + $0x118] sm:$0xff] %v5623_v61  ;;  %5644 = vpow2.f32 %v4867_v35  ;;  %v7516_v5 = vpop.f32.mrb[97].mxu1 }
 0x4b6   : > { %v5627_v11 = vpop.eup %5626  ;;  %4316 = vst [vmem:[%s7347_s14 + $0x138] sm:$0xff] %v5625_v1  ;;  %5646 = vpow2.f32 %v4869_v14  ;;  %v7519_v0 = vpop.f32.mrb[98].mxu1 }
 0x4b7   : > { %v5629_v49 = vpop.eup %5628  ;;  %4313 = vst [vmem:[%s7347_s14 + $0x120] sm:$0xff] %v5627_v11  ;;  %5648 = vpow2.f32 %v4873_v37  ;;  %v7522_v40 = vpop.f32.mrb[99].mxu1 }
 0x4b8   : > { %v5631_v4 = vpop.eup %5630  ;;  %4317 = vst [vmem:[%s7347_s14 + $0x140] sm:$0xff] %v5629_v49  ;;  %5650 = vpow2.f32 %v4870_v54 }
 0x4b9   : > { %v5633_v57 = vpop.eup %5632  ;;  %4319 = vst [vmem:[%s7347_s14 + $0x150] sm:$0xff] %v5631_v4  ;;  %5652 = vpow2.f32 %v4874_v31 }
 0x4ba   : > { %v5635_v10 = vpop.eup %5634  ;;  %4323 = vst [vmem:[%s7347_s14 + $0x170] sm:$0xff] %v5633_v57  ;;  %5654 = vpow2.f32 %v4876_v2  ;;  %v4883_v57 = vmul.f32 -1.442695, %v7403_v38 }
 0x4bb   : > { %v5637_v16 = vpop.eup %5636  ;;  %v3984_v35 = vadd.f32 1.0, %v5635_v10  ;;  %5656 = vpow2.f32 %v4880_v27  ;;  %v4881_v27 = vmul.f32 -1.442695, %v7396_v24  ;;  %v4884_v24 = vmul.f32 -1.442695, %v7409_v50 }
 0x4bc   : > { %v5639_v52 = vpop.eup %5638  ;;  %v3988_v41 = vadd.f32 1.0, %v5637_v16  ;;  %5658 = vpow2.f32 %v4877_v30  ;;  %v7524_v14 = vpop.f32.mrb[100].mxu1  ;;  %v4894_v50 = vmul.f32 -1.442695, %v7422_v9 }
 0x4bd   : > { %v5641_v18 = vpop.eup %5640  ;;  %5660 = vrcp.f32 %v3984_v35  ;;  %v3990_v60 = vadd.f32 1.0, %v5639_v52  ;;  %v7526_v33 = vpop.f32.mrb[101].mxu1  ;;  %v4887_v35 = vmul.f32 -1.442695, %v7406_v39 }
 0x4be   : > { %v5643_v63 = vpop.eup %5642  ;;  %5662 = vrcp.f32 %v3988_v41  ;;  %v3994_v62 = vadd.f32 1.0, %v5641_v18  ;;  %v7528_v53 = vpop.f32.mrb[102].mxu1 }
 0x4bf   : > { %v5645_v25 = vpop.eup %5644  ;;  %5664 = vrcp.f32 %v3990_v60  ;;  %v3991_v26 = vadd.f32 1.0, %v5643_v63  ;;  %v7530_v54 = vpop.f32.mrb[103].mxu1  ;;  %v4888_v60 = vmul.f32 -1.442695, %v7412_v51 }
 0x4c0   : > { %v5647_v15 = vpop.eup %5646  ;;  %5666 = vrcp.f32 %v3994_v62  ;;  %v3995_v32 = vadd.f32 1.0, %v5645_v25  ;;  %v4890_v62 = vmul.f32 -1.442695, %v7419_v8  ;;  %v4897_v8 = vmul.f32 -1.442695, %v7437_v23 }
 0x4c1   : > { %v5649_v37 = vpop.eup %5648  ;;  %5668 = vrcp.f32 %v3991_v26  ;;  %v3997_v44 = vadd.f32 1.0, %v5647_v15  ;;  %v4891_v15 = vmul.f32 -1.442695, %v7425_v12  ;;  %v4901_v12 = vmul.f32 -1.442695, %v7440_v29 }
 0x4c2   : > { %v5651_v46 = vpop.eup %5650  ;;  %5670 = vrcp.f32 %v3995_v32  ;;  %v4001_v47 = vadd.f32 1.0, %v5649_v37  ;;  %v4895_v32 = vmul.f32 -1.442695, %v7428_v13  ;;  %v4898_v13 = vmul.f32 -1.442695, %v7443_v43 }
 0x4c3   : > { %v5653_v20 = vpop.eup %5652  ;;  %5672 = vrcp.f32 %v3997_v44  ;;  %v3998_v61 = vadd.f32 1.0, %v5651_v46  ;;  %v4902_v23 = vmul.f32 -1.442695, %v7448_v45 }
 0x4c4   : > { %v5655_v56 = vpop.eup %5654  ;;  %5674 = vrcp.f32 %v4001_v47  ;;  %v4002_v1 = vadd.f32 1.0, %v5653_v20  ;;  %v7534_v10 = vpop.f32.mrb[104].mxu1 }
 0x4c5   : > { %v5657_v31 = vpop.eup %5656  ;;  %5676 = vrcp.f32 %v3998_v61  ;;  %v4004_v11 = vadd.f32 1.0, %v5655_v56  ;;  %v7538_v52 = vpop.f32.mrb[105].mxu1 }
 0x4c6   : > { %v5659_v2 = vpop.eup %5658  ;;  %5678 = vrcp.f32 %v4002_v1  ;;  %v4008_v49 = vadd.f32 1.0, %v5657_v31  ;;  %v7542_v18 = vpop.f32.mrb[106].mxu1 }
 0x4c7   : > { %v5661_v4 = vpop.eup %5660  ;;  %5680 = vrcp.f32 %v4004_v11  ;;  %v4005_v30 = vadd.f32 1.0, %v5659_v2  ;;  %v7546_v63 = vpop.f32.mrb[107].mxu1 }
 0x4c8   : > { %v5663_v16 = vpop.eup %5662  ;;  %4320 = vst [vmem:[%s7347_s14 + $0x158] sm:$0xff] %v5661_v4  ;;  %5682 = vrcp.f32 %v4008_v49 }
 0x4c9   : > { %v5665_v41 = vpop.eup %5664  ;;  %4324 = vst [vmem:[%s7347_s14 + $0x178] sm:$0xff] %v5663_v16  ;;  %5684 = vrcp.f32 %v4005_v30 }
 0x4ca   : > { %v5667_v38 = vpop.eup %5666  ;;  %4326 = vst [vmem:[%s7347_s14 + $0x188] sm:$0xff] %v5665_v41  ;;  %5686 = vpow2.f32 %v4881_v27 }
 0x4cb   : > { %v5669_v39 = vpop.eup %5668  ;;  %4330 = vst [vmem:[%s7347_s14 + $0x1a8] sm:$0xff] %v5667_v38  ;;  %5688 = vpow2.f32 %v4883_v57 }
 0x4cc   : > { %v5671_v25 = vpop.eup %5670  ;;  %4327 = vst [vmem:[%s7347_s14 + $0x190] sm:$0xff] %v5669_v39  ;;  %5690 = vpow2.f32 %v4887_v35  ;;  %v7558_v44 = vpop.f32.mrb[108].mxu1 }
 0x4cd   : > { %v5673_v26 = vpop.eup %5672  ;;  %4331 = vst [vmem:[%s7347_s14 + $0x1b0] sm:$0xff] %v5671_v25  ;;  %5692 = vpow2.f32 %v4884_v24  ;;  %v7562_v46 = vpop.f32.mrb[109].mxu1 }
 0x4ce   : > { %v5675_v51 = vpop.eup %5674  ;;  %4333 = vst [vmem:[%s7347_s14 + $0x1c0] sm:$0xff] %v5673_v26  ;;  %5694 = vpow2.f32 %v4888_v60  ;;  %v7566_v20 = vpop.f32.mrb[110].mxu1 }
 0x4cf   : > { %v5677_v37 = vpop.eup %5676  ;;  %4337 = vst [vmem:[%s7347_s14 + $0x1e0] sm:$0xff] %v5675_v51  ;;  %5696 = vpow2.f32 %v4890_v62  ;;  %v7570_v56 = vpop.f32.mrb[111].mxu1 }
 0x4d0   : > { %v5679_v9 = vpop.eup %5678  ;;  %4334 = vst [vmem:[%s7347_s14 + $0x1c8] sm:$0xff] %v5677_v37  ;;  %5698 = vpow2.f32 %v4894_v50 }
 0x4d1   : > { %v5681_v47 = vpop.eup %5680  ;;  %4338 = vst [vmem:[%s7347_s14 + $0x1e8] sm:$0xff] %v5679_v9  ;;  %5700 = vpow2.f32 %v4891_v15 }
 0x4d2   : > { %v5683_v61 = vpop.eup %5682  ;;  %4340 = vst [vmem:[%s7347_s14 + $0x1f8] sm:$0xff] %v5681_v47  ;;  %5702 = vpow2.f32 %v4895_v32 }
 0x4d3   : > { %v5685_v1 = vpop.eup %5684  ;;  %4344 = vst [vmem:[%s7347_s14 + $0x218] sm:$0xff] %v5683_v61  ;;  %5704 = vpow2.f32 %v4897_v8  ;;  %v2568_v61 = vsub.s32 2, %v6621_v59 }
 0x4d4   : > { %v5687_v29 = vpop.eup %5686  ;;  %4341 = vst [vmem:[%s7347_s14 + $0x200] sm:$0xff] %v5685_v1  ;;  %5706 = vpow2.f32 %v4901_v12  ;;  %v7574_v4 = vpop.f32.mrb[112].mxu1 }
 0x4d5   : > { %v5689_v31 = vpop.eup %5688  ;;  %v4009_v11 = vadd.f32 1.0, %v5687_v29  ;;  %5708 = vpow2.f32 %v4898_v13  ;;  %v7576_v57 = vpop.f32.mrb[113].mxu1  ;;  %v4904_v13 = vmul.f32 -1.442695, %v7455_v3 }
 0x4d6   : > { %v5691_v2 = vpop.eup %5690  ;;  %v4011_v43 = vadd.f32 1.0, %v5689_v31  ;;  %5710 = vpow2.f32 %v4902_v23  ;;  %v7578_v41 = vpop.f32.mrb[114].mxu1  ;;  %v4908_v31 = vmul.f32 -1.442695, %v7458_v6  ;;  %v4911_v6 = vmul.f32 -1.442695, %v7476_v19 }
 0x4d7   : > { %v5693_v49 = vpop.eup %5692  ;;  %5712 = vrcp.f32 %v4009_v11  ;;  %v4015_v27 = vadd.f32 1.0, %v5691_v2  ;;  %v7580_v60 = vpop.f32.mrb[115].mxu1  ;;  %v4916_v19 = vmul.f32 -1.442695, %v7487_v17 }
 0x4d8   : > { %v5695_v45 = vpop.eup %5694  ;;  %5714 = vrcp.f32 %v4011_v43  ;;  %v4012_v30 = vadd.f32 1.0, %v5693_v49  ;;  %v4905_v43 = vmul.f32 -1.442695, %v7461_v7  ;;  %v4915_v7 = vmul.f32 -1.442695, %v7479_v22 }
 0x4d9   : > { %v5697_v16 = vpop.eup %5696  ;;  %5716 = vrcp.f32 %v4015_v27  ;;  %v4016_v35 = vadd.f32 1.0, %v5695_v45  ;;  %v4909_v27 = vmul.f32 -1.442695, %v7467_v34  ;;  %v4912_v34 = vmul.f32 -1.442695, %v7484_v28 }
 0x4da   : > { %v5699_v24 = vpop.eup %5698  ;;  %5718 = vrcp.f32 %v4012_v30  ;;  %v4018_v38 = vadd.f32 1.0, %v5697_v16  ;;  %v7600_v30 = vrot.slane %v7301_v36, %v2568_v61  ;;  %v4918_v22 = vmul.f32 -1.442695, %v7493_v48 }
 0x4db   : > { %v5701_v39 = vpop.eup %5700  ;;  %5720 = vrcp.f32 %v4016_v35  ;;  %v4022_v62 = vadd.f32 1.0, %v5699_v24  ;;  %v4919_v48 = vmul.f32 -1.442695, %v7505_v55 }
 0x4dc   : > { %v5703_v25 = vpop.eup %5702  ;;  %5722 = vrcp.f32 %v4018_v38  ;;  %v4019_v50 = vadd.f32 1.0, %v5701_v39  ;;  %v7582_v9 = vpop.f32.mrb[116].mxu1  ;;  %v3317_v39 = vadd.f32 %v7513_v42, %v7600_v30 }
 0x4dd   : > { %v5705_v26 = vpop.eup %5704  ;;  %5724 = vrcp.f32 %v4022_v62  ;;  %v4023_v15 = vadd.f32 1.0, %v5703_v25  ;;  %v7586_v23 = vpop.f32.mrb[117].mxu1  ;;  %v4922_v25 = vmul.f32 -1.442695, %v7499_v58 }
 0x4de   : > { %v5707_v51 = vpop.eup %5706  ;;  %5726 = vrcp.f32 %v4019_v50  ;;  %v4025_v32 = vadd.f32 1.0, %v5705_v26  ;;  %v7589_v11 = vpop.f32.mrb[118].mxu1  ;;  %v4815_v58 = vmul.f32 -1.442695, %v3317_v39 }
 0x4df   : > { %v5709_v37 = vpop.eup %5708  ;;  %5728 = vrcp.f32 %v4023_v15  ;;  %v4029_v8 = vadd.f32 1.0, %v5707_v51  ;;  %v7593_v3 = vpop.f32.mrb[119].mxu1  ;;  %v4923_v15 = vmul.f32 -1.442695, %v7508_v21  ;;  %v7633_v21 = vld [vmem:[%s7848_s9] sm:$0xff] }
 0x4e0   : > { %v5711_v12 = vpop.eup %5710  ;;  %5730 = vrcp.f32 %v4025_v32  ;;  %v4026_v47 = vadd.f32 1.0, %v5709_v37  ;;  %v2572_v32 = vsub.s32 3, %v6621_v59 }
 0x4e1   : > { %v5713_v1 = vpop.eup %5712  ;;  %5732 = vrcp.f32 %v4029_v8  ;;  %v4030_v29 = vadd.f32 1.0, %v5711_v12 }
 0x4e2   : > { %v5715_v2 = vpop.eup %5714  ;;  %4345 = vst [vmem:[%s7347_s14 + $0x220] sm:$0xff] %v5713_v1  ;;  %5734 = vrcp.f32 %v4026_v47  ;;  %v7636_v1 = vrot.slane %v7633_v21, %v2572_v32 }
 0x4e3   : > { %v5717_v49 = vpop.eup %5716  ;;  %4347 = vst [vmem:[%s7347_s14 + $0x230] sm:$0xff] %v5715_v2  ;;  %5736 = vrcp.f32 %v4030_v29 }
 0x4e4   : > { %v5719_v45 = vpop.eup %5718  ;;  %4351 = vst [vmem:[%s7347_s14 + $0x250] sm:$0xff] %v5717_v49  ;;  %5738 = vpow2.f32 %v4904_v13  ;;  %v7608_v38 = vpop.f32.mrb[120].mxu1 }
 0x4e5   : > { %v5721_v16 = vpop.eup %5720  ;;  %4348 = vst [vmem:[%s7347_s14 + $0x238] sm:$0xff] %v5719_v45  ;;  %5740 = vpow2.f32 %v4908_v31  ;;  %v7614_v62 = vpop.f32.mrb[121].mxu1 }
 0x4e6   : > { %v5723_v35 = vpop.eup %5722  ;;  %4352 = vst [vmem:[%s7347_s14 + $0x258] sm:$0xff] %v5721_v16  ;;  %5742 = vpow2.f32 %v4905_v43  ;;  %v7618_v17 = vpop.f32.mrb[122].mxu1 }
 0x4e7   : > { %v5725_v24 = vpop.eup %5724  ;;  %4354 = vst [vmem:[%s7347_s14 + $0x268] sm:$0xff] %v5723_v35  ;;  %5744 = vpow2.f32 %v4909_v27  ;;  %v7622_v26 = vpop.f32.mrb[123].mxu1 }
 0x4e8   : > { %v5727_v36 = vpop.eup %5726  ;;  %4358 = vst [vmem:[%s7347_s14 + $0x288] sm:$0xff] %v5725_v24  ;;  %5746 = vpow2.f32 %v4911_v6 }
 0x4e9   : > { %v5729_v28 = vpop.eup %5728  ;;  %4355 = vst [vmem:[%s7347_s14 + $0x270] sm:$0xff] %v5727_v36  ;;  %5748 = vpow2.f32 %v4915_v7 }
 0x4ea   : > { %v5731_v50 = vpop.eup %5730  ;;  %4359 = vst [vmem:[%s7347_s14 + $0x290] sm:$0xff] %v5729_v28  ;;  %5750 = vpow2.f32 %v4912_v34 }
 0x4eb   : > { %v5733_v42 = vpop.eup %5732  ;;  %4361 = vst [vmem:[%s7347_s14 + $0x2a0] sm:$0xff] %v5731_v50  ;;  %5752 = vpow2.f32 %v4916_v19  ;;  %v3319_v19 = vadd.f32 %v7516_v5, %v7636_v1  ;;  %v3323_v5 = vadd.f32 %v7522_v40, %v7636_v1 }
 0x4ec   : > { %v5735_v51 = vpop.eup %5734  ;;  %4365 = vst [vmem:[%s7347_s14 + $0x2c0] sm:$0xff] %v5733_v42  ;;  %5754 = vpow2.f32 %v4918_v22  ;;  %v3386_v47 = vpop.f32.mrb[124].mxu1 }
 0x4ed   : > { %v5737_v37 = vpop.eup %5736  ;;  %4362 = vst [vmem:[%s7347_s14 + $0x2a8] sm:$0xff] %v5735_v51  ;;  %5756 = vpow2.f32 %v4922_v25  ;;  %v7639_v29 = vadd.f32 %v3386_v47, %v7600_v30  ;;  %v7641_v31 = vpop.f32.mrb[125].mxu1  ;;  %v3321_v25 = vadd.f32 %v7519_v0, %v7600_v30 }
 0x4ee   : > { %v5739_v8 = vpop.eup %5738  ;;  %4366 = vst [vmem:[%s7347_s14 + $0x2c8] sm:$0xff] %v5737_v37  ;;  %5758 = vpow2.f32 %v4919_v48  ;;  %v3390_v49 = vpop.f32.mrb[126].mxu1 }
 0x4ef   : > { %v5741_v55 = vpop.eup %5740  ;;  %v4032_v12 = vadd.f32 1.0, %v5739_v8  ;;  %5760 = vpow2.f32 %v4923_v15  ;;  %v7644_v6 = vadd.f32 %v3390_v49, %v7600_v30  ;;  %v7646_v16 = vpop.f32.mrb[127].mxu1 }
 0x4f0   : > { %v5743_v13 = vpop.eup %5742  ;;  %v4036_v61 = vadd.f32 1.0, %v5741_v55  ;;  %5762 = vpow2.f32 %v4815_v58  ;;  %v4816_v58 = vmul.f32 -1.442695, %v3319_v19  ;;  %v3327_v55 = vadd.f32 %v7524_v14, %v7600_v30 }
 0x4f1   : > { %v5745_v2 = vpop.eup %5744  ;;  %5764 = vrcp.f32 %v4032_v12  ;;  %v4033_v43 = vadd.f32 1.0, %v5743_v13 }
 0x4f2   : > { %v5747_v27 = vpop.eup %5746  ;;  %5766 = vrcp.f32 %v4036_v61  ;;  %v4037_v45 = vadd.f32 1.0, %v5745_v2  ;;  %v4822_v61 = vmul.f32 -1.442695, %v3321_v25  ;;  %v3329_v2 = vadd.f32 %v7526_v33, %v7636_v1 }
 0x4f3   : > { %v5749_v7 = vpop.eup %5748  ;;  %5768 = vrcp.f32 %v4033_v43  ;;  %v4039_v35 = vadd.f32 1.0, %v5747_v27  ;;  %v3331_v27 = vadd.f32 %v7528_v53, %v7600_v30  ;;  %v4829_v33 = vmul.f32 -1.442695, %v3327_v55 }
 0x4f4   : > { %v5751_v34 = vpop.eup %5750  ;;  %5770 = vrcp.f32 %v4037_v45  ;;  %v4043_v24 = vadd.f32 1.0, %v5749_v7  ;;  %v4944_v42 = vpop.f32.mrb[128].mxu1  ;;  %v4823_v7 = vmul.f32 -1.442695, %v3323_v5  ;;  %v4830_v53 = vmul.f32 -1.442695, %v3329_v2 }
 0x4f5   : > { %v5753_v36 = vpop.eup %5752  ;;  %5772 = vrcp.f32 %v4039_v35  ;;  %v4040_v22 = vadd.f32 1.0, %v5751_v34  ;;  %v4945_v32 = vpop.f32.mrb[129].mxu1  ;;  %v3333_v35 = vadd.f32 %v7530_v54, %v7636_v1  ;;  %v4836_v54 = vmul.f32 -1.442695, %v3331_v27 }
 0x4f6   : > { %v5755_v39 = vpop.eup %5754  ;;  %5774 = vrcp.f32 %v4043_v24  ;;  %v4044_v28 = vadd.f32 1.0, %v5753_v36  ;;  %v7656_v0 = vadd.f32 %v4945_v32, %v4944_v42  ;;  %v4947_v12 = vpop.f32.mrb[130].mxu1  ;;  %v3337_v24 = vadd.f32 %v7534_v10, %v7600_v30 }
 0x4f7   : > { %v5757_v50 = vpop.eup %5756  ;;  %5776 = vrcp.f32 %v4040_v22  ;;  %v4046_v48 = vadd.f32 1.0, %v5755_v39  ;;  %v4948_v40 = vpop.f32.mrb[131].mxu1  ;;  %v3339_v36 = vadd.f32 %v7538_v52, %v7636_v1  ;;  %v3341_v39 = vadd.f32 %v7542_v18, %v7600_v30 }
 0x4f8   : > { %v5759_v15 = vpop.eup %5758  ;;  %5778 = vrcp.f32 %v4044_v28  ;;  %v4050_v51 = vadd.f32 1.0, %v5757_v50  ;;  %v7662_v14 = vadd.f32 %v4948_v40, %v4947_v12  ;;  %v4837_v10 = vmul.f32 -1.442695, %v3333_v35 }
 0x4f9   : > { %v5761_v37 = vpop.eup %5760  ;;  %5780 = vrcp.f32 %v4046_v48  ;;  %v4047_v8 = vadd.f32 1.0, %v5759_v15  ;;  %v3343_v50 = vadd.f32 %v7546_v63, %v7636_v1  ;;  %v4843_v52 = vmul.f32 -1.442695, %v3337_v24 }
 0x4fa   : > { %v5763_v47 = vpop.eup %5762  ;;  %5782 = vrcp.f32 %v4050_v51  ;;  %v4051_v13 = vadd.f32 1.0, %v5761_v37  ;;  %v3347_v15 = vadd.f32 %v7558_v44, %v7600_v30  ;;  %v4844_v5 = vmul.f32 -1.442695, %v3339_v36 }
 0x4fb   : > { %v5765_v43 = vpop.eup %5764  ;;  %5784 = vrcp.f32 %v4047_v8  ;;  %v3943_v49 = vadd.f32 1.0, %v5763_v47  ;;  %v3349_v63 = vadd.f32 %v7562_v46, %v7636_v1  ;;  %v4850_v8 = vmul.f32 -1.442695, %v3341_v39 }
 0x4fc   : > { %v5767_v45 = vpop.eup %5766  ;;  %4368 = vst [vmem:[%s7347_s14 + $0x2d8] sm:$0xff] %v5765_v43  ;;  %5786 = vrcp.f32 %v4051_v13  ;;  %v4950_v28 = vpop.f32.mrb[132].mxu1  ;;  %v4851_v12 = vmul.f32 -1.442695, %v3343_v50  ;;  %v4857_v13 = vmul.f32 -1.442695, %v3347_v15 }
 0x4fd   : > { %v5769_v34 = vpop.eup %5768  ;;  %4372 = vst [vmem:[%s7347_s14 + $0x2f8] sm:$0xff] %v5767_v45  ;;  %5788 = vrcp.f32 %v3943_v49  ;;  %v4951_v48 = vpop.f32.mrb[133].mxu1  ;;  %v4858_v46 = vmul.f32 -1.442695, %v3349_v63 }
 0x4fe   : > { %v5771_v19 = vpop.eup %5770  ;;  %4369 = vst [vmem:[%s7347_s14 + $0x2e0] sm:$0xff] %v5769_v34  ;;  %5790 = vpow2.f32 %v4816_v58  ;;  %v7682_v18 = vadd.f32 %v4951_v48, %v4950_v28  ;;  %v4953_v51 = vpop.f32.mrb[134].mxu1 }
 0x4ff   : > { %v5773_v22 = vpop.eup %5772  ;;  %4373 = vst [vmem:[%s7347_s14 + $0x300] sm:$0xff] %v5771_v19  ;;  %5792 = vpow2.f32 %v4822_v61  ;;  %v4954_v32 = vpop.f32.mrb[135].mxu1 }
 0x500   : > { %v5775_v25 = vpop.eup %5774  ;;  %4375 = vst [vmem:[%s7347_s14 + $0x310] sm:$0xff] %v5773_v22  ;;  %5794 = vpow2.f32 %v4823_v7  ;;  %v7688_v55 = vadd.f32 %v4954_v32, %v4953_v51  ;;  %v3351_v51 = vadd.f32 %v7566_v20, %v7600_v30  ;;  %v3353_v32 = vadd.f32 %v7570_v56, %v7636_v1 }
 0x501   : > { %v5777_v42 = vpop.eup %5776  ;;  %4379 = vst [vmem:[%s7347_s14 + $0x330] sm:$0xff] %v5775_v25  ;;  %5796 = vpow2.f32 %v4829_v33 }
 0x502   : > { %v5779_v58 = vpop.eup %5778  ;;  %4376 = vst [vmem:[%s7347_s14 + $0x318] sm:$0xff] %v5777_v42  ;;  %5798 = vpow2.f32 %v4830_v53 }
 0x503   : > { %v5781_v37 = vpop.eup %5780  ;;  %4380 = vst [vmem:[%s7347_s14 + $0x338] sm:$0xff] %v5779_v58  ;;  %5800 = vpow2.f32 %v4836_v54 }
 0x504   : > { %v5783_v44 = vpop.eup %5782  ;;  %4382 = vst [vmem:[%s7347_s14 + $0x348] sm:$0xff] %v5781_v37  ;;  %5802 = vpow2.f32 %v4837_v10  ;;  %v4956_v40 = vpop.f32.mrb[136].mxu1 }
 0x505   : > { %v5785_v47 = vpop.eup %5784  ;;  %4386 = vst [vmem:[%s7347_s14 + $0x368] sm:$0xff] %v5783_v44  ;;  %5804 = vpow2.f32 %v4843_v52  ;;  %v4957_v49 = vpop.f32.mrb[137].mxu1 }
 0x506   : > { %v5787_v61 = vpop.eup %5786  ;;  %4383 = vst [vmem:[%s7347_s14 + $0x350] sm:$0xff] %v5785_v47  ;;  %5806 = vpow2.f32 %v4844_v5  ;;  %v7695_v7 = vadd.f32 %v4957_v49, %v4956_v40  ;;  %v4959_v35 = vpop.f32.mrb[138].mxu1  ;;  %v3357_v47 = vadd.f32 %v7574_v4, %v7600_v30  ;;  %v3361_v49 = vadd.f32 %v7578_v41, %v7600_v30 }
 0x507   : > { %v5789_v2 = vpop.eup %5788  ;;  %4387 = vst [vmem:[%s7347_s14 + $0x370] sm:$0xff] %v5787_v61  ;;  %5808 = vpow2.f32 %v4850_v8  ;;  %v4960_v24 = vpop.f32.mrb[139].mxu1 }
 0x508   : > { %v5791_v43 = vpop.eup %5790  ;;  %4279 = vst [vmem:[%s7347_s14 + $0x10] sm:$0xff] %v5789_v2  ;;  %5810 = vpow2.f32 %v4851_v12  ;;  %v7697_v36 = vadd.f32 %v4960_v24, %v4959_v35  ;;  %v3363_v35 = vadd.f32 %v7580_v60, %v7636_v1  ;;  %v4878_v60 = vmul.f32 -1.442695, %v3361_v49 }
 0x509   : > { %v5793_v27 = vpop.eup %5792  ;;  %v3944_v45 = vadd.f32 1.0, %v5791_v43  ;;  %5812 = vpow2.f32 %v4857_v13  ;;  %v4864_v43 = vmul.f32 -1.442695, %v3351_v51 }
 0x50a   : > { %v5795_v34 = vpop.eup %5794  ;;  %v3950_v33 = vadd.f32 1.0, %v5793_v27  ;;  %5814 = vpow2.f32 %v4858_v46  ;;  %v3359_v46 = vadd.f32 %v7576_v57, %v7636_v1  ;;  %v4871_v57 = vmul.f32 -1.442695, %v3357_v47 }
 0x50b   : > { %v5797_v19 = vpop.eup %5796  ;;  %5816 = vrcp.f32 %v3944_v45  ;;  %v3951_v53 = vadd.f32 1.0, %v5795_v34  ;;  %v4865_v45 = vmul.f32 -1.442695, %v3353_v32 }
 0x50c   : > { %v5799_v22 = vpop.eup %5798  ;;  %5818 = vrcp.f32 %v3950_v33  ;;  %v3957_v54 = vadd.f32 1.0, %v5797_v19  ;;  %v4962_v42 = vpop.f32.mrb[140].mxu1  ;;  %v3367_v33 = vadd.f32 %v7582_v9, %v7600_v30  ;;  %v4872_v41 = vmul.f32 -1.442695, %v3359_v46 }
 0x50d   : > { %v5801_v39 = vpop.eup %5800  ;;  %5820 = vrcp.f32 %v3951_v53  ;;  %v3958_v28 = vadd.f32 1.0, %v5799_v22  ;;  %v4963_v58 = vpop.f32.mrb[141].mxu1  ;;  %v3369_v19 = vadd.f32 %v7586_v23, %v7636_v1  ;;  %v4879_v9 = vmul.f32 -1.442695, %v3363_v35 }
 0x50e   : > { %v5803_v25 = vpop.eup %5802  ;;  %5822 = vrcp.f32 %v3957_v54  ;;  %v3964_v10 = vadd.f32 1.0, %v5801_v39  ;;  %v7703_v37 = vadd.f32 %v4963_v58, %v4962_v42  ;;  %v4965_v8 = vpop.f32.mrb[142].mxu1  ;;  %v3371_v54 = vadd.f32 %v7589_v11, %v7600_v30 }
 0x50f   : > { %v5805_v50 = vpop.eup %5804  ;;  %5824 = vrcp.f32 %v3958_v28  ;;  %v3965_v48 = vadd.f32 1.0, %v5803_v25  ;;  %v4966_v13 = vpop.f32.mrb[143].mxu1  ;;  %v3373_v25 = vadd.f32 %v7593_v3, %v7636_v1  ;;  %v3377_v11 = vadd.f32 %v7608_v38, %v7600_v30 }
 0x510   : > { %v5807_v52 = vpop.eup %5806  ;;  %5826 = vrcp.f32 %v3964_v10  ;;  %v3971_v15 = vadd.f32 1.0, %v5805_v50  ;;  %v7709_v2 = vadd.f32 %v4966_v13, %v4965_v8  ;;  %v3379_v3 = vadd.f32 %v7614_v62, %v7636_v1 }
 0x511   : > { %v5809_v5 = vpop.eup %5808  ;;  %5828 = vrcp.f32 %v3965_v48  ;;  %v3972_v63 = vadd.f32 1.0, %v5807_v52  ;;  %v4885_v48 = vmul.f32 -1.442695, %v3367_v33  ;;  %v3381_v38 = vadd.f32 %v7618_v17, %v7600_v30 }
 0x512   : > { %v5811_v44 = vpop.eup %5810  ;;  %5830 = vrcp.f32 %v3971_v15  ;;  %v3978_v12 = vadd.f32 1.0, %v5809_v5  ;;  %v4886_v15 = vmul.f32 -1.442695, %v3369_v19  ;;  %v4892_v5 = vmul.f32 -1.442695, %v3371_v54 }
 0x513   : > { %v5813_v61 = vpop.eup %5812  ;;  %5832 = vrcp.f32 %v3972_v63  ;;  %v3979_v20 = vadd.f32 1.0, %v5811_v44  ;;  %v4893_v32 = vmul.f32 -1.442695, %v3373_v25  ;;  %v4899_v62 = vmul.f32 -1.442695, %v3377_v11 }
 0x514   : > { %v5815_v56 = vpop.eup %5814  ;;  %5834 = vrcp.f32 %v3978_v12  ;;  %v3985_v40 = vadd.f32 1.0, %v5813_v61  ;;  %v4968_v53 = vpop.f32.mrb[144].mxu1  ;;  %v4900_v12 = vmul.f32 -1.442695, %v3379_v3  ;;  %v4906_v61 = vmul.f32 -1.442695, %v3381_v38 }
 0x515   : > { %v5817_v27 = vpop.eup %5816  ;;  %5836 = vrcp.f32 %v3979_v20  ;;  %v3986_v4 = vadd.f32 1.0, %v5815_v56  ;;  %v4969_v39 = vpop.f32.mrb[145].mxu1  ;;  %v2584_v19 = vsub.s32 6, %v6621_v59 }
 0x516   : > { %v5819_v34 = vpop.eup %5818  ;;  %4280 = vst [vmem:[%s7347_s14 + $0x18] sm:$0xff] %v5817_v27  ;;  %5838 = vrcp.f32 %v3985_v40  ;;  %v7727_v23 = vadd.f32 %v4969_v39, %v4968_v53  ;;  %v4971_v10 = vpop.f32.mrb[146].mxu1 }
 0x517   : > { %v5821_v24 = vpop.eup %5820  ;;  %4286 = vst [vmem:[%s7347_s14 + $0x48] sm:$0xff] %v5819_v34  ;;  %5840 = vrcp.f32 %v3986_v4  ;;  %v4972_v42 = vpop.f32.mrb[147].mxu1 }
 0x518   : > { %v5823_v22 = vpop.eup %5822  ;;  %4287 = vst [vmem:[%s7347_s14 + $0x50] sm:$0xff] %v5821_v24  ;;  %5842 = vpow2.f32 %v4864_v43  ;;  %v7735_v51 = vadd.f32 %v4972_v42, %v4971_v10 }
 0x519   : > { %v5825_v28 = vpop.eup %5824  ;;  %4293 = vst [vmem:[%s7347_s14 + $0x80] sm:$0xff] %v5823_v22  ;;  %5844 = vpow2.f32 %v4865_v45 }
 0x51a   : > { %v5827_v50 = vpop.eup %5826  ;;  %4294 = vst [vmem:[%s7347_s14 + $0x88] sm:$0xff] %v5825_v28  ;;  %5846 = vpow2.f32 %v4871_v57 }
 0x51b   : > { %v5829_v52 = vpop.eup %5828  ;;  %4300 = vst [vmem:[%s7347_s14 + $0xb8] sm:$0xff] %v5827_v50  ;;  %5848 = vpow2.f32 %v4872_v41 }
 0x51c   : > { %v5831_v58 = vpop.eup %5830  ;;  %4301 = vst [vmem:[%s7347_s14 + $0xc0] sm:$0xff] %v5829_v52  ;;  %5850 = vpow2.f32 %v4878_v60  ;;  %v4974_v47 = vpop.f32.mrb[148].mxu1  ;;  %v7756_v52 = vrot.slane %v7633_v21, %v2584_v19  ;;  %v3393_v21 = vadd.f32 %v7646_v16, %v7636_v1  ;;  %v4920_v16 = vmul.f32 -1.442695, %v7644_v6 }
 0x51d   : > { %v5833_v63 = vpop.eup %5832  ;;  %4307 = vst [vmem:[%s7347_s14 + $0xf0] sm:$0xff] %v5831_v58  ;;  %5852 = vpow2.f32 %v4879_v9  ;;  %v4975_v30 = vpop.f32.mrb[149].mxu1 }
 0x51e   : > { %v5835_v8 = vpop.eup %5834  ;;  %4308 = vst [vmem:[%s7347_s14 + $0xf8] sm:$0xff] %v5833_v63  ;;  %5854 = vpow2.f32 %v4885_v48  ;;  %v7745_v20 = vadd.f32 %v4975_v30, %v4974_v47  ;;  %v4977_v46 = vpop.f32.mrb[150].mxu1  ;;  %v3383_v48 = vadd.f32 %v7622_v26, %v7636_v1  ;;  %v3546_v30 = vadd.f32 %v7662_v14, %v7756_v52 }
 0x51f   : > { %v5837_v44 = vpop.eup %5836  ;;  %4314 = vst [vmem:[%s7347_s14 + $0x128] sm:$0xff] %v5835_v8  ;;  %5856 = vpow2.f32 %v4886_v15  ;;  %v4978_v40 = vpop.f32.mrb[151].mxu1  ;;  %v3554_v14 = vadd.f32 %v7688_v55, %v7756_v52 }
 0x520   : > { %v5839_v13 = vpop.eup %5838  ;;  %4315 = vst [vmem:[%s7347_s14 + $0x130] sm:$0xff] %v5837_v44  ;;  %5858 = vpow2.f32 %v4892_v5  ;;  %v7748_v27 = vadd.f32 %v4978_v40, %v4977_v46  ;;  %v3389_v5 = vadd.f32 %v7641_v31, %v7636_v1  ;;  %v4907_v8 = vmul.f32 -1.442695, %v3383_v48 }
 0x521   : > { %v5841_v17 = vpop.eup %5840  ;;  %4321 = vst [vmem:[%s7347_s14 + $0x160] sm:$0xff] %v5839_v13  ;;  %5860 = vpow2.f32 %v4893_v32  ;;  %v3543_v31 = vadd.f32 %v7656_v0, %v7756_v52  ;;  %v4921_v40 = vmul.f32 -1.442695, %v3393_v21 }
 0x522   : > { %v5843_v56 = vpop.eup %5842  ;;  %4322 = vst [vmem:[%s7347_s14 + $0x168] sm:$0xff] %v5841_v17  ;;  %5862 = vpow2.f32 %v4899_v62 }
 0x523   : > { %v5845_v43 = vpop.eup %5844  ;;  %v3992_v49 = vadd.f32 1.0, %v5843_v56  ;;  %5864 = vpow2.f32 %v4900_v12  ;;  %v4913_v12 = vmul.f32 -1.442695, %v7639_v29  ;;  %v3551_v29 = vadd.f32 %v7682_v18, %v7756_v52 }
 0x524   : > { %v5847_v4 = vpop.eup %5846  ;;  %v3993_v45 = vadd.f32 1.0, %v5845_v43  ;;  %5866 = vpow2.f32 %v4906_v61  ;;  %v4980_v53 = vpop.f32.mrb[152].mxu1  ;;  %v4914_v61 = vmul.f32 -1.442695, %v3389_v5  ;;  %v4819_v6 = vmul.f32 -1.442695, %v3543_v31 }
 0x525   : > { %v5849_v35 = vpop.eup %5848  ;;  %5868 = vrcp.f32 %v3992_v49  ;;  %v3999_v34 = vadd.f32 1.0, %v5847_v4  ;;  %v4981_v54 = vpop.f32.mrb[153].mxu1  ;;  %v3559_v18 = vadd.f32 %v7695_v7, %v7756_v52  ;;  %v3578_v31 = vadd.f32 %v7735_v51, %v7756_v52 }
 0x526   : > { %v5851_v57 = vpop.eup %5850  ;;  %5870 = vrcp.f32 %v3993_v45  ;;  %v4000_v33 = vadd.f32 1.0, %v5849_v35  ;;  %v7751_v9 = vadd.f32 %v4981_v54, %v4980_v53  ;;  %v4983_v25 = vpop.f32.mrb[154].mxu1  ;;  %v4826_v35 = vmul.f32 -1.442695, %v3546_v30 }
 0x527   : > { %v5853_v24 = vpop.eup %5852  ;;  %5872 = vrcp.f32 %v3999_v34  ;;  %v4006_v41 = vadd.f32 1.0, %v5851_v57  ;;  %v4984_v11 = vpop.f32.mrb[155].mxu1  ;;  %v3562_v34 = vadd.f32 %v7697_v36, %v7756_v52  ;;  %v4833_v57 = vmul.f32 -1.442695, %v3551_v29 }
 0x528   : > { %v5855_v22 = vpop.eup %5854  ;;  %5874 = vrcp.f32 %v4000_v33  ;;  %v4007_v60 = vadd.f32 1.0, %v5853_v24  ;;  %v7758_v15 = vadd.f32 %v4984_v11, %v4983_v25  ;;  %v3567_v33 = vadd.f32 %v7703_v37, %v7756_v52 }
 0x529   : > { %v5857_v39 = vpop.eup %5856  ;;  %5876 = vrcp.f32 %v4006_v41  ;;  %v4013_v28 = vadd.f32 1.0, %v5855_v22  ;;  %v4840_v24 = vmul.f32 -1.442695, %v3554_v14  ;;  %v3570_v41 = vadd.f32 %v7709_v2, %v7756_v52 }
 0x52a   : > { %v5859_v10 = vpop.eup %5858  ;;  %5878 = vrcp.f32 %v4007_v60  ;;  %v4014_v50 = vadd.f32 1.0, %v5857_v39  ;;  %v4847_v36 = vmul.f32 -1.442695, %v3559_v18  ;;  %v4854_v22 = vmul.f32 -1.442695, %v3562_v34 }
 0x52b   : > { %v5861_v42 = vpop.eup %5860  ;;  %5880 = vrcp.f32 %v4013_v28  ;;  %v4020_v59 = vadd.f32 1.0, %v5859_v10  ;;  %v4861_v37 = vmul.f32 -1.442695, %v3567_v33  ;;  %v4868_v39 = vmul.f32 -1.442695, %v3570_v41 }
 0x52c   : > { %v5863_v3 = vpop.eup %5862  ;;  %5882 = vrcp.f32 %v4014_v50  ;;  %v4021_v58 = vadd.f32 1.0, %v5861_v42  ;;  %v4986_v47 = vpop.f32.mrb[156].mxu1  ;;  %v3591_v51 = vadd.f32 %v7751_v9, %v7756_v52 }
 0x52d   : > { %v5865_v38 = vpop.eup %5864  ;;  %5884 = vrcp.f32 %v4020_v59  ;;  %v4027_v63 = vadd.f32 1.0, %v5863_v3  ;;  %v4987_v17 = vpop.f32.mrb[157].mxu1 }
 0x52e   : > { %v5867_v26 = vpop.eup %5866  ;;  %5886 = vrcp.f32 %v4021_v58  ;;  %v4028_v32 = vadd.f32 1.0, %v5865_v38  ;;  %v7774_v0 = vadd.f32 %v4987_v17, %v4986_v47  ;;  %v4989_v46 = vpop.f32.mrb[158].mxu1 }
 0x52f   : > { %v5869_v62 = vpop.eup %5868  ;;  %5888 = vrcp.f32 %v4027_v63  ;;  %v4034_v44 = vadd.f32 1.0, %v5867_v26  ;;  %v4990_v43 = vpop.f32.mrb[159].mxu1 }
 0x530   : > { %v5871_v13 = vpop.eup %5870  ;;  %4328 = vst [vmem:[%s7347_s14 + $0x198] sm:$0xff] %v5869_v62  ;;  %5890 = vrcp.f32 %v4028_v32  ;;  %v7782_v4 = vadd.f32 %v4990_v43, %v4989_v46  ;;  %v3575_v62 = vadd.f32 %v7727_v23, %v7756_v52  ;;  %v3599_v43 = vadd.f32 %v7774_v0, %v7756_v52 }
 0x531   : > { %v5873_v1 = vpop.eup %5872  ;;  %4329 = vst [vmem:[%s7347_s14 + $0x1a0] sm:$0xff] %v5871_v13  ;;  %5892 = vrcp.f32 %v4034_v44 }
 0x532   : > { %v5875_v56 = vpop.eup %5874  ;;  %4335 = vst [vmem:[%s7347_s14 + $0x1d0] sm:$0xff] %v5873_v1  ;;  %5894 = vpow2.f32 %v4907_v8  ;;  %v3586_v1 = vadd.f32 %v7748_v27, %v7756_v52  ;;  %v4875_v29 = vmul.f32 -1.442695, %v3575_v62  ;;  %v4917_v34 = vmul.f32 -1.442695, %v3599_v43 }
 0x533   : > { %v5877_v49 = vpop.eup %5876  ;;  %4336 = vst [vmem:[%s7347_s14 + $0x1d8] sm:$0xff] %v5875_v56  ;;  %5896 = vpow2.f32 %v4913_v12 }
 0x534   : > { %v5879_v45 = vpop.eup %5878  ;;  %4342 = vst [vmem:[%s7347_s14 + $0x208] sm:$0xff] %v5877_v49  ;;  %5898 = vpow2.f32 %v4914_v61  ;;  %v3583_v61 = vadd.f32 %v7745_v20, %v7756_v52  ;;  %v4882_v20 = vmul.f32 -1.442695, %v3578_v31  ;;  %v4896_v9 = vmul.f32 -1.442695, %v3586_v1 }
 0x535   : > { %v5881_v55 = vpop.eup %5880  ;;  %4343 = vst [vmem:[%s7347_s14 + $0x210] sm:$0xff] %v5879_v45  ;;  %5900 = vpow2.f32 %v4920_v16 }
 0x536   : > { %v5883_v7 = vpop.eup %5882  ;;  %4349 = vst [vmem:[%s7347_s14 + $0x240] sm:$0xff] %v5881_v55  ;;  %5902 = vpow2.f32 %v4921_v40  ;;  %v3594_v40 = vadd.f32 %v7758_v15, %v7756_v52  ;;  %v4889_v27 = vmul.f32 -1.442695, %v3583_v61  ;;  %v4903_v15 = vmul.f32 -1.442695, %v3591_v51 }
 0x537   : > { %v5885_v19 = vpop.eup %5884  ;;  %4350 = vst [vmem:[%s7347_s14 + $0x248] sm:$0xff] %v5883_v7  ;;  %5904 = vpow2.f32 %v4819_v6  ;;  %v3602_v6 = vadd.f32 %v7782_v4, %v7756_v52 }
 0x538   : > { %v5887_v53 = vpop.eup %5886  ;;  %4356 = vst [vmem:[%s7347_s14 + $0x278] sm:$0xff] %v5885_v19  ;;  %5906 = vpow2.f32 %v4826_v35  ;;  %v4910_v35 = vmul.f32 -1.442695, %v3594_v40 }
 0x539   : > { %v5889_v60 = vpop.eup %5888  ;;  %4357 = vst [vmem:[%s7347_s14 + $0x280] sm:$0xff] %v5887_v53  ;;  %5908 = vpow2.f32 %v4833_v57  ;;  %v4924_v52 = vmul.f32 -1.442695, %v3602_v6 }
 0x53a   : > { %v5891_v54 = vpop.eup %5890  ;;  %4363 = vst [vmem:[%s7347_s14 + $0x2b0] sm:$0xff] %v5889_v60  ;;  %5910 = vpow2.f32 %v4840_v24 }
 0x53b   : > { %v5893_v28 = vpop.eup %5892  ;;  %4364 = vst [vmem:[%s7347_s14 + $0x2b8] sm:$0xff] %v5891_v54  ;;  %5912 = vpow2.f32 %v4847_v36 }
 0x53c   : > { %v5895_v2 = vpop.eup %5894  ;;  %4370 = vst [vmem:[%s7347_s14 + $0x2e8] sm:$0xff] %v5893_v28  ;;  %5914 = vpow2.f32 %v4854_v22 }
 0x53d   : > { %v5897_v25 = vpop.eup %5896  ;;  %v4035_v10 = vadd.f32 1.0, %v5895_v2  ;;  %5916 = vpow2.f32 %v4861_v37 }
 0x53e   : > { %v5899_v50 = vpop.eup %5898  ;;  %v4041_v48 = vadd.f32 1.0, %v5897_v25  ;;  %5918 = vpow2.f32 %v4868_v39 }
 0x53f   : > { %v5901_v11 = vpop.eup %5900  ;;  %5920 = vrcp.f32 %v4035_v10  ;;  %v4042_v42 = vadd.f32 1.0, %v5899_v50 }
 0x540   : > { %v5903_v59 = vpop.eup %5902  ;;  %5922 = vrcp.f32 %v4041_v48  ;;  %v4048_v3 = vadd.f32 1.0, %v5901_v11 }
 0x541   : > { %v5905_v58 = vpop.eup %5904  ;;  %5924 = vrcp.f32 %v4042_v42  ;;  %v4049_v5 = vadd.f32 1.0, %v5903_v59 }
 0x542   : > { %v5907_v38 = vpop.eup %5906  ;;  %5926 = vrcp.f32 %v4048_v3  ;;  %v3947_v63 = vadd.f32 1.0, %v5905_v58 }
 0x543   : > { %v5909_v26 = vpop.eup %5908  ;;  %5928 = vrcp.f32 %v4049_v5  ;;  %v3954_v32 = vadd.f32 1.0, %v5907_v38 }
 0x544   : > { %v5911_v8 = vpop.eup %5910  ;;  %5930 = vrcp.f32 %v3947_v63  ;;  %v3961_v21 = vadd.f32 1.0, %v5909_v26 }
 0x545   : > { %v5913_v44 = vpop.eup %5912  ;;  %5932 = vrcp.f32 %v3954_v32  ;;  %v3968_v12 = vadd.f32 1.0, %v5911_v8 }
 0x546   : > { %v5915_v47 = vpop.eup %5914  ;;  %5934 = vrcp.f32 %v3961_v21  ;;  %v3975_v13 = vadd.f32 1.0, %v5913_v44 }
 0x547   : > { %v5917_v30 = vpop.eup %5916  ;;  %5936 = vrcp.f32 %v3968_v12  ;;  %v3982_v17 = vadd.f32 1.0, %v5915_v47 }
 0x548   : > { %v5919_v23 = vpop.eup %5918  ;;  %5938 = vrcp.f32 %v3975_v13  ;;  %v3989_v16 = vadd.f32 1.0, %v5917_v30 }
 0x549   : > { %v5921_v46 = vpop.eup %5920  ;;  %5940 = vrcp.f32 %v3982_v17  ;;  %v3996_v56 = vadd.f32 1.0, %v5919_v23 }
 0x54a   : > { %v5923_v14 = vpop.eup %5922  ;;  %4371 = vst [vmem:[%s7347_s14 + $0x2f0] sm:$0xff] %v5921_v46  ;;  %5942 = vrcp.f32 %v3989_v16 }
 0x54b   : > { %v5925_v49 = vpop.eup %5924  ;;  %4377 = vst [vmem:[%s7347_s14 + $0x320] sm:$0xff] %v5923_v14  ;;  %5944 = vrcp.f32 %v3996_v56 }
 0x54c   : > { %v5927_v18 = vpop.eup %5926  ;;  %4378 = vst [vmem:[%s7347_s14 + $0x328] sm:$0xff] %v5925_v49  ;;  %5946 = vpow2.f32 %v4875_v29 }
 0x54d   : > { %v5929_v45 = vpop.eup %5928  ;;  %4384 = vst [vmem:[%s7347_s14 + $0x358] sm:$0xff] %v5927_v18  ;;  %5948 = vpow2.f32 %v4882_v20 }
 0x54e   : > { %v5931_v0 = vpop.eup %5930  ;;  %4385 = vst [vmem:[%s7347_s14 + $0x360] sm:$0xff] %v5929_v45  ;;  %5950 = vpow2.f32 %v4889_v27 }
 0x54f   : > { %v5933_v55 = vpop.eup %5932  ;;  %4283 = vst [vmem:[%s7347_s14 + $0x30] sm:$0xff] %v5931_v0  ;;  %5952 = vpow2.f32 %v4896_v9 }
 0x550   : > { %v5935_v4 = vpop.eup %5934  ;;  %4290 = vst [vmem:[%s7347_s14 + $0x68] sm:$0xff] %v5933_v55  ;;  %5954 = vpow2.f32 %v4903_v15 }
 0x551   : > { %v5937_v57 = vpop.eup %5936  ;;  %4297 = vst [vmem:[%s7347_s14 + $0xa0] sm:$0xff] %v5935_v4  ;;  %5956 = vpow2.f32 %v4910_v35 }
 0x552   : > { %v5939_v33 = vpop.eup %5938  ;;  %4304 = vst [vmem:[%s7347_s14 + $0xd8] sm:$0xff] %v5937_v57  ;;  %5958 = vpow2.f32 %v4917_v34 }
 0x553   : > { %v5941_v7 = vpop.eup %5940  ;;  %4311 = vst [vmem:[%s7347_s14 + $0x110] sm:$0xff] %v5939_v33  ;;  %5960 = vpow2.f32 %v4924_v52 }
 0x554   : > { %v5943_v24 = vpop.eup %5942  ;;  %4318 = vst [vmem:[%s7347_s14 + $0x148] sm:$0xff] %v5941_v7 }
 0x555   : > { %v5945_v41 = vpop.eup %5944  ;;  %4325 = vst [vmem:[%s7347_s14 + $0x180] sm:$0xff] %v5943_v24 }
 0x556   : > { %v5947_v19 = vpop.eup %5946  ;;  %4332 = vst [vmem:[%s7347_s14 + $0x1b8] sm:$0xff] %v5945_v41 }
 0x557   : > { %v5949_v36 = vpop.eup %5948  ;;  %v4003_v53 = vadd.f32 1.0, %v5947_v19 }
 0x558   : > { %v5951_v22 = vpop.eup %5950  ;;  %v4010_v60 = vadd.f32 1.0, %v5949_v36 }
 0x559   : > { %v5953_v37 = vpop.eup %5952  ;;  %5962 = vrcp.f32 %v4003_v53  ;;  %v4017_v54 = vadd.f32 1.0, %v5951_v22 }
 0x55a   : > { %v5955_v39 = vpop.eup %5954  ;;  %5964 = vrcp.f32 %v4010_v60  ;;  %v4024_v28 = vadd.f32 1.0, %v5953_v37 }
 0x55b   : > { %v5957_v2 = vpop.eup %5956  ;;  %5966 = vrcp.f32 %v4017_v54  ;;  %v4031_v25 = vadd.f32 1.0, %v5955_v39 }
 0x55c   : > { %v5959_v10 = vpop.eup %5958  ;;  %5968 = vrcp.f32 %v4024_v28  ;;  %v4038_v50 = vadd.f32 1.0, %v5957_v2 }
 0x55d   : > { %v5961_v48 = vpop.eup %5960  ;;  %5970 = vrcp.f32 %v4031_v25  ;;  %v4045_v11 = vadd.f32 1.0, %v5959_v10 }
 0x55e   : > { %5972 = vrcp.f32 %v4038_v50  ;;  %v4052_v42 = vadd.f32 1.0, %v5961_v48 }
 0x55f   : > { %5974 = vrcp.f32 %v4045_v11 }
 0x560   : > { %5976 = vrcp.f32 %v4052_v42 }
 0x563   : > { %v5963_v59 = vpop.eup %5962 }
 0x564   : > { %v5965_v3 = vpop.eup %5964  ;;  %4339 = vst [vmem:[%s7347_s14 + $0x1f0] sm:$0xff] %v5963_v59 }
 0x565   : > { %v5967_v58 = vpop.eup %5966  ;;  %4346 = vst [vmem:[%s7347_s14 + $0x228] sm:$0xff] %v5965_v3 }
 0x566   : > { %v5969_v5 = vpop.eup %5968  ;;  %4353 = vst [vmem:[%s7347_s14 + $0x260] sm:$0xff] %v5967_v58 }
 0x567   : > { %v5971_v38 = vpop.eup %5970  ;;  %4360 = vst [vmem:[%s7347_s14 + $0x298] sm:$0xff] %v5969_v5 }
 0x568   : > { %v5973_v63 = vpop.eup %5972  ;;  %4367 = vst [vmem:[%s7347_s14 + $0x2d0] sm:$0xff] %v5971_v38 }
 0x569   : > { %v5975_v26 = vpop.eup %5974  ;;  %4374 = vst [vmem:[%s7347_s14 + $0x308] sm:$0xff] %v5973_v63 }
 0x56a   : > { %v5977_v32 = vpop.eup %5976  ;;  %4381 = vst [vmem:[%s7347_s14 + $0x340] sm:$0xff] %v5975_v26 }
 0x56b   : > { %4388 = vst [vmem:[%s7347_s14 + $0x378] sm:$0xff] %v5977_v32 }
 0x56c PF: > { %s22_s17 = sadd.s32 1, %s5985_s17  }
 0x56d   : > { %p19_p4 = scmp.ge.s32.totalorder %s22_s17, 4  }
 0x56f   :  { %21 = sbr.rel (!%p19_p4) target bundleno = 1 (0x1), region = 105 }

</bundles_post_ra>
